<compile_context>
chip_gen: v7x
topology: tpu7x:2x2x1
jax: 0.10.0
libtpu: 0.0.40
codegen_flags: <defaults>
</compile_context>

<pallas_src>
import jax
import jax.numpy as jnp
from jax import lax
from jax.experimental import pallas as pl
from jax.experimental.pallas import tpu as pltpu


def cnn_kernel(x_ref, w1_ref, b1_ref, cw_ref, cb_ref, w2_ref, b2_ref,
               wo_ref, bo_ref, out_ref):
    TB, L, D = x_ref.shape
    H = w1_ref.shape[1]
    NC, KH = cw_ref.shape[0], cw_ref.shape[1]     # KH = K * H (taps stacked on contraction)
    K = KH // H
    pad = K // 2
    M = TB * L
    bf16 = jnp.bfloat16

    # ---- Linear(input_dim -> H) + folded BN + ReLU (Dropout = identity) ----------------
    x = x_ref[...].reshape(M, D).astype(bf16)
    h = jnp.dot(x, w1_ref[...], preferred_element_type=jnp.float32) + b1_ref[...]
    h = jnp.maximum(h, 0.0)                                     # (M, H) f32

    # ---- hoisted edge masks: depend only on the tap offset d, not on the layer ----------
    l_idx = lax.broadcasted_iota(jnp.int32, (TB, L, H), 1)
    edge_mask = {}
    for k in range(K):
        d = k - pad
        if d != 0:
            lo, hi = max(0, -d), min(L, L - d)
            edge_mask[d] = (l_idx >= lo) & (l_idx < hi)

    # ---- conv stack: 'same' Conv1d == (rolled+masked taps stacked on lanes) @ (K*H, H) ---
    for nc in range(NC):                                        # statically unrolled
        h3 = h.reshape(TB, L, H)
        taps = []
        for k in range(K):
            d = k - pad                                         # tap offset along L
            if d == 0:
                src = h3
            else:
                rolled = pltpu.roll(h3, shift=(-d) % L, axis=1)  # XLU sublane rotate (f32)
                src = jnp.where(edge_mask[d], rolled, 0.0)       # zero wrapped-around rows
            taps.append(src.astype(bf16))
        src_cat = jnp.concatenate(taps, axis=-1).reshape(M, KH)  # (M, K*H) bf16
        acc = jnp.dot(src_cat, cw_ref[nc],                       # one deep MXU matmul/layer
                      preferred_element_type=jnp.float32)
        h = jnp.maximum(acc + cb_ref[nc], 0.0)                   # folded BN + ReLU

    # ---- Linear(H -> H) + folded BN + ReLU ----------------------------------------------
    h = jnp.dot(h.astype(bf16), w2_ref[...],
                preferred_element_type=jnp.float32) + b2_ref[...]
    h = jnp.maximum(h, 0.0)

    # ---- output head Linear(H -> 1): VPU mul + lane reduce; lane-dense (1,1,M) store -----
    o = jnp.sum(h * wo_ref[...], axis=-1).reshape(1, 1, M) + bo_ref[...].reshape(1, 1, 1)
    out_ref[...] = jnp.tanh(o)


def cnn_forward(x, p, *, batch_block=32):
    """x: (B, L, input_dim) f32; p: prepared (BN-folded, bf16-weight) params."""
    B, L, D = x.shape
    TB = min(batch_block, B)
    assert B % TB == 0, "batch must be divisible by the batch block"
    assert L % 8 == 0, "keep L sublane-aligned so in-kernel reshapes are layout-free"
    assert (TB * L) % 128 == 0, "output slab must be lane-dense (TB*L multiple of 128)"
    G = B // TB

    def const_spec(a):                      # whole-array block, constant index map
        nd = a.ndim
        return pl.BlockSpec(a.shape, lambda b, _nd=nd: (0,) * _nd)

    weight_order = ["w1", "b1", "cw", "cb", "w2", "b2", "wo", "bo"]
    in_specs = [pl.BlockSpec((TB, L, D), lambda b: (b, 0, 0))]
    in_specs += [const_spec(p[k]) for k in weight_order]

    out = pl.pallas_call(
        cnn_kernel,
        out_shape=jax.ShapeDtypeStruct((G, 1, TB * L), jnp.float32),
        grid=(G,),
        in_specs=in_specs,
        out_specs=pl.BlockSpec((1, 1, TB * L), lambda b: (b, 0, 0)),
        compiler_params=pltpu.CompilerParams(
            dimension_semantics=("parallel",),      # shard batch blocks across TCs (v7x)
            vmem_limit_bytes=48 * 1024 * 1024,      # <= v7x 64 MiB physical; > 32 MiB default
        ),
    )(x, *[p[k] for k in weight_order])
    return out.reshape(B, L)


def init_params(key, input_dim, hidden_dim, num_layers, kernel_size):
    """Deterministic synthetic parameters (shapes match the PyTorch module, eval mode)."""
    assert kernel_size % 2 == 1, "'same' conv via pad=K//2 matches PyTorch only for odd K"
    NC = num_layers - 1
    keys = jax.random.split(key, 5)
    sc = 0.1
    eps = 1e-5
    # BatchNorm1d at init: gamma=1, beta=0, running_mean=0, running_var=1 -> folded scale/shift
    bn_scale = jnp.full((1, hidden_dim), 1.0 / jnp.sqrt(1.0 + eps), jnp.float32)
    bn_shift = jnp.zeros((1, hidden_dim), jnp.float32)
    return dict(
        # Linear weights stored as (in, out); conv weights per-tap as (H_in, H_out)
        w1=sc * jax.random.normal(keys[0], (input_dim, hidden_dim), jnp.float32),
        b1=jnp.zeros((1, hidden_dim), jnp.float32),
        s1=bn_scale, t1=bn_shift,
        cw=sc * jax.random.normal(keys[1], (NC, kernel_size, hidden_dim, hidden_dim), jnp.float32),
        cb=jnp.zeros((NC, 1, hidden_dim), jnp.float32),
        cs=jnp.tile(bn_scale[None], (NC, 1, 1)),
        ct=jnp.zeros((NC, 1, hidden_dim), jnp.float32),
        w2=sc * jax.random.normal(keys[2], (hidden_dim, hidden_dim), jnp.float32),
        b2=jnp.zeros((1, hidden_dim), jnp.float32),
        s2=bn_scale, t2=bn_shift,
        wo=sc * jax.random.normal(keys[3], (hidden_dim, 1), jnp.float32),
        bo=sc * jax.random.normal(keys[4], (1, 1), jnp.float32),
    )


def prepare_params(p, compute_dtype=jnp.bfloat16):
    """Fold eval-mode BatchNorm into weights/biases, cast matmul weights to bf16,
    and stack the conv taps along the contraction dimension: (NC, K, H, H) -> (NC, K*H, H)."""
    NC, K, H, _ = p["cw"].shape
    cw = (p["cw"] * p["cs"][:, None]).astype(compute_dtype)     # scale output channels
    return dict(
        w1=(p["w1"] * p["s1"]).astype(compute_dtype),
        b1=p["b1"] * p["s1"] + p["t1"],
        cw=cw.reshape(NC, K * H, H),
        cb=p["cb"] * p["cs"] + p["ct"],
        w2=(p["w2"] * p["s2"]).astype(compute_dtype),
        b2=p["b2"] * p["s2"] + p["t2"],
        wo=p["wo"].T.astype(jnp.float32),                       # (1, H) row, f32 VPU head
        bo=p["bo"].astype(jnp.float32),                         # (1, 1)
    )


def cnn_reference_f32(x, p):
    """Pure-JAX f32 reference with un-folded BN (eval-mode PyTorch semantics)."""
    h = jnp.maximum((x @ p["w1"] + p["b1"]) * p["s1"] + p["t1"], 0.0)
    NC, K = p["cw"].shape[:2]
    pad = K // 2
    L = x.shape[1]
    for nc in range(NC):
        hp = jnp.pad(h, ((0, 0), (pad, pad), (0, 0)))
        acc = sum(hp[:, k:k + L, :] @ p["cw"][nc, k] for k in range(K))
        h = jnp.maximum((acc + p["cb"][nc]) * p["cs"][nc] + p["ct"][nc], 0.0)
    h = jnp.maximum((h @ p["w2"] + p["b2"]) * p["s2"] + p["t2"], 0.0)
    o = h @ p["wo"] + p["bo"]
    return jnp.tanh(o[..., 0])


def cnn_reference_prepared(x, q):
    """Reference mirroring the kernel math exactly (folded BN, bf16 matmul operands)."""
    cdt = q["w1"].dtype
    B, L, H = x.shape[0], x.shape[1], q["w1"].shape[1]
    NC, KH = q["cw"].shape[0], q["cw"].shape[1]
    K = KH // H
    pad = K // 2
    cw4 = q["cw"].reshape(NC, K, H, H)
    h = jnp.maximum(jnp.einsum("bld,dh->blh", x.astype(cdt), q["w1"],
                               preferred_element_type=jnp.float32) + q["b1"], 0.0)
    for nc in range(NC):
        hp = jnp.pad(h, ((0, 0), (pad, pad), (0, 0)))
        acc = jnp.zeros((B, L, H), jnp.float32)
        for k in range(K):
            acc = acc + jnp.einsum("blh,hg->blg", hp[:, k:k + L, :].astype(cdt),
                                   cw4[nc, k], preferred_element_type=jnp.float32)
        h = jnp.maximum(acc + q["cb"][nc], 0.0)
    h = jnp.maximum(jnp.einsum("blh,hg->blg", h.astype(cdt), q["w2"],
                               preferred_element_type=jnp.float32) + q["b2"], 0.0)
    o = jnp.sum(h * q["wo"], axis=-1) + q["bo"][0, 0]
    return jnp.tanh(o)


if __name__ == "__main__":
    # Shapes: batch 64 with batch_block 32 -> grid of 2 even blocks (v7x megacore), M = 256
    # (fills the 256-row MXU), seq 8, input_dim 16, hidden_dim 128 (full lane use), 3 layers, K=3.
    B, L = 64, 8
    input_dim, hidden_dim, num_layers, kernel_size = 16, 128, 3, 3

    key = jax.random.PRNGKey(0)
    kx, kp = jax.random.split(key)
    x = jax.random.normal(kx, (B, L, input_dim), jnp.float32)
    raw = init_params(kp, input_dim, hidden_dim, num_layers, kernel_size)
    params = prepare_params(raw)

    out = cnn_forward(x, params, batch_block=32)
    out = jax.block_until_ready(out)
    assert out.shape == (B, L), out.shape

    ref_exact = cnn_reference_prepared(x, params)   # same folded/bf16 math as the kernel
    ref_f32 = cnn_reference_f32(x, raw)             # eval-mode PyTorch semantics in f32
    assert jnp.allclose(out, ref_exact, atol=1e-3, rtol=1e-3), "kernel/reference mismatch"
    assert jnp.allclose(out, ref_f32, atol=5e-2, rtol=5e-2), "bf16 kernel drifted from f32 reference"
    print("KERNEL_OK")
</pallas_src>

<mosaic_0001>
module attributes {stable_mosaic.version = 11 : i64} {
  func.func @cnn_kernel(%arg0: i32, %arg1: memref<32x8x16xf32, #tpu.memory_space<vmem>>, %arg2: memref<16x128xbf16, #tpu.memory_space<vmem>>, %arg3: memref<1x128xf32, #tpu.memory_space<vmem>>, %arg4: memref<2x384x128xbf16, #tpu.memory_space<vmem>>, %arg5: memref<2x1x128xf32, #tpu.memory_space<vmem>>, %arg6: memref<128x128xbf16, #tpu.memory_space<vmem>>, %arg7: memref<1x128xf32, #tpu.memory_space<vmem>>, %arg8: memref<1x128xf32, #tpu.memory_space<vmem>>, %arg9: memref<1x1xf32, #tpu.memory_space<vmem>>, %arg10: memref<1x1x256xf32, #tpu.memory_space<vmem>>) attributes {dimension_semantics = [#tpu.dimension_semantics<parallel>], iteration_bounds = array<i64: 2>, scalar_prefetch = 0 : i64, scratch_operands = 0 : i64, tpu.core_type = #tpu.core_type<tc>, window_params = [{transform_indices = @transform_0, window_bounds = array<i64: 32, 8, 16>}, {pipeline_mode = #tpu.pipeline_mode<synchronous>, transform_indices = @transform_1, window_bounds = array<i64: 16, 128>}, {pipeline_mode = #tpu.pipeline_mode<synchronous>, transform_indices = @transform_2, window_bounds = array<i64: 1, 128>}, {pipeline_mode = #tpu.pipeline_mode<synchronous>, transform_indices = @transform_3, window_bounds = array<i64: 2, 384, 128>}, {pipeline_mode = #tpu.pipeline_mode<synchronous>, transform_indices = @transform_4, window_bounds = array<i64: 2, 1, 128>}, {pipeline_mode = #tpu.pipeline_mode<synchronous>, transform_indices = @transform_5, window_bounds = array<i64: 128, 128>}, {pipeline_mode = #tpu.pipeline_mode<synchronous>, transform_indices = @transform_6, window_bounds = array<i64: 1, 128>}, {pipeline_mode = #tpu.pipeline_mode<synchronous>, transform_indices = @transform_7, window_bounds = array<i64: 1, 128>}, {pipeline_mode = #tpu.pipeline_mode<synchronous>, transform_indices = @transform_8, window_bounds = array<i64: 1, 1>}, {transform_indices = @transform_9, window_bounds = array<i64: 1, 1, 256>}]} {
    %c0 = arith.constant 0 : index
    %c0_0 = arith.constant 0 : index
    %c0_1 = arith.constant 0 : index
    %0 = vector.load %arg1[%c0, %c0_0, %c0_1] : memref<32x8x16xf32, #tpu.memory_space<vmem>>, vector<32x8x16xf32>
    %1 = vector.shape_cast %0 : vector<32x8x16xf32> to vector<256x16xf32>
    %2 = arith.truncf %1 : vector<256x16xf32> to vector<256x16xbf16>
    %c0_2 = arith.constant 0 : index
    %c0_3 = arith.constant 0 : index
    %3 = vector.load %arg2[%c0_2, %c0_3] : memref<16x128xbf16, #tpu.memory_space<vmem>>, vector<16x128xbf16>
    %cst = arith.constant dense<0.000000e+00> : vector<256x128xf32>
    %4 = tpu.matmul %2, %3, %cst {dimension_numbers = #tpu.dot_dimension_numbers<[1], [0], [0], [1], [0, 0, 1, 1], [], []>} : vector<256x16xbf16>, vector<16x128xbf16>, vector<256x128xf32> -> vector<256x128xf32>
    %c0_4 = arith.constant 0 : index
    %c0_5 = arith.constant 0 : index
    %5 = vector.load %arg3[%c0_4, %c0_5] : memref<1x128xf32, #tpu.memory_space<vmem>>, vector<1x128xf32>
    %6 = vector.broadcast %5 : vector<1x128xf32> to vector<256x128xf32>
    %7 = arith.addf %4, %6 : vector<256x128xf32>
    %cst_6 = arith.constant 0.000000e+00 : f32
    %8 = vector.broadcast %cst_6 : f32 to vector<256x128xf32>
    %9 = arith.maximumf %7, %8 : vector<256x128xf32>
    %10 = tpu.iota {dimensions = array<i32: 1>} : vector<32x8x128xi32>
    %c1_i32 = arith.constant 1 : i32
    %11 = vector.broadcast %c1_i32 : i32 to vector<32x8x128xi32>
    %12 = arith.cmpi sge, %10, %11 : vector<32x8x128xi32>
    %c8_i32 = arith.constant 8 : i32
    %13 = vector.broadcast %c8_i32 : i32 to vector<32x8x128xi32>
    %14 = arith.cmpi slt, %10, %13 : vector<32x8x128xi32>
    %15 = arith.andi %12, %14 : vector<32x8x128xi1>
    %c0_i32 = arith.constant 0 : i32
    %16 = vector.broadcast %c0_i32 : i32 to vector<32x8x128xi32>
    %17 = arith.cmpi sge, %10, %16 : vector<32x8x128xi32>
    %c7_i32 = arith.constant 7 : i32
    %18 = vector.broadcast %c7_i32 : i32 to vector<32x8x128xi32>
    %19 = arith.cmpi slt, %10, %18 : vector<32x8x128xi32>
    %20 = arith.andi %17, %19 : vector<32x8x128xi1>
    %21 = vector.shape_cast %9 : vector<256x128xf32> to vector<32x8x128xf32>
    %c1_i32_7 = arith.constant 1 : i32
    %22 = tpu.dynamic_rotate %21 by %c1_i32_7 dim 1 : vector<32x8x128xf32>, i32 -> vector<32x8x128xf32>
    %cst_8 = arith.constant 0.000000e+00 : f32
    %23 = vector.broadcast %cst_8 : f32 to vector<32x8x128xf32>
    %24 = arith.select %15, %22, %23 : vector<32x8x128xi1>, vector<32x8x128xf32>
    %25 = arith.truncf %24 : vector<32x8x128xf32> to vector<32x8x128xbf16>
    %26 = arith.truncf %21 : vector<32x8x128xf32> to vector<32x8x128xbf16>
    %c7_i32_9 = arith.constant 7 : i32
    %27 = tpu.dynamic_rotate %21 by %c7_i32_9 dim 1 : vector<32x8x128xf32>, i32 -> vector<32x8x128xf32>
    %cst_10 = arith.constant 0.000000e+00 : f32
    %28 = vector.broadcast %cst_10 : f32 to vector<32x8x128xf32>
    %29 = arith.select %20, %27, %28 : vector<32x8x128xi1>, vector<32x8x128xf32>
    %30 = arith.truncf %29 : vector<32x8x128xf32> to vector<32x8x128xbf16>
    %31 = tpu.concatenate %25, %26, %30 in 2 : vector<32x8x128xbf16>, vector<32x8x128xbf16>, vector<32x8x128xbf16> -> vector<32x8x384xbf16>
    %32 = vector.shape_cast %31 : vector<32x8x384xbf16> to vector<256x384xbf16>
    %c0_11 = arith.constant 0 : index
    %c0_12 = arith.constant 0 : index
    %c0_13 = arith.constant 0 : index
    %33 = vector.load %arg4[%c0_11, %c0_12, %c0_13] : memref<2x384x128xbf16, #tpu.memory_space<vmem>>, vector<1x384x128xbf16>
    %34 = vector.shape_cast %33 : vector<1x384x128xbf16> to vector<384x128xbf16>
    %cst_14 = arith.constant dense<0.000000e+00> : vector<256x128xf32>
    %35 = tpu.matmul %32, %34, %cst_14 {dimension_numbers = #tpu.dot_dimension_numbers<[1], [0], [0], [1], [0, 0, 1, 1], [], []>} : vector<256x384xbf16>, vector<384x128xbf16>, vector<256x128xf32> -> vector<256x128xf32>
    %c0_15 = arith.constant 0 : index
    %c0_16 = arith.constant 0 : index
    %c0_17 = arith.constant 0 : index
    %36 = vector.load %arg5[%c0_15, %c0_16, %c0_17] : memref<2x1x128xf32, #tpu.memory_space<vmem>>, vector<1x1x128xf32>
    %37 = vector.shape_cast %36 : vector<1x1x128xf32> to vector<1x128xf32>
    %38 = vector.broadcast %37 : vector<1x128xf32> to vector<256x128xf32>
    %39 = arith.addf %35, %38 : vector<256x128xf32>
    %cst_18 = arith.constant 0.000000e+00 : f32
    %40 = vector.broadcast %cst_18 : f32 to vector<256x128xf32>
    %41 = arith.maximumf %39, %40 : vector<256x128xf32>
    %42 = vector.shape_cast %41 : vector<256x128xf32> to vector<32x8x128xf32>
    %c1_i32_19 = arith.constant 1 : i32
    %43 = tpu.dynamic_rotate %42 by %c1_i32_19 dim 1 : vector<32x8x128xf32>, i32 -> vector<32x8x128xf32>
    %cst_20 = arith.constant 0.000000e+00 : f32
    %44 = vector.broadcast %cst_20 : f32 to vector<32x8x128xf32>
    %45 = arith.select %15, %43, %44 : vector<32x8x128xi1>, vector<32x8x128xf32>
    %46 = arith.truncf %45 : vector<32x8x128xf32> to vector<32x8x128xbf16>
    %47 = arith.truncf %42 : vector<32x8x128xf32> to vector<32x8x128xbf16>
    %c7_i32_21 = arith.constant 7 : i32
    %48 = tpu.dynamic_rotate %42 by %c7_i32_21 dim 1 : vector<32x8x128xf32>, i32 -> vector<32x8x128xf32>
    %cst_22 = arith.constant 0.000000e+00 : f32
    %49 = vector.broadcast %cst_22 : f32 to vector<32x8x128xf32>
    %50 = arith.select %20, %48, %49 : vector<32x8x128xi1>, vector<32x8x128xf32>
    %51 = arith.truncf %50 : vector<32x8x128xf32> to vector<32x8x128xbf16>
    %52 = tpu.concatenate %46, %47, %51 in 2 : vector<32x8x128xbf16>, vector<32x8x128xbf16>, vector<32x8x128xbf16> -> vector<32x8x384xbf16>
    %53 = vector.shape_cast %52 : vector<32x8x384xbf16> to vector<256x384xbf16>
    %c1 = arith.constant 1 : index
    %c0_23 = arith.constant 0 : index
    %c0_24 = arith.constant 0 : index
    %54 = vector.load %arg4[%c1, %c0_23, %c0_24] : memref<2x384x128xbf16, #tpu.memory_space<vmem>>, vector<1x384x128xbf16>
    %55 = vector.shape_cast %54 : vector<1x384x128xbf16> to vector<384x128xbf16>
    %cst_25 = arith.constant dense<0.000000e+00> : vector<256x128xf32>
    %56 = tpu.matmul %53, %55, %cst_25 {dimension_numbers = #tpu.dot_dimension_numbers<[1], [0], [0], [1], [0, 0, 1, 1], [], []>} : vector<256x384xbf16>, vector<384x128xbf16>, vector<256x128xf32> -> vector<256x128xf32>
    %c1_26 = arith.constant 1 : index
    %c0_27 = arith.constant 0 : index
    %c0_28 = arith.constant 0 : index
    %57 = vector.load %arg5[%c1_26, %c0_27, %c0_28] : memref<2x1x128xf32, #tpu.memory_space<vmem>>, vector<1x1x128xf32>
    %58 = vector.shape_cast %57 : vector<1x1x128xf32> to vector<1x128xf32>
    %59 = vector.broadcast %58 : vector<1x128xf32> to vector<256x128xf32>
    %60 = arith.addf %56, %59 : vector<256x128xf32>
    %cst_29 = arith.constant 0.000000e+00 : f32
    %61 = vector.broadcast %cst_29 : f32 to vector<256x128xf32>
    %62 = arith.maximumf %60, %61 : vector<256x128xf32>
    %63 = arith.truncf %62 : vector<256x128xf32> to vector<256x128xbf16>
    %c0_30 = arith.constant 0 : index
    %c0_31 = arith.constant 0 : index
    %64 = vector.load %arg6[%c0_30, %c0_31] : memref<128x128xbf16, #tpu.memory_space<vmem>>, vector<128x128xbf16>
    %cst_32 = arith.constant dense<0.000000e+00> : vector<256x128xf32>
    %65 = tpu.matmul %63, %64, %cst_32 {dimension_numbers = #tpu.dot_dimension_numbers<[1], [0], [0], [1], [0, 0, 1, 1], [], []>} : vector<256x128xbf16>, vector<128x128xbf16>, vector<256x128xf32> -> vector<256x128xf32>
    %c0_33 = arith.constant 0 : index
    %c0_34 = arith.constant 0 : index
    %66 = vector.load %arg7[%c0_33, %c0_34] : memref<1x128xf32, #tpu.memory_space<vmem>>, vector<1x128xf32>
    %67 = vector.broadcast %66 : vector<1x128xf32> to vector<256x128xf32>
    %68 = arith.addf %65, %67 : vector<256x128xf32>
    %cst_35 = arith.constant 0.000000e+00 : f32
    %69 = vector.broadcast %cst_35 : f32 to vector<256x128xf32>
    %70 = arith.maximumf %68, %69 : vector<256x128xf32>
    %c0_36 = arith.constant 0 : index
    %c0_37 = arith.constant 0 : index
    %71 = vector.load %arg8[%c0_36, %c0_37] : memref<1x128xf32, #tpu.memory_space<vmem>>, vector<1x128xf32>
    %72 = vector.broadcast %71 : vector<1x128xf32> to vector<256x128xf32>
    %73 = arith.mulf %70, %72 : vector<256x128xf32>
    %cst_38 = arith.constant dense<0.000000e+00> : vector<256xf32>
    %74 = vector.multi_reduction <add>, %73, %cst_38 [1] : vector<256x128xf32> to vector<256xf32>
    %75 = vector.shape_cast %74 : vector<256xf32> to vector<1x1x256xf32>
    %c0_39 = arith.constant 0 : index
    %c0_40 = arith.constant 0 : index
    %76 = vector.load %arg9[%c0_39, %c0_40] : memref<1x1xf32, #tpu.memory_space<vmem>>, vector<1x1xf32>
    %77 = vector.shape_cast %76 : vector<1x1xf32> to vector<1x1x1xf32>
    %78 = vector.broadcast %77 : vector<1x1x1xf32> to vector<1x1x256xf32>
    %79 = arith.addf %75, %78 : vector<1x1x256xf32>
    %80 = math.tanh %79 : vector<1x1x256xf32>
    %c0_41 = arith.constant 0 : index
    %c0_42 = arith.constant 0 : index
    %c0_43 = arith.constant 0 : index
    %81 = vector.load %arg10[%c0_41, %c0_42, %c0_43] : memref<1x1x256xf32, #tpu.memory_space<vmem>>, vector<1x1x256xf32>
    tpu.vector_store %arg10[%c0_41, %c0_42, %c0_43], %80 {strides = array<i32>} : memref<1x1x256xf32, #tpu.memory_space<vmem>>, vector<1x1x256xf32>,
    return
  }
  func.func @transform_0(%arg0: i32) -> (i32, i32, i32) {
    %c0_i32 = arith.constant 0 : i32
    %c0_i32_0 = arith.constant 0 : i32
    %c0_i32_1 = arith.constant 0 : i32
    return %arg0, %c0_i32, %c0_i32_0 : i32, i32, i32
  }
  func.func @transform_1(%arg0: i32) -> (i32, i32) {
    %c0_i32 = arith.constant 0 : i32
    %c0_i32_0 = arith.constant 0 : i32
    %c0_i32_1 = arith.constant 0 : i32
    return %c0_i32, %c0_i32_0 : i32, i32
  }
  func.func @transform_2(%arg0: i32) -> (i32, i32) {
    %c0_i32 = arith.constant 0 : i32
    %c0_i32_0 = arith.constant 0 : i32
    %c0_i32_1 = arith.constant 0 : i32
    return %c0_i32, %c0_i32_0 : i32, i32
  }
  func.func @transform_3(%arg0: i32) -> (i32, i32, i32) {
    %c0_i32 = arith.constant 0 : i32
    %c0_i32_0 = arith.constant 0 : i32
    %c0_i32_1 = arith.constant 0 : i32
    %c0_i32_2 = arith.constant 0 : i32
    return %c0_i32, %c0_i32_0, %c0_i32_1 : i32, i32, i32
  }
  func.func @transform_4(%arg0: i32) -> (i32, i32, i32) {
    %c0_i32 = arith.constant 0 : i32
    %c0_i32_0 = arith.constant 0 : i32
    %c0_i32_1 = arith.constant 0 : i32
    %c0_i32_2 = arith.constant 0 : i32
    return %c0_i32, %c0_i32_0, %c0_i32_1 : i32, i32, i32
  }
  func.func @transform_5(%arg0: i32) -> (i32, i32) {
    %c0_i32 = arith.constant 0 : i32
    %c0_i32_0 = arith.constant 0 : i32
    %c0_i32_1 = arith.constant 0 : i32
    return %c0_i32, %c0_i32_0 : i32, i32
  }
  func.func @transform_6(%arg0: i32) -> (i32, i32) {
    %c0_i32 = arith.constant 0 : i32
    %c0_i32_0 = arith.constant 0 : i32
    %c0_i32_1 = arith.constant 0 : i32
    return %c0_i32, %c0_i32_0 : i32, i32
  }
  func.func @transform_7(%arg0: i32) -> (i32, i32) {
    %c0_i32 = arith.constant 0 : i32
    %c0_i32_0 = arith.constant 0 : i32
    %c0_i32_1 = arith.constant 0 : i32
    return %c0_i32, %c0_i32_0 : i32, i32
  }
  func.func @transform_8(%arg0: i32) -> (i32, i32) {
    %c0_i32 = arith.constant 0 : i32
    %c0_i32_0 = arith.constant 0 : i32
    %c0_i32_1 = arith.constant 0 : i32
    return %c0_i32, %c0_i32_0 : i32, i32
  }
  func.func @transform_9(%arg0: i32) -> (i32, i32, i32) {
    %c0_i32 = arith.constant 0 : i32
    %c0_i32_0 = arith.constant 0 : i32
    %c0_i32_1 = arith.constant 0 : i32
    return %arg0, %c0_i32, %c0_i32_0 : i32, i32, i32
  }
}

</mosaic_0001>

<bundles_post_ra>
// kernel: tpu_custom_call.1
= control target key start
LH: loop header
LB: loop body
LE: loop exit
PB: predicated region body
PF: predicated region fallthrough
CT: control target
= control target key end

     0   :  { %s9445_s0 = inlined_call_operand.vmem [shape: f32[64,8,16], index: 0, kind: input, shape index: {}]   ;;  %s9446_s1 = inlined_call_operand.vmem [shape: bf16[16,128], index: 1, kind: input, shape index: {}]   ;;  %s9447_s2 = inlined_call_operand.vmem [shape: f32[1,128], index: 2, kind: input, shape index: {}]   ;;  %s9448_s3 = inlined_call_operand.vmem [shape: bf16[2,384,128], index: 3, kind: input, shape index: {}]   ;;  %s9449_s4 = inlined_call_operand.vmem [shape: f32[2,1,128], index: 4, kind: input, shape index: {}]   ;;  %s9450_s5 = inlined_call_operand.vmem [shape: bf16[128,128], index: 5, kind: input, shape index: {}]   ;;  %s9451_s6 = inlined_call_operand.vmem [shape: f32[1,128], index: 6, kind: input, shape index: {}]   ;;  %s9452_s7 = inlined_call_operand.vmem [shape: f32[1,128], index: 7, kind: input, shape index: {}]   ;;  %s9453_s8 = inlined_call_operand.<no memory space> [shape: f32[1,1], index: 8, kind: input, shape index: {}]   ;;  %s9454_s9 = inlined_call_operand.hbm [shape: f32[2,1,256], index: 9, kind: output, shape index: {}]  }
   0x1   :  { %v14_v0 = vstv %s9453_s8 }
   0x2   :  { %15 = vst [vmem:[#allocation2] sm:$0x1] %v14_v0 }
   0x3   :  { %16 = vsyncpa [#allocation4], 0 }
   0x4   :  { %18 = vsyncpa [#allocation4 + $0x1], 0  ;;  %s7558_s11 = smov 0   ;;  %s7560_s12 = smov 0  }
   0x5   :  { %s7562_s13 = smov 0   ;;  %s7564_s14 = smov 0  }
   0x6 LB: > { %s6242_s8 = sadd.s32 4294967295, %s7500_s14   ;;  %s6243_s15 = sadd.s32 4294967294, %s7500_s14   ;;  %s7500_s14 = sphi %s7564_s14, %s9464_s14   ;;  %s7496_s13 = sphi %s7562_s13, %s9463_s13   ;;  %s7492_s12 = sphi %s7560_s12, %s9462_s12   ;;  %s7488_s11 = sphi %s7558_s11, %s9461_s11  }
   0x7   : > { %s7581_s16 = sadd.s32 1, %s7500_s14   ;;  %s225_s17 = sadd.s32 1, %s7496_s13 }
   0x8   : > { %s222_s18 = ssub.s32 %s7500_s14, %s7581_s16  ;;  %p235_p0 = scmp.ne.s32.totalorder %s7496_s13, %s7492_s12 }
   0x9   : > { %p223_p1 = scmp.eq.s32.totalorder %s222_s18, 0  ;;  %p236_p2 = scmp.eq.s32.totalorder %s6242_s8, 1 }
   0xa   : > { %p241_p3 = scmp.ne.s32.totalorder %s7492_s12, %s7488_s11  ;;  %p242_p4 = scmp.eq.s32.totalorder %s6243_s15, 1 }
   0xb   : > { %s7591_s19 = scalar_select %p223_p1, %s7496_s13, %s225_s17  }
   0xc   : > { %p7593_p5 = por %p236_p2, %p235_p0  ;;  %p7597_p6 = por %p242_p4, %p241_p3 }
   0xd   : > { %p6246_p7 = scmp.ge.s32.totalorder %s7500_s14, 1  ;;  %p293_p8 = scmp.lt.s32.totalorder %s7500_s14, 3 }
   0xf   : > { %p294_p9 = pnand %p6246_p7, %p293_p8 }
  0x10   : > { %v7317_v1 = vld [vmem:[%s9446_s1] sm:$0xff] (!%p294_p9)   ;;  %s7606_s24 = sshll.u32 (!%p294_p9), %s6242_s8, 5  ;;  %vm399_vm0 = vcmask (!%p294_p9), 130048   ;;  %v7319_v13 = vld [vmem:[%s9448_s3 + $0x88] sm:$0xff] (!%p294_p9)   ;;  %v7320_v18 = vld [vmem:[%s9448_s3 + $0x90] sm:$0xff] (!%p294_p9)   ;;  %vm5969_vm5 = vcmask (!%p294_p9), 130112  }
  0x11   : > { %297 = sbr.rel (%p294_p9) target bundleno = 1545 (0x609), region = 56  ;;  %p330_p10 = scmp.lt.s32.totalorder (!%p294_p9), %s7606_s24, 63  ;;  %7080 = vmatprep.subr.bf16.mxu0 (!%p294_p9), %v7317_v1  ;;  %v7318_v2 = vld [vmem:[%s9448_s3 + $0x80] sm:$0xff] (!%p294_p9)   ;;  %v7321_v21 = vld [vmem:[%s9448_s3 + $0x98] sm:$0xff] (!%p294_p9)   ;;  %v7325_v28 = vld [vmem:[%s9448_s3 + $0x48] sm:$0xff] (!%p294_p9)   ;;  %vm5976_vm6 = vcmask (!%p294_p9), 195712  }
  0x12   : > { %7081 = vmatpush3.bf16.msra.mxu0 (!%p294_p9), %v7317_v1  ;;  %v7322_v3 = vld [vmem:[%s9448_s3 + $0x40] sm:$0xff] (!%p294_p9)   ;;  %v7326_v29 = vld [vmem:[%s9448_s3 + $0x8] sm:$0xff] (!%p294_p9)   ;;  %v7327_v30 = vld [vmem:[%s9448_s3 + $0x50] sm:$0xff] (!%p294_p9)   ;;  %vm5983_vm7 = vcmask (!%p294_p9), 261312   ;;  %vm5990_vm8 = vcmask (!%p294_p9), 326912   ;;  %vm5997_vm9 = vcmask (!%p294_p9), 392512   ;;  %s9401_s30 = scalar_lea.hbm (!%p294_p9), %s9454_s9, %s7606_s24 }
  0x13   : > { %7114 = vmatprep.subr.bf16.mxu0 (!%p294_p9), %v7318_v2  ;;  %6784 = vmatprep.subr.bf16.mxu1 (!%p294_p9), %v7322_v3  ;;  %v7323_v22 = vld [vmem:[%s9448_s3] sm:$0xff] (!%p294_p9)   ;;  %v7328_v32 = vld [vmem:[%s9448_s3 + $0x10] sm:$0xff] (!%p294_p9)   ;;  %v7329_v34 = vld [vmem:[%s9448_s3 + $0xa8] sm:$0xff] (!%p294_p9)   ;;  %vm6004_vm10 = vcmask (!%p294_p9), 458112   ;;  %vm6011_vm11 = vcmask (!%p294_p9), 523712   ;;  %vm6018_vm12 = vcmask (!%p294_p9), 589312  }
  0x14   : > { %6785 = vmatpush3.bf16.msra.mxu1 (!%p294_p9), %v7323_v22  ;;  %v7324_v27 = vld [vmem:[%s9448_s3 + $0xa0] sm:$0xff] (!%p294_p9)   ;;  %v7330_v35 = vld [vmem:[%s9448_s3 + $0x58] sm:$0xff] (!%p294_p9)   ;;  %v7334_v42 = vld [vmem:[%s9448_s3 + $0xb0] sm:$0xff] (!%p294_p9)   ;;  %vm6025_vm13 = vcmask (!%p294_p9), 654912   ;;  %vm6032_vm14 = vcmask (!%p294_p9), 720512   ;;  %vm6039_vm15 = vcmask (!%p294_p9), 786112  }
  0x15   : > { %6786 = vmatprep.subr.bf16.mxu1 (!%p294_p9), %v7325_v28  ;;  %v7331_v38 = vld [vmem:[%s9448_s3 + $0x18] sm:$0xff] (!%p294_p9)   ;;  %v7332_v41 = vld [vmem:[%s9448_s3 + $0x60] sm:$0xff] (!%p294_p9)   ;;  %v7335_v3 = vld [vmem:[%s9448_s3 + $0x68] sm:$0xff] (!%p294_p9)   ;;  %s326_s23 = sand.u32 (!%p294_p9), 1, %s7492_s12   ;;  %s7504_s17 = smov (!%p294_p9), [#allocation3]  }
  0x16   : > { %v7333_v43 = vld [vmem:[%s9448_s3 + $0x20] sm:$0xff] (!%p294_p9)   ;;  %s6247_s25 = sshll.u32 (!%p294_p9), %s326_s23, 1  ;;  %s6170_s15 = scalar_lea.sflag (!%p294_p9), [#allocation4], %s326_s23 }
  0x17   : > { %s328_s26 = scalar_lea.vmem (!%p294_p9), [#allocation3], %s6247_s25  ;;  %s7442_s18 = sshll.u32 (!%p294_p9), %s7504_s17, 4  ;;  %s7443_s18 = int_to_ptr.vmem [resolvable:$false] %s7442_s18 }
  0x18   : > { %s331_s27 = scalar_select %p330_p10, %s7606_s24, 63  ;;  %6787 = vmatpush3.bf16.msra.mxu1 %v7326_v29 }
  0x19   : > { %6788 = vmatprep.subr.bf16.mxu1 %v7327_v30 }
  0x1a   : > { %s6249_s28 = sshll.u32 %s331_s27, 3  ;;  %s6184_s27 = sshll.u32 %s328_s26, 4  ;;  %s9403_s27 = int_to_ptr.vmem [resolvable:$true] %s6184_s27 }
  0x1b   : > { %s7616_s10 = scalar_lea.vmem %s9445_s0, %s6249_s28  ;;  %s7438_s8 = scalar_lea.vmem %s9403_s27, 32 }
  0x1c   : > { %v336_v4 = vld [vmem:[%s7616_s10] sm:$0xff]  ;;  %v337_v5 = vld [vmem:[%s7616_s10 + $0x8] sm:$0xff]  ;;  %v338_v6 = vld [vmem:[%s7616_s10 + $0x10] sm:$0xff]  ;;  %6789 = vmatpush3.bf16.msra.mxu1 %v7328_v32  ;;  %p7439_p11 = scmp.ne.s32.totalorder %s9403_s27, %s7438_s8  ;;  %p7445_p0 = scmp.lt.s32.totalorder %s9403_s27, %s7443_s18 }
  0x1d   : > { %v368_v7 = vpack.c.bf16 %v337_v5, %v336_v4  ;;  %v339_v8 = vld [vmem:[%s7616_s10 + $0x18] sm:$0xff]  ;;  %v340_v9 = vld [vmem:[%s7616_s10 + $0x20] sm:$0xff]  ;;  %v341_v10 = vld [vmem:[%s7616_s10 + $0x28] sm:$0xff]  ;;  %6790 = vmatprep.subr.bf16.mxu1 %v7330_v35 }
  0x1e   : > { %v369_v11 = vpack.c.bf16 %v339_v8, %v338_v6  ;;  %v370_v12 = vpack.c.bf16 %v341_v10, %v340_v9  ;;  %v342_v14 = vld [vmem:[%s7616_s10 + $0x30] sm:$0xff]  ;;  %v343_v15 = vld [vmem:[%s7616_s10 + $0x38] sm:$0xff]  ;;  %v344_v16 = vld [vmem:[%s7616_s10 + $0x40] sm:$0xff]  ;;  %v641_v10 = vlaneseq  ;;  %p7440_p12 = pnand %p7439_p11, %p7593_p5 }
  0x1f   : > { %7082 = vmatprep.mubr.msk.bf16.mxu0 %vm399_vm0, %v368_v7  ;;  %v345_v17 = vld [vmem:[%s7616_s10 + $0x48] sm:$0xff]  ;;  %v371_v19 = vpack.c.bf16 %v343_v15, %v342_v14  ;;  %v346_v23 = vld [vmem:[%s7616_s10 + $0x50] sm:$0xff]  ;;  %v347_v24 = vld [vmem:[%s7616_s10 + $0x58] sm:$0xff] }
  0x20   : > { %7083 = vmatmul.mubr.msk.bf16.vlgmr.msra.gmra.mrb[0].mxu0 %vm399_vm0, %v369_v11  ;;  %v372_v20 = vpack.c.bf16 %v345_v17, %v344_v16  ;;  %v348_v25 = vld [vmem:[%s7616_s10 + $0x60] sm:$0xff]  ;;  %v349_v26 = vld [vmem:[%s7616_s10 + $0x68] sm:$0xff]  ;;  %v373_v31 = vpack.c.bf16 %v347_v24, %v346_v23  ;;  %v350_v36 = vld [vmem:[%s7616_s10 + $0x70] sm:$0xff]  ;;  %6791 = vmatpush3.bf16.msra.mxu1 %v7331_v38  ;;  %v7742_v15 = vshrl.u32 %v641_v10, 7  ;;  %p7441_p13 = pneg %p7440_p12 }
  0x21   : > { %7086 = vmatprep.mubr.msk.bf16.mxu0 %vm399_vm0, %v370_v12  ;;  %7115 = vmatpush3.bf16.msra.mxu0 %v7318_v2  ;;  %v374_v33 = vpack.c.bf16 %v349_v26, %v348_v25  ;;  %v351_v37 = vld [vmem:[%s7616_s10 + $0x78] sm:$0xff]  ;;  %v352_v39 = vld [vmem:[%s7616_s10 + $0x80] sm:$0xff]  ;;  %v353_v40 = vld [vmem:[%s7616_s10 + $0x88] sm:$0xff] }
  0x22   : > { %7116 = vmatprep.subr.bf16.mxu0 %v7319_v13  ;;  %v375_v44 = vpack.c.bf16 %v351_v37, %v350_v36  ;;  %v376_v45 = vpack.c.bf16 %v353_v40, %v352_v39  ;;  %6792 = vmatprep.subr.bf16.mxu1 %v7332_v41  ;;  %v354_v46 = vld [vmem:[%s7616_s10 + $0x90] sm:$0xff]  ;;  %v355_v47 = vld [vmem:[%s7616_s10 + $0x98] sm:$0xff]  ;;  %v356_v48 = vld [vmem:[%s7616_s10 + $0xa0] sm:$0xff]  ;;  %vm643_vm1 = vcmp.ge.s32.totalorder %v7742_v15, 1  ;;  %vm647_vm2 = vcmp.lt.s32.totalorder %v7742_v15, 7 }
  0x23   : > { %v357_v49 = vld [vmem:[%s7616_s10 + $0xa8] sm:$0xff]  ;;  %v377_v50 = vpack.c.bf16 %v355_v47, %v354_v46  ;;  %v358_v52 = vld [vmem:[%s7616_s10 + $0xb0] sm:$0xff]  ;;  %v359_v53 = vld [vmem:[%s7616_s10 + $0xb8] sm:$0xff] }
  0x24   : > { %6793 = vmatpush3.bf16.msra.mxu1 %v7333_v43  ;;  %v378_v51 = vpack.c.bf16 %v357_v49, %v356_v48  ;;  %v360_v54 = vld [vmem:[%s7616_s10 + $0xc0] sm:$0xff]  ;;  %v361_v55 = vld [vmem:[%s7616_s10 + $0xc8] sm:$0xff]  ;;  %v379_v56 = vpack.c.bf16 %v359_v53, %v358_v52  ;;  %v362_v58 = vld [vmem:[%s7616_s10 + $0xd0] sm:$0xff] }
  0x25   : > { %7117 = vmatpush3.bf16.msra.mxu0 %v7319_v13  ;;  %v380_v57 = vpack.c.bf16 %v361_v55, %v360_v54  ;;  %v363_v59 = vld [vmem:[%s7616_s10 + $0xd8] sm:$0xff]  ;;  %v364_v60 = vld [vmem:[%s7616_s10 + $0xe0] sm:$0xff]  ;;  %v365_v61 = vld [vmem:[%s7616_s10 + $0xe8] sm:$0xff]  ;;  %6794 = vmatprep.subr.bf16.mxu1 %v7335_v3 }
  0x26   : > { %7118 = vmatprep.subr.bf16.mxu0 %v7320_v18  ;;  %v381_v62 = vpack.c.bf16 %v363_v59, %v362_v58  ;;  %v382_v63 = vpack.c.bf16 %v365_v61, %v364_v60  ;;  %v366_v0 = vld [vmem:[%s7616_s10 + $0xf0] sm:$0xff]  ;;  %v367_v1 = vld [vmem:[%s7616_s10 + $0xf8] sm:$0xff]  ;;  %v7336_v4 = vld [vmem:[%s9448_s3 + $0x28] sm:$0xff]   ;;  %s7444_s10 = scalar_lea.vmem %s7443_s18, 64 }
  0x27   : > { %v383_v2 = vpack.c.bf16 %v367_v1, %v366_v0  ;;  %v7337_v5 = vld [vmem:[%s9448_s3 + $0x70] sm:$0xff]   ;;  %v7340_v7 = vld [vmem:[%s9448_s3 + $0x78] sm:$0xff]   ;;  %v7738_v11 = vld [vmem:[%s9447_s2] ss:$0 sm:$0xff]  ;;  %p7446_p1 = scmp.lt.s32.totalorder %s7444_s10, %s7438_s8 }
  0x28   : > { %7087 = vmatmul.mubr.msk.bf16.gmra.mrb[4].mxu0 %vm399_vm0, %v371_v19  ;;  %6795 = vmatpush3.bf16.msra.mxu1 %v7336_v4  ;;  %v7338_v6 = vld [vmem:[%s9448_s3 + $0x30] sm:$0xff]   ;;  %v7339_v8 = vld [vmem:[%s9448_s3 + $0xb8] sm:$0xff]   ;;  %v7342_v23 = vld [vmem:[%s9448_s3 + $0x100] sm:$0xff]  }
  0x29   : > { %7090 = vmatprep.mubr.msk.bf16.mxu0 %vm399_vm0, %v372_v20  ;;  %7119 = vmatpush3.bf16.msra.mxu0 %v7320_v18  ;;  %v7341_v9 = vld [vmem:[%s9448_s3 + $0x38] sm:$0xff]   ;;  %vm7752_vm3 = vmpackc.low %vm643_vm1, %vm643_vm1  ;;  %v7343_v47 = vld [vmem:[%s9448_s3 + $0xc0] sm:$0xff]   ;;  %vm6053_vm1 = vcmask 917312   ;;  %p7447_p2 = por %p7446_p1, %p7445_p0 }
  0x2a   : > { %7120 = vmatprep.subr.bf16.mxu0 %v7321_v21  ;;  %6796 = vmatprep.subr.bf16.mxu1 %v7337_v5  ;;  %vm7757_vm4 = vmpackc.low %vm647_vm2, %vm647_vm2  ;;  %v7345_v60 = vld [vmem:[%s9448_s3 + $0xc8] sm:$0xff]   ;;  %v7346_v0 = vld [vmem:[%s9448_s3 + $0x110] sm:$0xff]   ;;  %vm6060_vm2 = vcmask 982912  }
  0x2b   : > { %v7368_v37 = vld [vmem:[%s9450_s5 + $0x10] sm:$0xff]   ;;  %v7369_v41 = vld [vmem:[%s9450_s5 + $0x18] sm:$0xff]   ;;  %p7448_p3 = pnand %p7447_p2, %p7441_p13 }
  0x2c   : > { %6797 = vmatpush3.bf16.msra.mxu1 %v7338_v6 }
  0x2d   : > { %7121 = vmatpush3.bf16.msra.mxu0 %v7321_v21  ;;  %6798 = vmatprep.subr.bf16.mxu1 %v7340_v7 }
  0x2e   : > { %7122 = vmatprep.subr.bf16.mxu0 %v7324_v27 }
  0x30   : > { %7091 = vmatmul.mubr.msk.bf16.gmra.mrb[8].mxu0 %vm399_vm0, %v373_v31  ;;  %6799 = vmatpush3.bf16.msra.mxu1 %v7341_v9 }
  0x31   : > { %7094 = vmatprep.mubr.msk.bf16.mxu0 %vm399_vm0, %v374_v33  ;;  %7123 = vmatpush3.bf16.msra.mxu0 %v7324_v27 }
  0x32   : > { %7124 = vmatprep.subr.bf16.mxu0 %v7329_v34 }
  0x35   : > { %7125 = vmatpush3.bf16.msra.mxu0 %v7329_v34 }
  0x36   : > { %7126 = vmatprep.subr.bf16.mxu0 %v7334_v42 }
  0x38   : > { %7095 = vmatmul.mubr.msk.bf16.gmra.mrb[12].mxu0 %vm399_vm0, %v375_v44 }
  0x39   : > { %7098 = vmatprep.mubr.msk.bf16.mxu0 %vm399_vm0, %v376_v45  ;;  %7127 = vmatpush3.bf16.msra.mxu0 %v7334_v42 }
  0x3a   : > { %7128 = vmatprep.subr.bf16.mxu0 %v7339_v8 }
  0x3d   : > { %7129 = vmatpush3.bf16.msra.mxu0 %v7339_v8 }
  0x3e   : > { %6920 = vmatprep.subr.bf16.mxu0 %v7342_v23 }
  0x40   : > { %7099 = vmatmul.mubr.msk.bf16.gmra.mrb[16].mxu0 %vm399_vm0, %v377_v50 }
  0x41   : > { %7102 = vmatprep.mubr.msk.bf16.mxu0 %vm399_vm0, %v378_v51  ;;  %v7344_v51 = vld [vmem:[%s9448_s3 + $0x108] sm:$0xff]  }
  0x48   : > { %7103 = vmatmul.mubr.msk.bf16.gmra.mrb[20].mxu0 %vm399_vm0, %v379_v56 }
  0x49   : > { %7106 = vmatprep.mubr.msk.bf16.mxu0 %vm399_vm0, %v380_v57 }
  0x50   : > { %7107 = vmatmul.mubr.msk.bf16.gmra.mrb[24].mxu0 %vm399_vm0, %v381_v62 }
  0x51   : > { %7110 = vmatprep.mubr.msk.bf16.mxu0 %vm399_vm0, %v382_v63 }
  0x58   : > { %7111 = vmatmul.mubr.msk.bf16.gmra.mrb[28].mxu0 %vm399_vm0, %v383_v2  ;;  %vm6046_vm0 = vcmask 851712  }
  0xf3   : > { %v7084_v12 = vpop.f32.mrb[0].mxu0 }
  0xf4   : > { %v491_v13 = vadd.f32 %v7084_v12, %v7738_v11  ;;  %v482_v14 = vpop.f32.mrb[1].mxu0 }
  0xf5   : > { %v483_v16 = vadd.f32 %v7738_v11, %v482_v14  ;;  %v7085_v17 = vpop.f32.mrb[2].mxu0 }
  0xf6   : > { %v611_v18 = vmax.f32 %v491_v13, 0.0  ;;  %v494_v19 = vadd.f32 %v7085_v17, %v7738_v11  ;;  %v485_v20 = vpop.f32.mrb[3].mxu0 }
  0xf7   : > { %v609_v21 = vmax.f32 %v483_v16, 0.0  ;;  %v486_v22 = vadd.f32 %v7738_v11, %v485_v20  ;;  %v7347_v16 = vld [vmem:[%s9448_s3 + $0xd0] sm:$0xff]   ;;  %v7348_v20 = vld [vmem:[%s9448_s3 + $0x118] sm:$0xff]  }
  0xf8   : > { %v612_v24 = vmax.f32 %v494_v19, 0.0  ;;  %v651_v25 = vrot.slane %v611_v18, 7  ;;  %v779_v26 = vrot.slane %v611_v18, 1 }
  0xf9   : > { %v610_v27 = vmax.f32 %v486_v22, 0.0  ;;  %v649_v28 = vrot.slane %v609_v21, 7  ;;  %v777_v32 = vrot.slane %v609_v21, 1 }
  0xfa   : > { %v652_v29 = vrot.slane %v612_v24, 7  ;;  %v780_v30 = vrot.slane %v612_v24, 1  ;;  %v6482_v31 = vpack.c.bf16 %v612_v24, %v611_v18 }
  0xfb   : > { %v650_v33 = vrot.slane %v610_v27, 7  ;;  %v778_v34 = vrot.slane %v610_v27, 1  ;;  %v7088_v35 = vpop.f32.mrb[4].mxu0  ;;  %v6479_v36 = vpack.c.bf16 %v610_v27, %v609_v21 }
  0xfc   : > { %v6578_v38 = vpack.c.bf16 %v780_v30, %v779_v26  ;;  %v507_v39 = vadd.f32 %v7088_v35, %v7738_v11  ;;  %v498_v40 = vpop.f32.mrb[5].mxu0  ;;  %v6530_v42 = vpack.c.bf16 %v652_v29, %v651_v25  ;;  %v7349_v29 = vld [vmem:[%s9448_s3 + $0xd8] sm:$0xff]  }
  0xfd   : > { %v499_v43 = vadd.f32 %v7738_v11, %v498_v40  ;;  %1392 = vmatprep.mubr.bf16.mxu1 %v6479_v36  ;;  %v7089_v44 = vpop.f32.mrb[6].mxu0  ;;  %v6527_v45 = vpack.c.bf16 %v650_v33, %v649_v28  ;;  %v6575_v46 = vpack.c.bf16 %v778_v34, %v777_v32  ;;  %v7350_v33 = vld [vmem:[%s9448_s3 + $0x120] sm:$0xff]  }
  0xfe   : > { %v7765_v48 = vmax.f32 %v507_v39, 0.0  ;;  %v510_v49 = vadd.f32 %v7089_v44, %v7738_v11  ;;  %v501_v50 = vpop.f32.mrb[7].mxu0 }
  0xff   : > { %v613_v52 = vmax.f32 %v499_v43, 0.0  ;;  %v502_v53 = vadd.f32 %v7738_v11, %v501_v50  ;;  %6528 = vmatmul.mubr.msk.bf16.vlgmr.msra.gmra.mrb[0].mxu1 %vm7752_vm3, %v6527_v45  ;;  %7130 = vmatprep.mubr.msk.bf16.mxu0 %vm7757_vm4, %v6575_v46 }
 0x100   : > { %v655_v54 = vrot.slane %v7765_v48, 7  ;;  %v783_v55 = vrot.slane %v7765_v48, 1  ;;  %v7778_v56 = vmax.f32 %v510_v49, 0.0  ;;  %1400 = vmatprep.mubr.bf16.mxu1 %v6482_v31  ;;  %7131 = vmatmul.mubr.msk.bf16.vlgmr.msra.gmra.mrb[32].mxu0 %vm7757_vm4, %v6578_v38  ;;  %v7351_v49 = vld [vmem:[%s9448_s3 + $0xe0] sm:$0xff]  }
 0x101   : > { %v653_v57 = vrot.slane %v613_v52, 7  ;;  %v781_v58 = vrot.slane %v613_v52, 1  ;;  %v614_v59 = vmax.f32 %v502_v53, 0.0  ;;  %6921 = vmatpush3.bf16.msra.mxu0 %v7343_v47  ;;  %v7352_v53 = vld [vmem:[%s9448_s3 + $0x128] sm:$0xff]  }
 0x102   : > { %v656_v61 = vrot.slane %v7778_v56, 7  ;;  %v784_v62 = vrot.slane %v7778_v56, 1  ;;  %v6488_v63 = vpack.c.bf16 %v7778_v56, %v7765_v48  ;;  %6922 = vmatprep.subr.bf16.mxu0 %v7344_v51  ;;  %v7353_v48 = vld [vmem:[%s9448_s3 + $0xe8] sm:$0xff]  }
 0x103   : > { %v654_v1 = vrot.slane %v614_v59, 7  ;;  %v782_v2 = vrot.slane %v614_v59, 1  ;;  %v6485_v3 = vpack.c.bf16 %v614_v59, %v613_v52  ;;  %v7092_v4 = vpop.f32.mrb[8].mxu0 }
 0x104   : > { %v6584_v5 = vpack.c.bf16 %v784_v62, %v783_v55  ;;  %v523_v6 = vadd.f32 %v7092_v4, %v7738_v11  ;;  %v514_v7 = vpop.f32.mrb[9].mxu0  ;;  %v7793_v8 = vpack.c.bf16 %v656_v61, %v655_v54 }
 0x105   : > { %v6581_v9 = vpack.c.bf16 %v782_v2, %v781_v58  ;;  %v515_v12 = vadd.f32 %v7738_v11, %v514_v7  ;;  %v7093_v13 = vpop.f32.mrb[10].mxu0  ;;  %v6533_v14 = vpack.c.bf16 %v654_v1, %v653_v57  ;;  %6923 = vmatpush3.bf16.msra.mxu0 %v7345_v60  ;;  %v7354_v1 = vld [vmem:[%s9448_s3 + $0x130] sm:$0xff]  }
 0x106   : > { %v7799_v17 = vmax.f32 %v523_v6, 0.0  ;;  %v526_v18 = vadd.f32 %v7093_v13, %v7738_v11  ;;  %v517_v19 = vpop.f32.mrb[11].mxu0  ;;  %6924 = vmatprep.subr.bf16.mxu0 %v7346_v0 }
 0x107   : > { %6531 = vmatmul.mubr.msk.bf16.gmra.mrb[4].mxu1 %vm7752_vm3, %v6530_v42  ;;  %7134 = vmatprep.mubr.msk.bf16.mxu0 %vm7757_vm4, %v6581_v9  ;;  %v7809_v21 = vmax.f32 %v515_v12, 0.0  ;;  %v518_v22 = vadd.f32 %v7738_v11, %v517_v19 }
 0x108   : > { %7135 = vmatmul.mubr.msk.bf16.gmra.mrb[36].mxu0 %vm7757_vm4, %v6584_v5  ;;  %1408 = vmatprep.mubr.bf16.mxu1 %v6485_v3  ;;  %v659_v23 = vrot.slane %v7799_v17, 7  ;;  %v787_v24 = vrot.slane %v7799_v17, 1  ;;  %v7816_v25 = vmax.f32 %v526_v18, 0.0 }
 0x109   : > { %v657_v26 = vrot.slane %v7809_v21, 7  ;;  %v785_v27 = vrot.slane %v7809_v21, 1  ;;  %v7820_v28 = vmax.f32 %v518_v22, 0.0  ;;  %6925 = vmatpush3.bf16.msra.mxu0 %v7347_v16 }
 0x10a   : > { %v660_v30 = vrot.slane %v7816_v25, 7  ;;  %v788_v31 = vrot.slane %v7816_v25, 1  ;;  %v6494_v32 = vpack.c.bf16 %v7816_v25, %v7799_v17  ;;  %6926 = vmatprep.subr.bf16.mxu0 %v7348_v20 }
 0x10b   : > { %v658_v34 = vrot.slane %v7820_v28, 7  ;;  %v786_v35 = vrot.slane %v7820_v28, 1  ;;  %v6491_v36 = vpack.c.bf16 %v7820_v28, %v7809_v21  ;;  %v7096_v38 = vpop.f32.mrb[12].mxu0 }
 0x10c   : > { %v6590_v39 = vpack.c.bf16 %v788_v31, %v787_v24  ;;  %v539_v40 = vadd.f32 %v7096_v38, %v7738_v11  ;;  %v530_v42 = vpop.f32.mrb[13].mxu0  ;;  %v7837_v43 = vpack.c.bf16 %v660_v30, %v659_v23 }
 0x10d   : > { %v6587_v44 = vpack.c.bf16 %v786_v35, %v785_v27  ;;  %v531_v45 = vadd.f32 %v7738_v11, %v530_v42  ;;  %v7097_v46 = vpop.f32.mrb[14].mxu0  ;;  %v7840_v47 = vpack.c.bf16 %v658_v34, %v657_v26  ;;  %6927 = vmatpush3.bf16.msra.mxu0 %v7349_v29 }
 0x10e   : > { %v7845_v50 = vmax.f32 %v539_v40, 0.0  ;;  %v542_v51 = vadd.f32 %v7097_v46, %v7738_v11  ;;  %v533_v52 = vpop.f32.mrb[15].mxu0  ;;  %6928 = vmatprep.subr.bf16.mxu0 %v7350_v33 }
 0x10f   : > { %6534 = vmatmul.mubr.msk.bf16.gmra.mrb[8].mxu1 %vm7752_vm3, %v6533_v14  ;;  %7138 = vmatprep.mubr.msk.bf16.mxu0 %vm7757_vm4, %v6587_v44  ;;  %v7855_v54 = vmax.f32 %v531_v45, 0.0  ;;  %v534_v55 = vadd.f32 %v7738_v11, %v533_v52 }
 0x110   : > { %1416 = vmatprep.mubr.bf16.mxu1 %v6488_v63  ;;  %7139 = vmatmul.mubr.msk.bf16.gmra.mrb[40].mxu0 %vm7757_vm4, %v6590_v39  ;;  %v663_v57 = vrot.slane %v7845_v50, 7  ;;  %v791_v58 = vrot.slane %v7845_v50, 1  ;;  %v7865_v59 = vmax.f32 %v542_v51, 0.0 }
 0x111   : > { %v661_v60 = vrot.slane %v7855_v54, 7  ;;  %v789_v61 = vrot.slane %v7855_v54, 1  ;;  %v7869_v62 = vmax.f32 %v534_v55, 0.0  ;;  %6929 = vmatpush3.bf16.msra.mxu0 %v7351_v49 }
 0x112   : > { %v664_v56 = vrot.slane %v7865_v59, 7  ;;  %v792_v63 = vrot.slane %v7865_v59, 1  ;;  %v6500_v0 = vpack.c.bf16 %v7865_v59, %v7845_v50  ;;  %6930 = vmatprep.subr.bf16.mxu0 %v7352_v53 }
 0x113   : > { %v662_v2 = vrot.slane %v7869_v62, 7  ;;  %v790_v3 = vrot.slane %v7869_v62, 1  ;;  %v6497_v4 = vpack.c.bf16 %v7869_v62, %v7855_v54  ;;  %v7100_v5 = vpop.f32.mrb[16].mxu0 }
 0x114   : > { %v6596_v6 = vpack.c.bf16 %v792_v63, %v791_v58  ;;  %v555_v7 = vadd.f32 %v7100_v5, %v7738_v11  ;;  %v546_v9 = vpop.f32.mrb[17].mxu0  ;;  %v7886_v12 = vpack.c.bf16 %v664_v56, %v663_v57 }
 0x115   : > { %v6593_v13 = vpack.c.bf16 %v790_v3, %v789_v61  ;;  %v547_v14 = vadd.f32 %v7738_v11, %v546_v9  ;;  %v7101_v16 = vpop.f32.mrb[18].mxu0  ;;  %v7889_v18 = vpack.c.bf16 %v662_v2, %v661_v60  ;;  %6931 = vmatpush3.bf16.msra.mxu0 %v7353_v48 }
 0x116   : > { %v7891_v19 = vmax.f32 %v555_v7, 0.0  ;;  %v558_v20 = vadd.f32 %v7101_v16, %v7738_v11  ;;  %v549_v21 = vpop.f32.mrb[19].mxu0  ;;  %6932 = vmatprep.subr.bf16.mxu0 %v7354_v1 }
 0x117   : > { %6537 = vmatmul.mubr.msk.bf16.gmra.mrb[12].mxu1 %vm7752_vm3, %v7793_v8  ;;  %7142 = vmatprep.mubr.msk.bf16.mxu0 %vm7757_vm4, %v6593_v13  ;;  %v7899_v22 = vmax.f32 %v547_v14, 0.0  ;;  %v550_v23 = vadd.f32 %v7738_v11, %v549_v21 }
 0x118   : > { %1424 = vmatprep.mubr.bf16.mxu1 %v6491_v36  ;;  %7143 = vmatmul.mubr.msk.bf16.gmra.mrb[44].mxu0 %vm7757_vm4, %v6596_v6  ;;  %v667_v24 = vrot.slane %v7891_v19, 7  ;;  %v795_v26 = vrot.slane %v7891_v19, 1  ;;  %v7906_v27 = vmax.f32 %v558_v20, 0.0 }
 0x119   : > { %v665_v28 = vrot.slane %v7899_v22, 7  ;;  %v793_v8 = vrot.slane %v7899_v22, 1  ;;  %v7910_v29 = vmax.f32 %v550_v23, 0.0 }
 0x11a   : > { %v668_v30 = vrot.slane %v7906_v27, 7  ;;  %v796_v31 = vrot.slane %v7906_v27, 1  ;;  %v6506_v33 = vpack.c.bf16 %v7906_v27, %v7891_v19  ;;  %v8047_v19 = vld [vmem:[%s9448_s3 + $0x140] sm:$0xff]   ;;  %v8057_v27 = vld [vmem:[%s9448_s3 + $0x148] sm:$0xff]  }
 0x11b   : > { %v666_v34 = vrot.slane %v7910_v29, 7  ;;  %v794_v35 = vrot.slane %v7910_v29, 1  ;;  %v6503_v36 = vpack.c.bf16 %v7910_v29, %v7899_v22  ;;  %v7104_v38 = vpop.f32.mrb[20].mxu0  ;;  %7258 = vmatprep.subr.bf16.mxu1 %v8047_v19  ;;  %v7356_v22 = vld [vmem:[%s9448_s3 + $0x138] sm:$0xff]  }
 0x11c   : > { %v6602_v39 = vpack.c.bf16 %v796_v31, %v795_v26  ;;  %v571_v40 = vadd.f32 %v7104_v38, %v7738_v11  ;;  %v562_v42 = vpop.f32.mrb[21].mxu0  ;;  %v7921_v44 = vpack.c.bf16 %v668_v30, %v667_v24  ;;  %7266 = vmatpush3.bf16.msra.mxu1 %v8047_v19  ;;  %v7357_v29 = vld [vmem:[%s9448_s3 + $0xf8] sm:$0xff]  }
 0x11d   : > { %v6599_v45 = vpack.c.bf16 %v794_v35, %v793_v8  ;;  %v563_v46 = vadd.f32 %v7738_v11, %v562_v42  ;;  %v7105_v49 = vpop.f32.mrb[22].mxu0  ;;  %v7924_v51 = vpack.c.bf16 %v666_v34, %v665_v28  ;;  %7259 = vmatprep.subr.bf16.mxu1 %v8057_v27 }
 0x11e   : > { %v7926_v52 = vmax.f32 %v571_v40, 0.0  ;;  %v574_v53 = vadd.f32 %v7105_v49, %v7738_v11  ;;  %v565_v55 = vpop.f32.mrb[23].mxu0 }
 0x11f   : > { %6540 = vmatmul.mubr.msk.bf16.gmra.mrb[16].mxu1 %vm7752_vm3, %v7840_v47  ;;  %7146 = vmatprep.mubr.msk.bf16.mxu0 %vm7757_vm4, %v6599_v45  ;;  %v7934_v57 = vmax.f32 %v563_v46, 0.0  ;;  %v566_v58 = vadd.f32 %v7738_v11, %v565_v55 }
 0x120   : > { %1432 = vmatprep.mubr.bf16.mxu1 %v6494_v32  ;;  %7147 = vmatmul.mubr.msk.bf16.gmra.mrb[48].mxu0 %vm7757_vm4, %v6602_v39  ;;  %v671_v60 = vrot.slane %v7926_v52, 7  ;;  %v799_v61 = vrot.slane %v7926_v52, 1  ;;  %v7944_v48 = vmax.f32 %v574_v53, 0.0 }
 0x121   : > { %v669_v47 = vrot.slane %v7934_v57, 7  ;;  %v797_v56 = vrot.slane %v7934_v57, 1  ;;  %v7948_v63 = vmax.f32 %v566_v58, 0.0  ;;  %7267 = vmatpush3.bf16.msra.mxu1 %v8057_v27 }
 0x122   : > { %v672_v1 = vrot.slane %v7944_v48, 7  ;;  %v800_v17 = vrot.slane %v7944_v48, 1  ;;  %v6512_v25 = vpack.c.bf16 %v7944_v48, %v7926_v52  ;;  %v8102_v52 = vld [vmem:[%s9448_s3 + $0x170] sm:$0xff]  }
 0x123   : > { %v670_v32 = vrot.slane %v7948_v63, 7  ;;  %v798_v2 = vrot.slane %v7948_v63, 1  ;;  %v6509_v3 = vpack.c.bf16 %v7948_v63, %v7934_v57  ;;  %v7108_v5 = vpop.f32.mrb[24].mxu0  ;;  %v8109_v57 = vld [vmem:[%s9448_s3 + $0x178] sm:$0xff]  }
 0x124   : > { %v6608_v6 = vpack.c.bf16 %v800_v17, %v799_v61  ;;  %v587_v7 = vadd.f32 %v7108_v5, %v7738_v11  ;;  %v578_v9 = vpop.f32.mrb[25].mxu0  ;;  %v7959_v13 = vpack.c.bf16 %v672_v1, %v671_v60 }
 0x125   : > { %v6605_v14 = vpack.c.bf16 %v798_v2, %v797_v56  ;;  %v579_v16 = vadd.f32 %v7738_v11, %v578_v9  ;;  %v7109_v20 = vpop.f32.mrb[26].mxu0  ;;  %v7962_v21 = vpack.c.bf16 %v670_v32, %v669_v47 }
 0x126   : > { %v7964_v23 = vmax.f32 %v587_v7, 0.0  ;;  %v590_v24 = vadd.f32 %v7109_v20, %v7738_v11  ;;  %v581_v26 = vpop.f32.mrb[27].mxu0 }
 0x127   : > { %6543 = vmatmul.mubr.msk.bf16.gmra.mrb[20].mxu1 %vm7752_vm3, %v7837_v43  ;;  %7150 = vmatprep.mubr.msk.bf16.mxu0 %vm7757_vm4, %v6605_v14  ;;  %v7972_v28 = vmax.f32 %v579_v16, 0.0  ;;  %v582_v8 = vadd.f32 %v7738_v11, %v581_v26 }
 0x128   : > { %1440 = vmatprep.mubr.bf16.mxu1 %v6497_v4  ;;  %7151 = vmatmul.mubr.msk.bf16.gmra.mrb[52].mxu0 %vm7757_vm4, %v6608_v6  ;;  %v675_v30 = vrot.slane %v7964_v23, 7  ;;  %v803_v31 = vrot.slane %v7964_v23, 1  ;;  %v7982_v34 = vmax.f32 %v590_v24, 0.0 }
 0x129   : > { %v673_v43 = vrot.slane %v7972_v28, 7  ;;  %v801_v35 = vrot.slane %v7972_v28, 1  ;;  %v634_v38 = vmax.f32 %v582_v8, 0.0 }
 0x12a   : > { %v676_v39 = vrot.slane %v7982_v34, 7  ;;  %v804_v40 = vrot.slane %v7982_v34, 1  ;;  %v6518_v54 = vpack.c.bf16 %v7982_v34, %v7964_v23 }
 0x12b   : > { %v674_v62 = vrot.slane %v634_v38, 7  ;;  %v802_v4 = vrot.slane %v634_v38, 1  ;;  %v6515_v42 = vpack.c.bf16 %v634_v38, %v7972_v28  ;;  %v7112_v45 = vpop.f32.mrb[28].mxu0 }
 0x12c   : > { %v6614_v46 = vpack.c.bf16 %v804_v40, %v803_v31  ;;  %v603_v49 = vadd.f32 %v7112_v45, %v7738_v11  ;;  %v594_v53 = vpop.f32.mrb[29].mxu0  ;;  %v6566_v55 = vpack.c.bf16 %v676_v39, %v675_v30 }
 0x12d   : > { %v6611_v58 = vpack.c.bf16 %v802_v4, %v801_v35  ;;  %v595_v60 = vadd.f32 %v7738_v11, %v594_v53  ;;  %v7113_v61 = vpop.f32.mrb[30].mxu0  ;;  %v6563_v47 = vpack.c.bf16 %v674_v62, %v673_v43 }
 0x12e   : > { %v7993_v56 = vmax.f32 %v603_v49, 0.0  ;;  %v606_v1 = vadd.f32 %v7113_v61, %v7738_v11  ;;  %v597_v17 = vpop.f32.mrb[31].mxu0 }
 0x12f   : > { %6546 = vmatmul.mubr.msk.bf16.gmra.mrb[24].mxu1 %vm7752_vm3, %v7889_v18  ;;  %7154 = vmatprep.mubr.msk.bf16.mxu0 %vm7757_vm4, %v6611_v58  ;;  %v637_v32 = vmax.f32 %v595_v60, 0.0  ;;  %v598_v2 = vadd.f32 %v7738_v11, %v597_v17 }
 0x130   : > { %1448 = vmatprep.mubr.bf16.mxu1 %v6500_v0  ;;  %7155 = vmatmul.mubr.msk.bf16.gmra.mrb[56].mxu0 %vm7757_vm4, %v6614_v46  ;;  %v679_v5 = vrot.slane %v7993_v56, 7  ;;  %v807_v6 = vrot.slane %v7993_v56, 1  ;;  %v640_v7 = vmax.f32 %v606_v1, 0.0 }
 0x131   : > { %v677_v9 = vrot.slane %v637_v32, 7  ;;  %v805_v18 = vrot.slane %v637_v32, 1  ;;  %v638_v14 = vmax.f32 %v598_v2, 0.0 }
 0x132   : > { %v680_v16 = vrot.slane %v640_v7, 7  ;;  %v808_v20 = vrot.slane %v640_v7, 1  ;;  %v6524_v23 = vpack.c.bf16 %v640_v7, %v7993_v56 }
 0x133   : > { %v678_v11 = vrot.slane %v638_v14, 7  ;;  %v806_v24 = vrot.slane %v638_v14, 1  ;;  %v6521_v26 = vpack.c.bf16 %v638_v14, %v637_v32 }
 0x134   : > { %v6620_v50 = vpack.c.bf16 %v808_v20, %v807_v6  ;;  %v6572_v59 = vpack.c.bf16 %v680_v16, %v679_v5 }
 0x135   : > { %v6617_v0 = vpack.c.bf16 %v806_v24, %v805_v18  ;;  %v6569_v28 = vpack.c.bf16 %v678_v11, %v677_v9 }
 0x137   : > { %6549 = vmatmul.mubr.msk.bf16.gmra.mrb[28].mxu1 %vm7752_vm3, %v7886_v12  ;;  %7158 = vmatprep.mubr.msk.bf16.mxu0 %vm7757_vm4, %v6617_v0  ;;  %v7355_v12 = vld [vmem:[%s9448_s3 + $0xf0] sm:$0xff]  }
 0x138   : > { %1456 = vmatprep.mubr.bf16.mxu1 %v6503_v36  ;;  %7159 = vmatmul.mubr.msk.bf16.gmra.mrb[60].mxu0 %vm7757_vm4, %v6620_v50  ;;  %v8077_v36 = vld [vmem:[%s9448_s3 + $0x158] sm:$0xff]  }
 0x139   : > { %6933 = vmatpush3.bf16.msra.mxu0 %v7355_v12 }
 0x13a   : > { %6934 = vmatprep.subr.bf16.mxu0 %v7356_v22 }
 0x13d   : > { %6935 = vmatpush3.bf16.msra.mxu0 %v7357_v29 }
 0x13e   : > { %7162 = vmatprep.subr.bf16.mxu0 %v8047_v19 }
 0x13f   : > { %6552 = vmatmul.mubr.msk.bf16.gmra.mrb[32].mxu1 %vm7752_vm3, %v7924_v51  ;;  %v8093_v51 = vld [vmem:[%s9448_s3 + $0x168] sm:$0xff]  }
 0x140   : > { %1464 = vmatprep.mubr.bf16.mxu1 %v6506_v33  ;;  %v8070_v33 = vld [vmem:[%s9448_s3 + $0x150] sm:$0xff]  }
 0x141   : > { %7260 = vmatprep.subr.bf16.mxu1 %v8070_v33 }
 0x142   : > { %7268 = vmatpush3.bf16.msra.mxu1 %v8070_v33 }
 0x143   : > { %7261 = vmatprep.subr.bf16.mxu1 %v8077_v36 }
 0x146   : > { %7269 = vmatpush3.bf16.msra.mxu1 %v8077_v36 }
 0x147   : > { %6555 = vmatmul.mubr.msk.bf16.gmra.mrb[36].mxu1 %vm7752_vm3, %v7921_v44  ;;  %v8086_v44 = vld [vmem:[%s9448_s3 + $0x160] sm:$0xff]  }
 0x148   : > { %1472 = vmatprep.mubr.bf16.mxu1 %v6509_v3  ;;  %7262 = vmatprep.subr.bf16.mxu1 %v8086_v44  ;;  %v8118_v3 = vld [vmem:[%s9449_s4] ss:$0 sm:$0xff] }
 0x14a   : > { %7270 = vmatpush3.bf16.msra.mxu1 %v8086_v44 }
 0x14b   : > { %7263 = vmatprep.subr.bf16.mxu1 %v8093_v51 }
 0x14e   : > { %7271 = vmatpush3.bf16.msra.mxu1 %v8093_v51 }
 0x14f   : > { %6558 = vmatmul.mubr.msk.bf16.gmra.mrb[40].mxu1 %vm7752_vm3, %v7962_v21  ;;  %7264 = vmatprep.subr.bf16.mxu1 %v8102_v52 }
 0x150   : > { %1480 = vmatprep.mubr.bf16.mxu1 %v6512_v25 }
 0x152   : > { %7272 = vmatpush3.bf16.msra.mxu1 %v8102_v52 }
 0x153   : > { %7265 = vmatprep.subr.bf16.mxu1 %v8109_v57 }
 0x156   : > { %7273 = vmatpush3.bf16.msra.mxu1 %v8109_v57 }
 0x157   : > { %6561 = vmatmul.mubr.msk.bf16.gmra.mrb[44].mxu1 %vm7752_vm3, %v7959_v13 }
 0x158   : > { %1488 = vmatprep.mubr.bf16.mxu1 %v6515_v42 }
 0x15f   : > { %6564 = vmatmul.mubr.msk.bf16.gmra.mrb[48].mxu1 %vm7752_vm3, %v6563_v47 }
 0x160   : > { %1496 = vmatprep.mubr.bf16.mxu1 %v6518_v54 }
 0x167   : > { %6567 = vmatmul.mubr.msk.bf16.gmra.mrb[52].mxu1 %vm7752_vm3, %v6566_v55 }
 0x168   : > { %1504 = vmatprep.mubr.bf16.mxu1 %v6521_v26 }
 0x16f   : > { %6570 = vmatmul.mubr.msk.bf16.gmra.mrb[56].mxu1 %vm7752_vm3, %v6569_v28 }
 0x170   : > { %1512 = vmatprep.mubr.bf16.mxu1 %v6524_v23 }
 0x177   : > { %6573 = vmatmul.mubr.msk.bf16.gmra.mrb[60].mxu1 %vm7752_vm3, %v6572_v59 }
 0x1d2   : > { %v6800_v48 = vpop.f32.mrb[0].mxu1 }
 0x1d3   : > { %v6801_v63 = vpop.f32.mrb[1].mxu1  ;;  %v7132_v25 = vpop.f32.mrb[32].mxu0 }
 0x1d4   : > { %v6802_v13 = vadd.f32 %v6801_v63, %v6800_v48  ;;  %v6803_v21 = vpop.f32.mrb[2].mxu1  ;;  %v1555_v8 = vpop.f32.mrb[33].mxu0 }
 0x1d5   : > { %v6804_v30 = vpop.f32.mrb[3].mxu1  ;;  %v7133_v31 = vpop.f32.mrb[34].mxu0 }
 0x1d6   : > { %v1395_v34 = vadd.f32 %v6802_v13, %v8118_v3  ;;  %v6805_v43 = vadd.f32 %v6804_v30, %v6803_v21  ;;  %v1558_v35 = vpop.f32.mrb[35].mxu0 }
 0x1d8   : > { %v1556_v38 = vadd.f32 %v1555_v8, %v1395_v34  ;;  %v1398_v39 = vadd.f32 %v6805_v43, %v8118_v3 }
 0x1da   : > { %v1682_v40 = vmax.f32 %v1556_v38, 0.0  ;;  %v1559_v54 = vadd.f32 %v1558_v35, %v1398_v39  ;;  %v6806_v62 = vpop.f32.mrb[4].mxu1 }
 0x1db   : > { %v6807_v4 = vpop.f32.mrb[5].mxu1  ;;  %v8122_v42 = vpop.f32.mrb[36].mxu0 }
 0x1dc   : > { %v1683_v45 = vmax.f32 %v1559_v54, 0.0  ;;  %v6808_v46 = vadd.f32 %v6807_v4, %v6806_v62  ;;  %v6809_v49 = vpop.f32.mrb[6].mxu1  ;;  %v1571_v53 = vpop.f32.mrb[37].mxu0  ;;  %v1714_v55 = vrot.slane %v1682_v40, 7  ;;  %v1842_v58 = vrot.slane %v1682_v40, 1 }
 0x1dd   : > { %v6810_v60 = vpop.f32.mrb[7].mxu1  ;;  %v8124_v61 = vpop.f32.mrb[38].mxu0 }
 0x1de   : > { %v1715_v47 = vrot.slane %v1683_v45, 7  ;;  %v1843_v56 = vrot.slane %v1683_v45, 1  ;;  %v1403_v1 = vadd.f32 %v6808_v46, %v8118_v3  ;;  %v6811_v17 = vadd.f32 %v6810_v60, %v6809_v49  ;;  %v1574_v32 = vpop.f32.mrb[39].mxu0 }
 0x1df   : > { %v6623_v2 = vpack.c.bf16 %v1683_v45, %v1682_v40 }
 0x1e0   : > { %v6671_v5 = vpack.c.bf16 %v1715_v47, %v1714_v55  ;;  %v1564_v6 = vadd.f32 %v7132_v25, %v1403_v1  ;;  %v1406_v7 = vadd.f32 %v6811_v17, %v8118_v3  ;;  %v8128_v9 = vpack.c.bf16 %v1843_v56, %v1842_v58 }
 0x1e1   : > { %2459 = vmatprep.mubr.bf16.mxu0 %v6623_v2 }
 0x1e2   : > { %v1684_v18 = vmax.f32 %v1564_v6, 0.0  ;;  %v1567_v14 = vadd.f32 %v7133_v31, %v1406_v7  ;;  %v6812_v16 = vpop.f32.mrb[8].mxu1  ;;  %6672 = vmatmul.mubr.msk.bf16.vlgmr.msra.gmra.mrb[64].mxu0 %vm7752_vm3, %v6671_v5 }
 0x1e3   : > { %7163 = vmatpush3.bf16.msra.mxu0 %v8047_v19  ;;  %v6813_v20 = vpop.f32.mrb[9].mxu1  ;;  %v8133_v23 = vpop.f32.mrb[40].mxu0 }
 0x1e4   : > { %v1685_v11 = vmax.f32 %v1567_v14, 0.0  ;;  %v6814_v24 = vadd.f32 %v6813_v20, %v6812_v16  ;;  %v6815_v26 = vpop.f32.mrb[10].mxu1  ;;  %v8135_v50 = vpop.f32.mrb[41].mxu0  ;;  %7164 = vmatprep.subr.bf16.mxu0 %v8057_v27  ;;  %v1844_v59 = vrot.slane %v1684_v18, 1  ;;  %v1716_v63 = vrot.slane %v1684_v18, 7 }
 0x1e5   : > { %v6816_v0 = vpop.f32.mrb[11].mxu1  ;;  %v8138_v28 = vpop.f32.mrb[42].mxu0 }
 0x1e6   : > { %v1845_v12 = vrot.slane %v1685_v11, 1  ;;  %v1411_v22 = vadd.f32 %v6814_v24, %v8118_v3  ;;  %v6817_v29 = vadd.f32 %v6816_v0, %v6815_v26  ;;  %v6626_v48 = vpack.c.bf16 %v1685_v11, %v1684_v18  ;;  %v8141_v19 = vpop.f32.mrb[43].mxu0 }
 0x1e7   : > { %v1717_v25 = vrot.slane %v1685_v11, 7  ;;  %7165 = vmatpush3.bf16.msra.mxu0 %v8057_v27 }
 0x1e8   : > { %v8144_v13 = vpack.c.bf16 %v1845_v12, %v1844_v59  ;;  %v1572_v21 = vadd.f32 %v1571_v53, %v1411_v22  ;;  %v1414_v8 = vadd.f32 %v6817_v29, %v8118_v3  ;;  %2467 = vmatprep.mubr.bf16.mxu0 %v6626_v48  ;;  %7166 = vmatprep.subr.bf16.mxu0 %v8070_v33 }
 0x1e9   : > { %v6674_v30 = vpack.c.bf16 %v1717_v25, %v1716_v63 }
 0x1ea   : > { %v1686_v31 = vmax.f32 %v1572_v21, 0.0  ;;  %v1575_v34 = vadd.f32 %v1574_v32, %v1414_v8  ;;  %v6818_v43 = vpop.f32.mrb[12].mxu1 }
 0x1eb   : > { %6675 = vmatmul.mubr.msk.bf16.gmra.mrb[68].mxu0 %vm7752_vm3, %v6674_v30  ;;  %v6819_v35 = vpop.f32.mrb[13].mxu1  ;;  %v8150_v38 = vpop.f32.mrb[44].mxu0 }
 0x1ec   : > { %v1687_v39 = vmax.f32 %v1575_v34, 0.0  ;;  %v6820_v27 = vadd.f32 %v6819_v35, %v6818_v43  ;;  %v6821_v40 = vpop.f32.mrb[14].mxu1  ;;  %v8152_v54 = vpop.f32.mrb[45].mxu0  ;;  %7167 = vmatpush3.bf16.msra.mxu0 %v8070_v33  ;;  %v1718_v4 = vrot.slane %v1686_v31, 7  ;;  %v1846_v60 = vrot.slane %v1686_v31, 1 }
 0x1ed   : > { %v6822_v62 = vpop.f32.mrb[15].mxu1  ;;  %v8155_v45 = vpop.f32.mrb[46].mxu0  ;;  %7168 = vmatprep.subr.bf16.mxu0 %v8077_v36 }
 0x1ee   : > { %v1419_v46 = vadd.f32 %v6820_v27, %v8118_v3  ;;  %v6823_v49 = vadd.f32 %v6822_v62, %v6821_v40  ;;  %v6629_v53 = vpack.c.bf16 %v1687_v39, %v1686_v31  ;;  %v1719_v55 = vrot.slane %v1687_v39, 7  ;;  %v8159_v58 = vpop.f32.mrb[47].mxu0 }
 0x1ef   : > { %v1847_v47 = vrot.slane %v1687_v39, 1 }
 0x1f0   : > { %v1580_v56 = vadd.f32 %v8122_v42, %v1419_v46  ;;  %v1422_v1 = vadd.f32 %v6823_v49, %v8118_v3  ;;  %2475 = vmatprep.mubr.bf16.mxu0 %v6629_v53  ;;  %v6677_v33 = vpack.c.bf16 %v1719_v55, %v1718_v4  ;;  %7169 = vmatpush3.bf16.msra.mxu0 %v8077_v36 }
 0x1f1   : > { %v6725_v17 = vpack.c.bf16 %v1847_v47, %v1846_v60  ;;  %7170 = vmatprep.subr.bf16.mxu0 %v8086_v44 }
 0x1f2   : > { %v1688_v32 = vmax.f32 %v1580_v56, 0.0  ;;  %v1583_v2 = vadd.f32 %v8124_v61, %v1422_v1  ;;  %v6824_v5 = vpop.f32.mrb[16].mxu1 }
 0x1f3   : > { %6678 = vmatmul.mubr.msk.bf16.gmra.mrb[72].mxu0 %vm7752_vm3, %v6677_v33  ;;  %7182 = vmatprep.mubr.msk.bf16.mxu1 %vm7757_vm4, %v6725_v17  ;;  %v6825_v42 = vpop.f32.mrb[17].mxu1  ;;  %v8170_v6 = vpop.f32.mrb[48].mxu0 }
 0x1f4   : > { %v1689_v7 = vmax.f32 %v1583_v2, 0.0  ;;  %v6826_v18 = vadd.f32 %v6825_v42, %v6824_v5  ;;  %v6827_v14 = vpop.f32.mrb[18].mxu1  ;;  %v8172_v36 = vpop.f32.mrb[49].mxu0  ;;  %7171 = vmatpush3.bf16.msra.mxu0 %v8086_v44  ;;  %v1848_v16 = vrot.slane %v1688_v32, 1  ;;  %v1720_v12 = vrot.slane %v1688_v32, 7 }
 0x1f5   : > { %v6828_v20 = vpop.f32.mrb[19].mxu1  ;;  %v8175_v61 = vpop.f32.mrb[50].mxu0  ;;  %7172 = vmatprep.subr.bf16.mxu0 %v8093_v51 }
 0x1f6   : > { %v1849_v11 = vrot.slane %v1689_v7, 1  ;;  %v1427_v24 = vadd.f32 %v6826_v18, %v8118_v3  ;;  %v6829_v26 = vadd.f32 %v6828_v20, %v6827_v14  ;;  %v6632_v59 = vpack.c.bf16 %v1689_v7, %v1688_v32  ;;  %v8179_v0 = vpop.f32.mrb[51].mxu0 }
 0x1f7   : > { %v1721_v22 = vrot.slane %v1689_v7, 7 }
 0x1f8   : > { %v6728_v29 = vpack.c.bf16 %v1849_v11, %v1848_v16  ;;  %v1588_v48 = vadd.f32 %v8135_v50, %v1427_v24  ;;  %v1430_v44 = vadd.f32 %v6829_v26, %v8118_v3  ;;  %2483 = vmatprep.mubr.bf16.mxu0 %v6632_v59  ;;  %7173 = vmatpush3.bf16.msra.mxu0 %v8093_v51 }
 0x1f9   : > { %v6680_v63 = vpack.c.bf16 %v1721_v22, %v1720_v12  ;;  %7174 = vmatprep.subr.bf16.mxu0 %v8102_v52 }
 0x1fa   : > { %v1690_v25 = vmax.f32 %v1588_v48, 0.0  ;;  %v1591_v21 = vadd.f32 %v8141_v19, %v1430_v44  ;;  %v6830_v8 = vpop.f32.mrb[20].mxu1  ;;  %7183 = vmatmul.mubr.msk.bf16.vlgmr.msra.gmra.mrb[64].mxu1 %vm7757_vm4, %v6728_v29 }
 0x1fb   : > { %6681 = vmatmul.mubr.msk.bf16.gmra.mrb[76].mxu0 %vm7752_vm3, %v6680_v63  ;;  %v6831_v30 = vpop.f32.mrb[21].mxu1  ;;  %v8190_v50 = vpop.f32.mrb[52].mxu0 }
 0x1fc   : > { %v1691_v31 = vmax.f32 %v1591_v21, 0.0  ;;  %v6832_v34 = vadd.f32 %v6831_v30, %v6830_v8  ;;  %v6833_v43 = vpop.f32.mrb[22].mxu1  ;;  %v8192_v51 = vpop.f32.mrb[53].mxu0  ;;  %7175 = vmatpush3.bf16.msra.mxu0 %v8102_v52  ;;  %v1722_v39 = vrot.slane %v1690_v25, 7  ;;  %v1850_v49 = vrot.slane %v1690_v25, 1 }
 0x1fd   : > { %v6834_v35 = vpop.f32.mrb[23].mxu1  ;;  %v8195_v19 = vpop.f32.mrb[54].mxu0  ;;  %7176 = vmatprep.subr.bf16.mxu0 %v8109_v57 }
 0x1fe   : > { %v1435_v27 = vadd.f32 %v6832_v34, %v8118_v3  ;;  %v6835_v40 = vadd.f32 %v6834_v35, %v6833_v43  ;;  %v6635_v62 = vpack.c.bf16 %v1691_v31, %v1690_v25  ;;  %v1723_v4 = vrot.slane %v1691_v31, 7  ;;  %v8199_v46 = vpop.f32.mrb[55].mxu0 }
 0x1ff   : > { %v1851_v53 = vrot.slane %v1691_v31, 1 }
 0x200   : > { %v1596_v55 = vadd.f32 %v8133_v23, %v1435_v27  ;;  %v1438_v60 = vadd.f32 %v6835_v40, %v8118_v3  ;;  %2491 = vmatprep.mubr.bf16.mxu0 %v6635_v62  ;;  %v6683_v52 = vpack.c.bf16 %v1723_v4, %v1722_v39  ;;  %7177 = vmatpush3.bf16.msra.mxu0 %v8109_v57 }
 0x201   : > { %v6731_v47 = vpack.c.bf16 %v1851_v53, %v1850_v49 }
 0x202   : > { %v1692_v56 = vmax.f32 %v1596_v55, 0.0  ;;  %v1599_v1 = vadd.f32 %v8138_v28, %v1438_v60  ;;  %v6836_v33 = vpop.f32.mrb[24].mxu1 }
 0x203   : > { %6684 = vmatmul.mubr.msk.bf16.gmra.mrb[80].mxu0 %vm7752_vm3, %v6683_v52  ;;  %7186 = vmatprep.mubr.msk.bf16.mxu1 %vm7757_vm4, %v6731_v47  ;;  %v6837_v17 = vpop.f32.mrb[25].mxu1  ;;  %v8209_v32 = vpop.f32.mrb[56].mxu0 }
 0x204   : > { %v1693_v23 = vmax.f32 %v1599_v1, 0.0  ;;  %v6838_v2 = vadd.f32 %v6837_v17, %v6836_v33  ;;  %v6839_v5 = vpop.f32.mrb[26].mxu1  ;;  %v8211_v42 = vpop.f32.mrb[57].mxu0  ;;  %v1724_v7 = vrot.slane %v1692_v56, 7  ;;  %v1852_v24 = vrot.slane %v1692_v56, 1 }
 0x205   : > { %v6840_v57 = vpop.f32.mrb[27].mxu1  ;;  %v8213_v18 = vpop.f32.mrb[58].mxu0 }
 0x206   : > { %v1443_v28 = vadd.f32 %v6838_v2, %v8118_v3  ;;  %v6841_v14 = vadd.f32 %v6840_v57, %v6839_v5  ;;  %v6638_v16 = vpack.c.bf16 %v1693_v23, %v1692_v56  ;;  %v1725_v20 = vrot.slane %v1693_v23, 7  ;;  %v8216_v11 = vpop.f32.mrb[59].mxu0 }
 0x207   : > { %v1853_v26 = vrot.slane %v1693_v23, 1 }
 0x208   : > { %v1604_v59 = vadd.f32 %v8152_v54, %v1443_v28  ;;  %v1446_v12 = vadd.f32 %v6841_v14, %v8118_v3  ;;  %2499 = vmatprep.mubr.bf16.mxu0 %v6638_v16  ;;  %v6686_v22 = vpack.c.bf16 %v1725_v20, %v1724_v7 }
 0x209   : > { %v6734_v29 = vpack.c.bf16 %v1853_v26, %v1852_v24 }
 0x20a   : > { %v1694_v48 = vmax.f32 %v1604_v59, 0.0  ;;  %v1607_v44 = vadd.f32 %v8159_v58, %v1446_v12  ;;  %v6842_v63 = vpop.f32.mrb[28].mxu1 }
 0x20b   : > { %6687 = vmatmul.mubr.msk.bf16.gmra.mrb[84].mxu0 %vm7752_vm3, %v6686_v22  ;;  %7187 = vmatmul.mubr.msk.bf16.gmra.mrb[68].mxu1 %vm7757_vm4, %v6734_v29  ;;  %v6843_v25 = vpop.f32.mrb[29].mxu1  ;;  %v8225_v21 = vpop.f32.mrb[60].mxu0 }
 0x20c   : > { %v1695_v8 = vmax.f32 %v1607_v44, 0.0  ;;  %v6844_v54 = vadd.f32 %v6843_v25, %v6842_v63  ;;  %v6845_v30 = vpop.f32.mrb[30].mxu1  ;;  %v8227_v31 = vpop.f32.mrb[61].mxu0  ;;  %v1726_v43 = vrot.slane %v1694_v48, 7  ;;  %v1854_v4 = vrot.slane %v1694_v48, 1 }
 0x20d   : > { %v6846_v34 = vpop.f32.mrb[31].mxu1  ;;  %v8229_v35 = vpop.f32.mrb[62].mxu0 }
 0x20e   : > { %v1451_v58 = vadd.f32 %v6844_v54, %v8118_v3  ;;  %v6847_v39 = vadd.f32 %v6846_v34, %v6845_v30  ;;  %v6641_v27 = vpack.c.bf16 %v1695_v8, %v1694_v48  ;;  %v1727_v40 = vrot.slane %v1695_v8, 7  ;;  %v8232_v62 = vpop.f32.mrb[63].mxu0 }
 0x20f   : > { %v1855_v49 = vrot.slane %v1695_v8, 1 }
 0x210   : > { %v1612_v53 = vadd.f32 %v8150_v38, %v1451_v58  ;;  %v1454_v55 = vadd.f32 %v6847_v39, %v8118_v3  ;;  %2507 = vmatprep.mubr.bf16.mxu0 %v6641_v27  ;;  %v6689_v60 = vpack.c.bf16 %v1727_v40, %v1726_v43 }
 0x211   : > { %v6737_v52 = vpack.c.bf16 %v1855_v49, %v1854_v4 }
 0x212   : > { %v1696_v47 = vmax.f32 %v1612_v53, 0.0  ;;  %v1615_v56 = vadd.f32 %v8155_v45, %v1454_v55  ;;  %v6848_v1 = vpop.f32.mrb[32].mxu1 }
 0x213   : > { %6690 = vmatmul.mubr.msk.bf16.gmra.mrb[88].mxu0 %vm7752_vm3, %v6689_v60  ;;  %7190 = vmatprep.mubr.msk.bf16.mxu1 %vm7757_vm4, %v6737_v52  ;;  %v6849_v33 = vpop.f32.mrb[33].mxu1 }
 0x214   : > { %v1697_v17 = vmax.f32 %v1615_v56, 0.0  ;;  %v6850_v23 = vadd.f32 %v6849_v33, %v6848_v1  ;;  %v6851_v2 = vpop.f32.mrb[34].mxu1  ;;  %v1728_v5 = vrot.slane %v1696_v47, 7  ;;  %v1856_v16 = vrot.slane %v1696_v47, 1 }
 0x215   : > { %v6852_v38 = vpop.f32.mrb[35].mxu1 }
 0x216   : > { %v1459_v57 = vadd.f32 %v6850_v23, %v8118_v3  ;;  %v6853_v7 = vadd.f32 %v6852_v38, %v6851_v2  ;;  %v6644_v28 = vpack.c.bf16 %v1697_v17, %v1696_v47  ;;  %v1729_v14 = vrot.slane %v1697_v17, 7 }
 0x217   : > { %v1857_v45 = vrot.slane %v1697_v17, 1 }
 0x218   : > { %v1620_v20 = vadd.f32 %v8172_v36, %v1459_v57  ;;  %v1462_v24 = vadd.f32 %v6853_v7, %v8118_v3  ;;  %2515 = vmatprep.mubr.bf16.mxu0 %v6644_v28  ;;  %v6692_v26 = vpack.c.bf16 %v1729_v14, %v1728_v5 }
 0x219   : > { %v6740_v59 = vpack.c.bf16 %v1857_v45, %v1856_v16 }
 0x21a   : > { %v1698_v12 = vmax.f32 %v1620_v20, 0.0  ;;  %v1623_v22 = vadd.f32 %v8179_v0, %v1462_v24  ;;  %v6854_v29 = vpop.f32.mrb[36].mxu1 }
 0x21b   : > { %6693 = vmatmul.mubr.msk.bf16.gmra.mrb[92].mxu0 %vm7752_vm3, %v6692_v26  ;;  %7191 = vmatmul.mubr.msk.bf16.gmra.mrb[72].mxu1 %vm7757_vm4, %v6740_v59  ;;  %v6855_v48 = vpop.f32.mrb[37].mxu1 }
 0x21c   : > { %v1699_v44 = vmax.f32 %v1623_v22, 0.0  ;;  %v6856_v63 = vadd.f32 %v6855_v48, %v6854_v29  ;;  %v6857_v25 = vpop.f32.mrb[38].mxu1  ;;  %v1730_v8 = vrot.slane %v1698_v12, 7  ;;  %v1858_v58 = vrot.slane %v1698_v12, 1 }
 0x21d   : > { %v6858_v36 = vpop.f32.mrb[39].mxu1 }
 0x21e   : > { %v1467_v54 = vadd.f32 %v6856_v63, %v8118_v3  ;;  %v6859_v30 = vadd.f32 %v6858_v36, %v6857_v25  ;;  %v6647_v34 = vpack.c.bf16 %v1699_v44, %v1698_v12  ;;  %v1731_v43 = vrot.slane %v1699_v44, 7 }
 0x21f   : > { %v1859_v0 = vrot.slane %v1699_v44, 1 }
 0x220   : > { %v1628_v39 = vadd.f32 %v8170_v6, %v1467_v54  ;;  %v1470_v27 = vadd.f32 %v6859_v30, %v8118_v3  ;;  %2523 = vmatprep.mubr.bf16.mxu0 %v6647_v34  ;;  %v6695_v40 = vpack.c.bf16 %v1731_v43, %v1730_v8 }
 0x221   : > { %v6743_v4 = vpack.c.bf16 %v1859_v0, %v1858_v58 }
 0x222   : > { %v1700_v49 = vmax.f32 %v1628_v39, 0.0  ;;  %v1631_v53 = vadd.f32 %v8175_v61, %v1470_v27  ;;  %v6860_v55 = vpop.f32.mrb[40].mxu1 }
 0x223   : > { %6696 = vmatmul.mubr.msk.bf16.gmra.mrb[96].mxu0 %vm7752_vm3, %v6695_v40  ;;  %7194 = vmatprep.mubr.msk.bf16.mxu1 %vm7757_vm4, %v6743_v4  ;;  %v6861_v60 = vpop.f32.mrb[41].mxu1 }
 0x224   : > { %v1701_v52 = vmax.f32 %v1631_v53, 0.0  ;;  %v6862_v47 = vadd.f32 %v6861_v60, %v6860_v55  ;;  %v6863_v56 = vpop.f32.mrb[42].mxu1  ;;  %v1732_v1 = vrot.slane %v1700_v49, 7  ;;  %v1860_v38 = vrot.slane %v1700_v49, 1 }
 0x225   : > { %v6864_v6 = vpop.f32.mrb[43].mxu1 }
 0x226   : > { %v1475_v33 = vadd.f32 %v6862_v47, %v8118_v3  ;;  %v6865_v17 = vadd.f32 %v6864_v6, %v6863_v56  ;;  %v6650_v23 = vpack.c.bf16 %v1701_v52, %v1700_v49  ;;  %v1733_v2 = vrot.slane %v1701_v52, 7 }
 0x227   : > { %v1861_v61 = vrot.slane %v1701_v52, 1 }
 0x228   : > { %v1636_v5 = vadd.f32 %v8192_v51, %v1475_v33  ;;  %v1478_v57 = vadd.f32 %v6865_v17, %v8118_v3  ;;  %2531 = vmatprep.mubr.bf16.mxu0 %v6650_v23  ;;  %v6698_v7 = vpack.c.bf16 %v1733_v2, %v1732_v1 }
 0x229   : > { %v6746_v28 = vpack.c.bf16 %v1861_v61, %v1860_v38 }
 0x22a   : > { %v1702_v14 = vmax.f32 %v1636_v5, 0.0  ;;  %v1639_v16 = vadd.f32 %v8199_v46, %v1478_v57  ;;  %v6866_v45 = vpop.f32.mrb[44].mxu1 }
 0x22b   : > { %6699 = vmatmul.mubr.msk.bf16.gmra.mrb[100].mxu0 %vm7752_vm3, %v6698_v7  ;;  %7195 = vmatmul.mubr.msk.bf16.gmra.mrb[76].mxu1 %vm7757_vm4, %v6746_v28  ;;  %v6867_v20 = vpop.f32.mrb[45].mxu1 }
 0x22c   : > { %v1703_v24 = vmax.f32 %v1639_v16, 0.0  ;;  %v6868_v26 = vadd.f32 %v6867_v20, %v6866_v45  ;;  %v6869_v59 = vpop.f32.mrb[46].mxu1  ;;  %v1734_v12 = vrot.slane %v1702_v14, 7  ;;  %v1862_v63 = vrot.slane %v1702_v14, 1 }
 0x22d   : > { %v6870_v51 = vpop.f32.mrb[47].mxu1 }
 0x22e   : > { %v1483_v22 = vadd.f32 %v6868_v26, %v8118_v3  ;;  %v6871_v29 = vadd.f32 %v6870_v51, %v6869_v59  ;;  %v6653_v48 = vpack.c.bf16 %v1703_v24, %v1702_v14  ;;  %v1735_v44 = vrot.slane %v1703_v24, 7 }
 0x22f   : > { %v1863_v46 = vrot.slane %v1703_v24, 1 }
 0x230   : > { %v1644_v25 = vadd.f32 %v8190_v50, %v1483_v22  ;;  %v1486_v36 = vadd.f32 %v6871_v29, %v8118_v3  ;;  %2539 = vmatprep.mubr.bf16.mxu0 %v6653_v48  ;;  %v6701_v8 = vpack.c.bf16 %v1735_v44, %v1734_v12 }
 0x231   : > { %v6749_v54 = vpack.c.bf16 %v1863_v46, %v1862_v63 }
 0x232   : > { %v1704_v30 = vmax.f32 %v1644_v25, 0.0  ;;  %v1647_v34 = vadd.f32 %v8195_v19, %v1486_v36  ;;  %v6872_v43 = vpop.f32.mrb[48].mxu1 }
 0x233   : > { %6702 = vmatmul.mubr.msk.bf16.gmra.mrb[104].mxu0 %vm7752_vm3, %v6701_v8  ;;  %7198 = vmatprep.mubr.msk.bf16.mxu1 %vm7757_vm4, %v6749_v54  ;;  %v6873_v58 = vpop.f32.mrb[49].mxu1 }
 0x234   : > { %v1705_v0 = vmax.f32 %v1647_v34, 0.0  ;;  %v6874_v39 = vadd.f32 %v6873_v58, %v6872_v43  ;;  %v6875_v27 = vpop.f32.mrb[50].mxu1  ;;  %v1736_v40 = vrot.slane %v1704_v30, 7  ;;  %v1864_v60 = vrot.slane %v1704_v30, 1 }
 0x235   : > { %v6876_v50 = vpop.f32.mrb[51].mxu1 }
 0x236   : > { %v1491_v4 = vadd.f32 %v6874_v39, %v8118_v3  ;;  %v6877_v49 = vadd.f32 %v6876_v50, %v6875_v27  ;;  %v6656_v53 = vpack.c.bf16 %v1705_v0, %v1704_v30  ;;  %v1737_v55 = vrot.slane %v1705_v0, 7 }
 0x237   : > { %v1865_v19 = vrot.slane %v1705_v0, 1 }
 0x238   : > { %v1652_v52 = vadd.f32 %v8211_v42, %v1491_v4  ;;  %v1494_v47 = vadd.f32 %v6877_v49, %v8118_v3  ;;  %2547 = vmatprep.mubr.bf16.mxu0 %v6656_v53  ;;  %v6704_v56 = vpack.c.bf16 %v1737_v55, %v1736_v40 }
 0x239   : > { %v6752_v6 = vpack.c.bf16 %v1865_v19, %v1864_v60 }
 0x23a   : > { %v1706_v1 = vmax.f32 %v1652_v52, 0.0  ;;  %v1655_v33 = vadd.f32 %v8216_v11, %v1494_v47  ;;  %v6878_v17 = vpop.f32.mrb[52].mxu1 }
 0x23b   : > { %6705 = vmatmul.mubr.msk.bf16.gmra.mrb[108].mxu0 %vm7752_vm3, %v6704_v56  ;;  %7199 = vmatmul.mubr.msk.bf16.gmra.mrb[80].mxu1 %vm7757_vm4, %v6752_v6  ;;  %v6879_v23 = vpop.f32.mrb[53].mxu1 }
 0x23c   : > { %v1707_v2 = vmax.f32 %v1655_v33, 0.0  ;;  %v6880_v38 = vadd.f32 %v6879_v23, %v6878_v17  ;;  %v6881_v61 = vpop.f32.mrb[54].mxu1  ;;  %v1738_v5 = vrot.slane %v1706_v1, 7  ;;  %v1866_v16 = vrot.slane %v1706_v1, 1 }
 0x23d   : > { %v6882_v42 = vpop.f32.mrb[55].mxu1 }
 0x23e   : > { %v1499_v57 = vadd.f32 %v6880_v38, %v8118_v3  ;;  %v6883_v7 = vadd.f32 %v6882_v42, %v6881_v61  ;;  %v6659_v28 = vpack.c.bf16 %v1707_v2, %v1706_v1  ;;  %v1739_v14 = vrot.slane %v1707_v2, 7 }
 0x23f   : > { %v1867_v11 = vrot.slane %v1707_v2, 1 }
 0x240   : > { %v1660_v45 = vadd.f32 %v8209_v32, %v1499_v57  ;;  %v1502_v20 = vadd.f32 %v6883_v7, %v8118_v3  ;;  %2555 = vmatprep.mubr.bf16.mxu0 %v6659_v28  ;;  %v6707_v24 = vpack.c.bf16 %v1739_v14, %v1738_v5  ;;  %v7367_v7 = vld [vmem:[%s9450_s5 + $0x8] sm:$0xff]  }
 0x241   : > { %v6755_v26 = vpack.c.bf16 %v1867_v11, %v1866_v16 }
 0x242   : > { %v1708_v59 = vmax.f32 %v1660_v45, 0.0  ;;  %v1663_v51 = vadd.f32 %v8213_v18, %v1502_v20  ;;  %v6884_v12 = vpop.f32.mrb[56].mxu1  ;;  %v7372_v45 = vld [vmem:[%s9450_s5 + $0x30] sm:$0xff]  }
 0x243   : > { %6708 = vmatmul.mubr.msk.bf16.gmra.mrb[112].mxu0 %vm7752_vm3, %v6707_v24  ;;  %7202 = vmatprep.mubr.msk.bf16.mxu1 %vm7757_vm4, %v6755_v26  ;;  %v6885_v22 = vpop.f32.mrb[57].mxu1  ;;  %v7373_v26 = vld [vmem:[%s9450_s5 + $0x38] sm:$0xff]  }
 0x244   : > { %v1709_v29 = vmax.f32 %v1663_v51, 0.0  ;;  %v6886_v48 = vadd.f32 %v6885_v22, %v6884_v12  ;;  %v6887_v44 = vpop.f32.mrb[58].mxu1  ;;  %v1740_v63 = vrot.slane %v1708_v59, 7  ;;  %v1868_v54 = vrot.slane %v1708_v59, 1 }
 0x245   : > { %v6888_v32 = vpop.f32.mrb[59].mxu1 }
 0x246   : > { %v1507_v46 = vadd.f32 %v6886_v48, %v8118_v3  ;;  %v6889_v25 = vadd.f32 %v6888_v32, %v6887_v44  ;;  %v6662_v36 = vpack.c.bf16 %v1709_v29, %v1708_v59  ;;  %v1741_v8 = vrot.slane %v1709_v29, 7 }
 0x247   : > { %v1869_v18 = vrot.slane %v1709_v29, 1 }
 0x248   : > { %v1668_v30 = vadd.f32 %v8227_v31, %v1507_v46  ;;  %v1510_v34 = vadd.f32 %v6889_v25, %v8118_v3  ;;  %2563 = vmatprep.mubr.bf16.mxu0 %v6662_v36  ;;  %v6710_v43 = vpack.c.bf16 %v1741_v8, %v1740_v63  ;;  %v8350_v8 = vld [vmem:[%s9449_s4 + $0x1] ss:$0 sm:$0xff] }
 0x249   : > { %v6758_v58 = vpack.c.bf16 %v1869_v18, %v1868_v54 }
 0x24a   : > { %v1710_v0 = vmax.f32 %v1668_v30, 0.0  ;;  %v1671_v39 = vadd.f32 %v8232_v62, %v1510_v34  ;;  %v6890_v27 = vpop.f32.mrb[60].mxu1 }
 0x24b   : > { %6711 = vmatmul.mubr.msk.bf16.gmra.mrb[116].mxu0 %vm7752_vm3, %v6710_v43  ;;  %7203 = vmatmul.mubr.msk.bf16.gmra.mrb[84].mxu1 %vm7757_vm4, %v6758_v58  ;;  %v6891_v50 = vpop.f32.mrb[61].mxu1 }
 0x24c   : > { %v1711_v40 = vmax.f32 %v1671_v39, 0.0  ;;  %v6892_v4 = vadd.f32 %v6891_v50, %v6890_v27  ;;  %v6893_v49 = vpop.f32.mrb[62].mxu1  ;;  %v1742_v53 = vrot.slane %v1710_v0, 7  ;;  %v1870_v47 = vrot.slane %v1710_v0, 1 }
 0x24d   : > { %v6894_v31 = vpop.f32.mrb[63].mxu1 }
 0x24e   : > { %v1515_v55 = vadd.f32 %v6892_v4, %v8118_v3  ;;  %v6895_v60 = vadd.f32 %v6894_v31, %v6893_v49  ;;  %v6665_v19 = vpack.c.bf16 %v1711_v40, %v1710_v0  ;;  %v1743_v52 = vrot.slane %v1711_v40, 7 }
 0x24f   : > { %v1871_v62 = vrot.slane %v1711_v40, 1 }
 0x250   : > { %v1676_v56 = vadd.f32 %v8225_v21, %v1515_v55  ;;  %v1518_v6 = vadd.f32 %v6895_v60, %v8118_v3  ;;  %2571 = vmatprep.mubr.bf16.mxu0 %v6665_v19  ;;  %v6713_v1 = vpack.c.bf16 %v1743_v52, %v1742_v53 }
 0x251   : > { %v6761_v33 = vpack.c.bf16 %v1871_v62, %v1870_v47 }
 0x252   : > { %v1712_v17 = vmax.f32 %v1676_v56, 0.0  ;;  %v1679_v23 = vadd.f32 %v8229_v35, %v1518_v6  ;;  %v7366_v35 = vld [vmem:[%s9450_s5] sm:$0xff]  }
 0x253   : > { %6714 = vmatmul.mubr.msk.bf16.gmra.mrb[120].mxu0 %vm7752_vm3, %v6713_v1  ;;  %7206 = vmatprep.mubr.msk.bf16.mxu1 %vm7757_vm4, %v6761_v33 }
 0x254   : > { %v1713_v2 = vmax.f32 %v1679_v23, 0.0  ;;  %v1744_v38 = vrot.slane %v1712_v17, 7  ;;  %v1872_v5 = vrot.slane %v1712_v17, 1  ;;  %7210 = vmatprep.subr.bf16.mxu1 %v7366_v35 }
 0x255   : > { %7211 = vmatpush3.bf16.msra.mxu1 %v7366_v35 }
 0x256   : > { %v6668_v61 = vpack.c.bf16 %v1713_v2, %v1712_v17  ;;  %v1745_v42 = vrot.slane %v1713_v2, 7  ;;  %v1873_v21 = vrot.slane %v1713_v2, 1  ;;  %7212 = vmatprep.subr.bf16.mxu1 %v7367_v7 }
 0x258   : > { %2579 = vmatprep.mubr.bf16.mxu0 %v6668_v61  ;;  %v6716_v3 = vpack.c.bf16 %v1745_v42, %v1744_v38  ;;  %v6764_v57 = vpack.c.bf16 %v1873_v21, %v1872_v5 }
 0x259   : > { %7213 = vmatpush3.bf16.msra.mxu1 %v7367_v7 }
 0x25a   : > { %7207 = vmatmul.mubr.msk.bf16.gmra.mrb[88].mxu1 %vm7757_vm4, %v6764_v57  ;;  %7214 = vmatprep.subr.bf16.mxu1 %v7368_v37 }
 0x25b   : > { %6717 = vmatmul.mubr.msk.bf16.gmra.mrb[124].mxu0 %vm7752_vm3, %v6716_v3  ;;  %vm6067_vm3 = vcmask 1048512  }
 0x25c   : > { %7178 = vmatprep.mubr.msk.bf16.mxu0 %vm7757_vm4, %v8128_v9  ;;  %v7370_v9 = vld [vmem:[%s9450_s5 + $0x20] sm:$0xff]  }
 0x25d   : > { %7215 = vmatpush3.bf16.msra.mxu1 %v7368_v37 }
 0x25e   : > { %7216 = vmatprep.subr.bf16.mxu1 %v7369_v41 }
 0x261   : > { %7217 = vmatpush3.bf16.msra.mxu1 %v7369_v41 }
 0x262   : > { %7218 = vmatprep.subr.bf16.mxu1 %v7370_v9 }
 0x263   : > { %7179 = vmatmul.mubr.msk.bf16.vlgmr.msra.gmra.mrb[128].mxu0 %vm7757_vm4, %v8144_v13  ;;  %v7371_v13 = vld [vmem:[%s9450_s5 + $0x28] sm:$0xff]   ;;  %vm6166_vm4 = vcmp.lt.s32.totalorder %v641_v10, 256 }
 0x265   : > { %7219 = vmatpush3.bf16.msra.mxu1 %v7370_v9 }
 0x266   : > { %7220 = vmatprep.subr.bf16.mxu1 %v7371_v13 }
 0x269   : > { %7221 = vmatpush3.bf16.msra.mxu1 %v7371_v13 }
 0x26a   : > { %7222 = vmatprep.subr.bf16.mxu1 %v7372_v45 }
 0x26d   : > { %7223 = vmatpush3.bf16.msra.mxu1 %v7372_v45 }
 0x26e   : > { %7224 = vmatprep.subr.bf16.mxu1 %v7373_v26 }
 0x271   : > { %7225 = vmatpush3.bf16.msra.mxu1 %v7373_v26 }
 0x2b5   : > { %v6936_v28 = vpop.f32.mrb[64].mxu0 }
 0x2b6   : > { %v6937_v14 = vpop.f32.mrb[65].mxu0 }
 0x2b7   : > { %v8333_v16 = vadd.f32 %v6937_v14, %v6936_v28  ;;  %v6939_v11 = vpop.f32.mrb[66].mxu0 }
 0x2b8   : > { %v6940_v20 = vpop.f32.mrb[67].mxu0 }
 0x2b9   : > { %v8338_v24 = vadd.f32 %v6940_v20, %v6939_v11 }
 0x2be   : > { %v6942_v59 = vpop.f32.mrb[68].mxu0 }
 0x2bf   : > { %v6943_v51 = vpop.f32.mrb[69].mxu0 }
 0x2c0   : > { %v8343_v12 = vadd.f32 %v6943_v51, %v6942_v59  ;;  %v6945_v22 = vpop.f32.mrb[70].mxu0 }
 0x2c1   : > { %v6946_v29 = vpop.f32.mrb[71].mxu0 }
 0x2c2   : > { %v8345_v48 = vadd.f32 %v6946_v29, %v6945_v22 }
 0x2c6   : > { %v6948_v44 = vpop.f32.mrb[72].mxu0 }
 0x2c7   : > { %v6949_v32 = vpop.f32.mrb[73].mxu0 }
 0x2c8   : > { %v6950_v63 = vadd.f32 %v6949_v32, %v6948_v44  ;;  %v6951_v46 = vpop.f32.mrb[74].mxu0 }
 0x2c9   : > { %v6952_v25 = vpop.f32.mrb[75].mxu0 }
 0x2ca   : > { %v6953_v36 = vadd.f32 %v6952_v25, %v6951_v46  ;;  %v2478_v18 = vadd.f32 %v6950_v63, %v8350_v8 }
 0x2cc   : > { %v2481_v39 = vadd.f32 %v6953_v36, %v8350_v8 }
 0x2cd   : > { %v7184_v54 = vpop.f32.mrb[64].mxu1 }
 0x2ce   : > { %v6954_v30 = vpop.f32.mrb[76].mxu0  ;;  %v2638_v34 = vpop.f32.mrb[65].mxu1 }
 0x2cf   : > { %v6955_v43 = vpop.f32.mrb[77].mxu0  ;;  %v2639_v58 = vadd.f32 %v2638_v34, %v2478_v18  ;;  %v7185_v0 = vpop.f32.mrb[66].mxu1 }
 0x2d0   : > { %v6956_v27 = vadd.f32 %v6955_v43, %v6954_v30  ;;  %v6957_v50 = vpop.f32.mrb[78].mxu0  ;;  %v2641_v40 = vpop.f32.mrb[67].mxu1 }
 0x2d1   : > { %v6958_v4 = vpop.f32.mrb[79].mxu0  ;;  %v2642_v49 = vadd.f32 %v2641_v40, %v2481_v39  ;;  %v2753_v55 = vmax.f32 %v2639_v58, 0.0 }
 0x2d2   : > { %v2486_v31 = vadd.f32 %v6956_v27, %v8350_v8  ;;  %v6959_v53 = vadd.f32 %v6958_v4, %v6957_v50 }
 0x2d3   : > { %v2754_v60 = vmax.f32 %v2642_v49, 0.0 }
 0x2d4   : > { %v2647_v19 = vadd.f32 %v7184_v54, %v2486_v31  ;;  %v2489_v52 = vadd.f32 %v6959_v53, %v8350_v8 }
 0x2d5   : > { %v8356_v47 = vpack.c.bf16 %v2754_v60, %v2753_v55 }
 0x2d6   : > { %v2650_v62 = vadd.f32 %v7185_v0, %v2489_v52  ;;  %v6960_v56 = vpop.f32.mrb[80].mxu0  ;;  %v2755_v1 = vmax.f32 %v2647_v19, 0.0 }
 0x2d7   : > { %v6961_v6 = vpop.f32.mrb[81].mxu0 }
 0x2d8   : > { %v2756_v33 = vmax.f32 %v2650_v62, 0.0  ;;  %v6962_v17 = vadd.f32 %v6961_v6, %v6960_v56  ;;  %v6963_v23 = vpop.f32.mrb[82].mxu0 }
 0x2d9   : > { %v6964_v2 = vpop.f32.mrb[83].mxu0 }
 0x2da   : > { %v6965_v38 = vadd.f32 %v6964_v2, %v6963_v23  ;;  %v8358_v61 = vpack.c.bf16 %v2756_v33, %v2755_v1  ;;  %v2494_v21 = vadd.f32 %v6962_v17, %v8350_v8 }
 0x2dc   : > { %v2497_v9 = vadd.f32 %v6965_v38, %v8350_v8 }
 0x2de   : > { %v6966_v42 = vpop.f32.mrb[84].mxu0  ;;  %v7188_v5 = vpop.f32.mrb[68].mxu1 }
 0x2df   : > { %v6967_v3 = vpop.f32.mrb[85].mxu0  ;;  %v2654_v57 = vpop.f32.mrb[69].mxu1 }
 0x2e0   : > { %v6968_v35 = vadd.f32 %v6967_v3, %v6966_v42  ;;  %v2655_v7 = vadd.f32 %v2654_v57, %v2494_v21  ;;  %v6969_v37 = vpop.f32.mrb[86].mxu0  ;;  %v7189_v41 = vpop.f32.mrb[70].mxu1  ;;  %v3164_v3 = vld [vmem:[#allocation2] sm:$0x1] }
 0x2e1   : > { %v6970_v13 = vpop.f32.mrb[87].mxu0  ;;  %v2657_v28 = vpop.f32.mrb[71].mxu1 }
 0x2e2   : > { %v2502_v14 = vadd.f32 %v6968_v35, %v8350_v8  ;;  %v6971_v11 = vadd.f32 %v6970_v13, %v6969_v37  ;;  %v2658_v45 = vadd.f32 %v2657_v28, %v2497_v9  ;;  %v2757_v26 = vmax.f32 %v2655_v7, 0.0 }
 0x2e3   : > { %v7502_v7 = vmov 0  }
 0x2e4   : > { %v2663_v20 = vadd.f32 %v7188_v5, %v2502_v14  ;;  %v2505_v59 = vadd.f32 %v6971_v11, %v8350_v8  ;;  %v2758_v51 = vmax.f32 %v2658_v45, 0.0  ;;  %7315 = vset.pattern.permute.xlu1 %v7502_v7  ;;  %7316 = vset.pattern.permute.xlu0 %v7502_v7 }
 0x2e5   : > { %3167 = vperm.xlu1 %7315, %v3164_v3  }
 0x2e6   : > { %v2666_v22 = vadd.f32 %v7189_v41, %v2505_v59  ;;  %v8364_v29 = vpack.c.bf16 %v2758_v51, %v2757_v26  ;;  %v6972_v44 = vpop.f32.mrb[88].mxu0  ;;  %v2759_v63 = vmax.f32 %v2663_v20, 0.0 }
 0x2e7   : > { %v6973_v32 = vpop.f32.mrb[89].mxu0 }
 0x2e8   : > { %v2760_v46 = vmax.f32 %v2666_v22, 0.0  ;;  %v6974_v25 = vadd.f32 %v6973_v32, %v6972_v44  ;;  %v6975_v36 = vpop.f32.mrb[90].mxu0 }
 0x2e9   : > { %v6976_v54 = vpop.f32.mrb[91].mxu0 }
 0x2ea   : > { %v6977_v18 = vadd.f32 %v6976_v54, %v6975_v36  ;;  %v8366_v30 = vpack.c.bf16 %v2760_v46, %v2759_v63  ;;  %v2510_v58 = vadd.f32 %v6974_v25, %v8350_v8 }
 0x2ec   : > { %v2513_v49 = vadd.f32 %v6977_v18, %v8350_v8 }
 0x2ee   : > { %v6978_v34 = vpop.f32.mrb[92].mxu0  ;;  %v7192_v43 = vpop.f32.mrb[72].mxu1 }
 0x2ef   : > { %v6979_v0 = vpop.f32.mrb[93].mxu0  ;;  %v2670_v39 = vpop.f32.mrb[73].mxu1 }
 0x2f0   : > { %v6980_v27 = vadd.f32 %v6979_v0, %v6978_v34  ;;  %v2671_v50 = vadd.f32 %v2670_v39, %v2510_v58  ;;  %v6981_v40 = vpop.f32.mrb[94].mxu0  ;;  %v7193_v4 = vpop.f32.mrb[74].mxu1 }
 0x2f1   : > { %v6982_v31 = vpop.f32.mrb[95].mxu0  ;;  %v2673_v53 = vpop.f32.mrb[75].mxu1 }
 0x2f2   : > { %v2518_v55 = vadd.f32 %v6980_v27, %v8350_v8  ;;  %v6983_v60 = vadd.f32 %v6982_v31, %v6981_v40  ;;  %v2674_v19 = vadd.f32 %v2673_v53, %v2513_v49  ;;  %v2761_v62 = vmax.f32 %v2671_v50, 0.0 }
 0x2f4   : > { %v2679_v52 = vadd.f32 %v7192_v43, %v2518_v55  ;;  %v2521_v56 = vadd.f32 %v6983_v60, %v8350_v8  ;;  %v2762_v6 = vmax.f32 %v2674_v19, 0.0 }
 0x2f6   : > { %v2682_v1 = vadd.f32 %v7193_v4, %v2521_v56  ;;  %v8372_v33 = vpack.c.bf16 %v2762_v6, %v2761_v62  ;;  %v6984_v17 = vpop.f32.mrb[96].mxu0  ;;  %v2763_v2 = vmax.f32 %v2679_v52, 0.0 }
 0x2f7   : > { %v6985_v23 = vpop.f32.mrb[97].mxu0 }
 0x2f8   : > { %v2764_v38 = vmax.f32 %v2682_v1, 0.0  ;;  %v6986_v42 = vadd.f32 %v6985_v23, %v6984_v17  ;;  %v6987_v5 = vpop.f32.mrb[98].mxu0 }
 0x2f9   : > { %v6988_v21 = vpop.f32.mrb[99].mxu0 }
 0x2fa   : > { %v6989_v57 = vadd.f32 %v6988_v21, %v6987_v5  ;;  %v8374_v35 = vpack.c.bf16 %v2764_v38, %v2763_v2  ;;  %v2526_v9 = vadd.f32 %v6986_v42, %v8350_v8 }
 0x2fc   : > { %v2529_v26 = vadd.f32 %v6989_v57, %v8350_v8 }
 0x2fe   : > { %v6990_v37 = vpop.f32.mrb[100].mxu0  ;;  %v7196_v41 = vpop.f32.mrb[76].mxu1 }
 0x2ff   : > { %v6991_v13 = vpop.f32.mrb[101].mxu0  ;;  %v2686_v28 = vpop.f32.mrb[77].mxu1 }
 0x300   : > { %v6992_v14 = vadd.f32 %v6991_v13, %v6990_v37  ;;  %v2687_v11 = vadd.f32 %v2686_v28, %v2526_v9  ;;  %v6993_v45 = vpop.f32.mrb[102].mxu0  ;;  %v7197_v20 = vpop.f32.mrb[78].mxu1 }
 0x301   : > { %v6994_v59 = vpop.f32.mrb[103].mxu0  ;;  %v2689_v51 = vpop.f32.mrb[79].mxu1 }
 0x302   : > { %v2534_v22 = vadd.f32 %v6992_v14, %v8350_v8  ;;  %v6995_v44 = vadd.f32 %v6994_v59, %v6993_v45  ;;  %v2690_v32 = vadd.f32 %v2689_v51, %v2529_v26  ;;  %v2765_v46 = vmax.f32 %v2687_v11, 0.0 }
 0x304   : > { %v2695_v63 = vadd.f32 %v7196_v41, %v2534_v22  ;;  %v2537_v25 = vadd.f32 %v6995_v44, %v8350_v8  ;;  %v2766_v36 = vmax.f32 %v2690_v32, 0.0 }
 0x306   : > { %v2698_v54 = vadd.f32 %v7197_v20, %v2537_v25  ;;  %v8380_v18 = vpack.c.bf16 %v2766_v36, %v2765_v46  ;;  %v6996_v34 = vpop.f32.mrb[104].mxu0  ;;  %v2767_v58 = vmax.f32 %v2695_v63, 0.0 }
 0x307   : > { %v6997_v43 = vpop.f32.mrb[105].mxu0 }
 0x308   : > { %v2768_v0 = vmax.f32 %v2698_v54, 0.0  ;;  %v6998_v39 = vadd.f32 %v6997_v43, %v6996_v34  ;;  %v6999_v27 = vpop.f32.mrb[106].mxu0 }
 0x309   : > { %v7000_v50 = vpop.f32.mrb[107].mxu0 }
 0x30a   : > { %v7001_v40 = vadd.f32 %v7000_v50, %v6999_v27  ;;  %v8382_v4 = vpack.c.bf16 %v2768_v0, %v2767_v58  ;;  %v2542_v53 = vadd.f32 %v6998_v39, %v8350_v8 }
 0x30c   : > { %v2545_v6 = vadd.f32 %v7001_v40, %v8350_v8 }
 0x30e   : > { %v7002_v49 = vpop.f32.mrb[108].mxu0  ;;  %v7200_v31 = vpop.f32.mrb[80].mxu1 }
 0x30f   : > { %v7003_v55 = vpop.f32.mrb[109].mxu0  ;;  %v2702_v60 = vpop.f32.mrb[81].mxu1 }
 0x310   : > { %v7004_v19 = vadd.f32 %v7003_v55, %v7002_v49  ;;  %v2703_v52 = vadd.f32 %v2702_v60, %v2542_v53  ;;  %v7005_v62 = vpop.f32.mrb[110].mxu0  ;;  %v7201_v56 = vpop.f32.mrb[82].mxu1 }
 0x311   : > { %v7006_v1 = vpop.f32.mrb[111].mxu0  ;;  %v2705_v17 = vpop.f32.mrb[83].mxu1 }
 0x312   : > { %v2550_v23 = vadd.f32 %v7004_v19, %v8350_v8  ;;  %v7007_v2 = vadd.f32 %v7006_v1, %v7005_v62  ;;  %v2706_v38 = vadd.f32 %v2705_v17, %v2545_v6  ;;  %v2769_v5 = vmax.f32 %v2703_v52, 0.0 }
 0x314   : > { %v2711_v42 = vadd.f32 %v7200_v31, %v2550_v23  ;;  %v2553_v21 = vadd.f32 %v7007_v2, %v8350_v8  ;;  %v2770_v3 = vmax.f32 %v2706_v38, 0.0 }
 0x316   : > { %v2714_v57 = vadd.f32 %v7201_v56, %v2553_v21  ;;  %v8388_v7 = vpack.c.bf16 %v2770_v3, %v2769_v5  ;;  %v7008_v37 = vpop.f32.mrb[112].mxu0  ;;  %v2771_v9 = vmax.f32 %v2711_v42, 0.0 }
 0x317   : > { %v7009_v41 = vpop.f32.mrb[113].mxu0 }
 0x318   : > { %v2772_v13 = vmax.f32 %v2714_v57, 0.0  ;;  %v7010_v28 = vadd.f32 %v7009_v41, %v7008_v37  ;;  %v7011_v14 = vpop.f32.mrb[114].mxu0 }
 0x319   : > { %v7012_v11 = vpop.f32.mrb[115].mxu0 }
 0x31a   : > { %v7013_v45 = vadd.f32 %v7012_v11, %v7011_v14  ;;  %v8390_v20 = vpack.c.bf16 %v2772_v13, %v2771_v9  ;;  %v2558_v51 = vadd.f32 %v7010_v28, %v8350_v8 }
 0x31c   : > { %v2561_v36 = vadd.f32 %v7013_v45, %v8350_v8 }
 0x31e   : > { %v7014_v26 = vpop.f32.mrb[116].mxu0  ;;  %v7204_v59 = vpop.f32.mrb[84].mxu1 }
 0x31f   : > { %v7015_v22 = vpop.f32.mrb[117].mxu0  ;;  %v2718_v44 = vpop.f32.mrb[85].mxu1 }
 0x320   : > { %v7016_v32 = vadd.f32 %v7015_v22, %v7014_v26  ;;  %v2719_v63 = vadd.f32 %v2718_v44, %v2558_v51  ;;  %v7017_v46 = vpop.f32.mrb[118].mxu0  ;;  %v7205_v25 = vpop.f32.mrb[86].mxu1  ;;  %v2470_v22 = vadd.f32 %v8343_v12, %v8350_v8 }
 0x321   : > { %v7018_v54 = vpop.f32.mrb[119].mxu0  ;;  %v2721_v34 = vpop.f32.mrb[87].mxu1 }
 0x322   : > { %v2566_v43 = vadd.f32 %v7016_v32, %v8350_v8  ;;  %v7019_v58 = vadd.f32 %v7018_v54, %v7017_v46  ;;  %v2722_v0 = vadd.f32 %v2721_v34, %v2561_v36  ;;  %v2773_v27 = vmax.f32 %v2719_v63, 0.0 }
 0x323   : > { %v2462_v63 = vadd.f32 %v8333_v16, %v8350_v8  ;;  %v2473_v36 = vadd.f32 %v8345_v48, %v8350_v8 }
 0x324   : > { %v2727_v39 = vadd.f32 %v7204_v59, %v2566_v43  ;;  %v2569_v50 = vadd.f32 %v7019_v58, %v8350_v8  ;;  %v2774_v40 = vmax.f32 %v2722_v0, 0.0  ;;  %v2465_v0 = vadd.f32 %v8338_v24, %v8350_v8  ;;  %v8424_v24 = vld [vmem:[%s9451_s6] ss:$0 sm:$0xff] }
 0x326   : > { %v2730_v49 = vadd.f32 %v7205_v25, %v2569_v50  ;;  %v8396_v31 = vpack.c.bf16 %v2774_v40, %v2773_v27  ;;  %v7020_v53 = vpop.f32.mrb[120].mxu0  ;;  %v2775_v60 = vmax.f32 %v2727_v39, 0.0 }
 0x327   : > { %v7021_v55 = vpop.f32.mrb[121].mxu0 }
 0x328   : > { %v2776_v19 = vmax.f32 %v2730_v49, 0.0  ;;  %v7022_v52 = vadd.f32 %v7021_v55, %v7020_v53  ;;  %v7023_v62 = vpop.f32.mrb[122].mxu0 }
 0x329   : > { %v7024_v56 = vpop.f32.mrb[123].mxu0 }
 0x32a   : > { %v7025_v6 = vadd.f32 %v7024_v56, %v7023_v62  ;;  %v2794_v1 = vpack.c.bf16 %v2776_v19, %v2775_v60  ;;  %v2574_v23 = vadd.f32 %v7022_v52, %v8350_v8 }
 0x32c   : > { %v2577_v3 = vadd.f32 %v7025_v6, %v8350_v8 }
 0x32d   : > { %v7208_v17 = vpop.f32.mrb[88].mxu1 }
 0x32e   : > { %v7026_v2 = vpop.f32.mrb[124].mxu0  ;;  %v2734_v38 = vpop.f32.mrb[89].mxu1 }
 0x32f   : > { %v7027_v42 = vpop.f32.mrb[125].mxu0  ;;  %v2735_v5 = vadd.f32 %v2734_v38, %v2574_v23  ;;  %v7209_v21 = vpop.f32.mrb[90].mxu1 }
 0x330   : > { %v7028_v57 = vadd.f32 %v7027_v42, %v7026_v2  ;;  %v7029_v37 = vpop.f32.mrb[126].mxu0  ;;  %v2737_v41 = vpop.f32.mrb[91].mxu1 }
 0x331   : > { %v7030_v9 = vpop.f32.mrb[127].mxu0  ;;  %v2738_v13 = vadd.f32 %v2737_v41, %v2577_v3  ;;  %v2777_v11 = vmax.f32 %v2735_v5, 0.0 }
 0x332   : > { %v2582_v28 = vadd.f32 %v7028_v57, %v8350_v8  ;;  %v7031_v14 = vadd.f32 %v7030_v9, %v7029_v37 }
 0x333   : > { %v2778_v45 = vmax.f32 %v2738_v13, 0.0 }
 0x334   : > { %v2743_v26 = vadd.f32 %v7208_v17, %v2582_v28  ;;  %v2585_v59 = vadd.f32 %v7031_v14, %v8350_v8 }
 0x335   : > { %v2795_v51 = vpack.c.bf16 %v2778_v45, %v2777_v11 }
 0x336   : > { %v2746_v44 = vadd.f32 %v7209_v21, %v2585_v59  ;;  %v7180_v32 = vpop.f32.mrb[128].mxu0  ;;  %v2779_v54 = vmax.f32 %v2743_v26, 0.0 }
 0x337   : > { %v2631_v46 = vadd.f32 %v7180_v32, %v2470_v22  ;;  %v2622_v25 = vpop.f32.mrb[129].mxu0 }
 0x338   : > { %v2780_v34 = vmax.f32 %v2746_v44, 0.0  ;;  %v2623_v43 = vadd.f32 %v2622_v25, %v2462_v63  ;;  %v7181_v58 = vpop.f32.mrb[130].mxu0 }
 0x339   : > { %v2634_v39 = vadd.f32 %v7181_v58, %v2473_v36  ;;  %v2625_v27 = vpop.f32.mrb[131].mxu0  ;;  %v2751_v40 = vmax.f32 %v2631_v46, 0.0 }
 0x33a   : > { %v2626_v12 = vadd.f32 %v2625_v27, %v2465_v0  ;;  %v2796_v50 = vpack.c.bf16 %v2780_v34, %v2779_v54  ;;  %v2749_v53 = vmax.f32 %v2623_v43, 0.0 }
 0x33b   : > { %v2752_v49 = vmax.f32 %v2634_v39, 0.0 }
 0x33c   : > { %v2750_v16 = vmax.f32 %v2626_v12, 0.0 }
 0x33d   : > { %v2782_v55 = vpack.c.bf16 %v2752_v49, %v2751_v40 }
 0x33e   : > { %v2781_v60 = vpack.c.bf16 %v2750_v16, %v2749_v53 }
 0x340   : > { %7226 = vmatprep.mubr.bf16.mxu1 %v2781_v60 }
 0x341   : > { %7227 = vmatmul.mubr.bf16.vlgmr.msra.gmra.mrb[92].mxu1 %v2782_v55 }
 0x342   : > { %7230 = vmatprep.mubr.bf16.mxu1 %v8356_v47 }
 0x349   : > { %7231 = vmatmul.mubr.bf16.gmra.mrb[96].mxu1 %v8358_v61 }
 0x34a   : > { %7234 = vmatprep.mubr.bf16.mxu1 %v8364_v29 }
 0x351   : > { %7235 = vmatmul.mubr.bf16.gmra.mrb[100].mxu1 %v8366_v30  ;;  %v8431_v30 = vld [vmem:[%s9452_s7] ss:$0 sm:$0xff] }
 0x352   : > { %7238 = vmatprep.mubr.bf16.mxu1 %v8372_v33 }
 0x359   : > { %7239 = vmatmul.mubr.bf16.gmra.mrb[104].mxu1 %v8374_v35 }
 0x35a   : > { %7242 = vmatprep.mubr.bf16.mxu1 %v8380_v18 }
 0x361   : > { %7243 = vmatmul.mubr.bf16.gmra.mrb[108].mxu1 %v8382_v4 }
 0x362   : > { %7246 = vmatprep.mubr.bf16.mxu1 %v8388_v7 }
 0x369   : > { %7247 = vmatmul.mubr.bf16.gmra.mrb[112].mxu1 %v8390_v20 }
 0x36a   : > { %7250 = vmatprep.mubr.bf16.mxu1 %v8396_v31 }
 0x371   : > { %7251 = vmatmul.mubr.bf16.gmra.mrb[116].mxu1 %v2794_v1 }
 0x372   : > { %7254 = vmatprep.mubr.bf16.mxu1 %v2795_v51 }
 0x379   : > { %7255 = vmatmul.mubr.bf16.gmra.mrb[120].mxu1 %v2796_v50 }
 0x414   : > { %v7228_v48 = vpop.f32.mrb[92].mxu1 }
 0x415   : > { %v2911_v8 = vadd.f32 %v7228_v48, %v8424_v24  ;;  %v2902_v47 = vpop.f32.mrb[93].mxu1 }
 0x416   : > { %v2903_v61 = vadd.f32 %v8424_v24, %v2902_v47  ;;  %v7229_v29 = vpop.f32.mrb[94].mxu1 }
 0x417   : > { %v3031_v33 = vmax.f32 %v2911_v8, 0.0  ;;  %v2914_v35 = vadd.f32 %v7229_v29, %v8424_v24  ;;  %v2905_v18 = vpop.f32.mrb[95].mxu1 }
 0x418   : > { %v3029_v4 = vmax.f32 %v2903_v61, 0.0  ;;  %v2906_v7 = vadd.f32 %v8424_v24, %v2905_v18 }
 0x419   : > { %v3032_v20 = vmax.f32 %v2914_v35, 0.0  ;;  %v3070_v31 = vmul.f32 %v8431_v30, %v3031_v33 }
 0x41a   : > { %v3030_v19 = vmax.f32 %v2906_v7, 0.0  ;;  %v3068_v52 = vmul.f32 %v8431_v30, %v3029_v4 }
 0x41b   : > { %3104 = vadd.xlane.f32.xlu1 %v3070_v31  ;;  %v3071_v1 = vmul.f32 %v8431_v30, %v3032_v20 }
 0x41c   : > { %v7232_v62 = vpop.f32.mrb[96].mxu1  ;;  %3100 = vadd.xlane.f32.xlu0 %v3068_v52  ;;  %v3069_v2 = vmul.f32 %v8431_v30, %v3030_v19 }
 0x41d   : > { %v2927_v56 = vadd.f32 %v7232_v62, %v8424_v24  ;;  %v2918_v6 = vpop.f32.mrb[97].mxu1 }
 0x41e   : > { %v2919_v17 = vadd.f32 %v8424_v24, %v2918_v6  ;;  %v7233_v23 = vpop.f32.mrb[98].mxu1 }
 0x41f   : > { %v3035_v38 = vmax.f32 %v2927_v56, 0.0  ;;  %v2930_v42 = vadd.f32 %v7233_v23, %v8424_v24  ;;  %3106 = vadd.xlane.f32.xlu1 %v3071_v1  ;;  %v2921_v5 = vpop.f32.mrb[99].mxu1 }
 0x420   : > { %v2922_v21 = vadd.f32 %v8424_v24, %v2921_v5  ;;  %3102 = vadd.xlane.f32.xlu0 %v3069_v2  ;;  %v3033_v37 = vmax.f32 %v2919_v17, 0.0 }
 0x421   : > { %v3036_v3 = vmax.f32 %v2930_v42, 0.0  ;;  %v3074_v57 = vmul.f32 %v8431_v30, %v3035_v38 }
 0x422   : > { %v3034_v41 = vmax.f32 %v2922_v21, 0.0  ;;  %v3072_v26 = vmul.f32 %v8431_v30, %v3033_v37 }
 0x423   : > { %v3075_v9 = vmul.f32 %v8431_v30, %v3036_v3 }
 0x424   : > { %v7236_v13 = vpop.f32.mrb[100].mxu1  ;;  %3112 = vadd.xlane.f32.xlu0 %v3074_v57  ;;  %v3073_v44 = vmul.f32 %v8431_v30, %v3034_v41 }
 0x425   : > { %v2943_v28 = vadd.f32 %v7236_v13, %v8424_v24  ;;  %3114 = vadd.xlane.f32.xlu1 %v3075_v9  ;;  %v2934_v14 = vpop.f32.mrb[101].mxu1 }
 0x426   : > { %v2935_v11 = vadd.f32 %v8424_v24, %v2934_v14  ;;  %v7237_v45 = vpop.f32.mrb[102].mxu1 }
 0x427   : > { %v3039_v59 = vmax.f32 %v2943_v28, 0.0  ;;  %v2946_v51 = vadd.f32 %v7237_v45, %v8424_v24  ;;  %v2937_v22 = vpop.f32.mrb[103].mxu1 }
 0x428   : > { %v2938_v32 = vadd.f32 %v8424_v24, %v2937_v22  ;;  %3108 = vadd.xlane.f32.xlu0 %v3072_v26  ;;  %v3037_v25 = vmax.f32 %v2935_v11, 0.0 }
 0x429   : > { %v3040_v63 = vmax.f32 %v2946_v51, 0.0  ;;  %3110 = vadd.xlane.f32.xlu1 %v3073_v44  ;;  %v3078_v46 = vmul.f32 %v8431_v30, %v3039_v59 }
 0x42a   : > { %v3038_v36 = vmax.f32 %v2938_v32, 0.0  ;;  %v3076_v27 = vmul.f32 %v8431_v30, %v3037_v25 }
 0x42b   : > { %v3079_v54 = vmul.f32 %v8431_v30, %v3040_v63 }
 0x42c   : > { %v7240_v34 = vpop.f32.mrb[104].mxu1  ;;  %3120 = vadd.xlane.f32.xlu0 %v3078_v46  ;;  %v3077_v40 = vmul.f32 %v8431_v30, %v3038_v36 }
 0x42d   : > { %v2959_v43 = vadd.f32 %v7240_v34, %v8424_v24  ;;  %v2950_v58 = vpop.f32.mrb[105].mxu1  ;;  %3122 = vadd.xlane.f32.xlu1 %v3079_v54 }
 0x42e   : > { %v2951_v0 = vadd.f32 %v8424_v24, %v2950_v58  ;;  %v7241_v39 = vpop.f32.mrb[106].mxu1 }
 0x42f   : > { %v3043_v12 = vmax.f32 %v2959_v43, 0.0  ;;  %v2953_v50 = vpop.f32.mrb[107].mxu1  ;;  %v2962_v55 = vadd.f32 %v7241_v39, %v8424_v24 }
 0x430   : > { %v2954_v49 = vadd.f32 %v8424_v24, %v2953_v50  ;;  %3116 = vadd.xlane.f32.xlu0 %v3076_v27  ;;  %v3041_v16 = vmax.f32 %v2951_v0, 0.0 }
 0x431   : > { %3118 = vadd.xlane.f32.xlu1 %v3077_v40  ;;  %v3082_v53 = vmul.f32 %v8431_v30, %v3043_v12  ;;  %v3044_v61 = vmax.f32 %v2962_v55, 0.0 }
 0x432   : > { %v3042_v60 = vmax.f32 %v2954_v49, 0.0  ;;  %v3080_v35 = vmul.f32 %v8431_v30, %v3041_v16 }
 0x433   : > { %v3083_v52 = vmul.f32 %v8431_v30, %v3044_v61 }
 0x434   : > { %v7244_v48 = vpop.f32.mrb[108].mxu1  ;;  %3128 = vadd.xlane.f32.xlu0 %v3082_v53  ;;  %v3081_v8 = vmul.f32 %v8431_v30, %v3042_v60 }
 0x435   : > { %v2966_v47 = vpop.f32.mrb[109].mxu1  ;;  %v2975_v29 = vadd.f32 %v7244_v48, %v8424_v24 }
 0x436   : > { %v7245_v33 = vpop.f32.mrb[110].mxu1  ;;  %3126 = vadd.xlane.f32.xlu1 %v3081_v8  ;;  %v2967_v19 = vadd.f32 %v8424_v24, %v2966_v47 }
 0x437   : > { %v2978_v18 = vadd.f32 %v7245_v33, %v8424_v24  ;;  %v2969_v4 = vpop.f32.mrb[111].mxu1  ;;  %v3047_v31 = vmax.f32 %v2975_v29, 0.0 }
 0x438   : > { %v2970_v7 = vadd.f32 %v8424_v24, %v2969_v4  ;;  %3124 = vadd.xlane.f32.xlu0 %v3080_v35  ;;  %v3045_v17 = vmax.f32 %v2967_v19, 0.0  ;;  %v3168_v4 = vpop.permute.xlu1 %3167 }
 0x439   : > { %v3048_v20 = vmax.f32 %v2978_v18, 0.0  ;;  %v3086_v38 = vmul.f32 %v8431_v30, %v3047_v31 }
 0x43a   : > { %v3046_v62 = vmax.f32 %v2970_v7, 0.0  ;;  %v3084_v41 = vmul.f32 %v8431_v30, %v3045_v17 }
 0x43b   : > { %v3087_v56 = vmul.f32 %v8431_v30, %v3048_v20 }
 0x43c   : > { %v7248_v6 = vpop.f32.mrb[112].mxu1  ;;  %3130 = vadd.xlane.f32.xlu0 %v3083_v52  ;;  %v3085_v5 = vmul.f32 %v8431_v30, %v3046_v62 }
 0x43d   : > { %v2982_v1 = vpop.f32.mrb[113].mxu1  ;;  %3138 = vadd.xlane.f32.xlu1 %v3087_v56  ;;  %v2991_v23 = vadd.f32 %v7248_v6, %v8424_v24  ;;  %v7503_v56 = vmov 1966171168  }
 0x43e   : > { %v7249_v2 = vpop.f32.mrb[114].mxu1  ;;  %v2983_v57 = vadd.f32 %v8424_v24, %v2982_v1  ;;  %v4299_v6 = vunpack.c.l.s4 %v7503_v56 }
 0x43f   : > { %v2985_v42 = vpop.f32.mrb[115].mxu1  ;;  %v3051_v3 = vmax.f32 %v2991_v23, 0.0  ;;  %v2994_v11 = vadd.f32 %v7249_v2, %v8424_v24  ;;  %v8506_v2 = vsub.s32 1, %v7742_v15 }
 0x440   : > { %v2986_v21 = vadd.f32 %v8424_v24, %v2985_v42  ;;  %3136 = vadd.xlane.f32.xlu0 %v3086_v38  ;;  %v3049_v14 = vmax.f32 %v2983_v57, 0.0  ;;  %v4300_v38 = vunpack.c.0.s8 %v4299_v6 }
 0x441   : > { %3134 = vadd.xlane.f32.xlu1 %v3085_v5  ;;  %v3090_v26 = vmul.f32 %v8431_v30, %v3051_v3  ;;  %v3052_v32 = vmax.f32 %v2994_v11, 0.0  ;;  %v8513_v3 = vsub.s32 3, %v7742_v15 }
 0x442   : > { %v3050_v37 = vmax.f32 %v2986_v21, 0.0  ;;  %v3088_v25 = vmul.f32 %v8431_v30, %v3049_v14  ;;  %v8510_v21 = vsub.s32 2, %v7742_v15  ;;  %v8529_v11 = vsub.s32 %v4300_v38, %v7742_v15 }
 0x443   : > { %v3091_v50 = vmul.f32 %v8431_v30, %v3052_v32 }
 0x444   : > { %v7252_v9 = vpop.f32.mrb[116].mxu1  ;;  %3132 = vadd.xlane.f32.xlu0 %v3084_v41  ;;  %v3089_v13 = vmul.f32 %v8431_v30, %v3050_v37  ;;  %v8517_v37 = vsub.s32 4, %v7742_v15  ;;  %v8520_v41 = vsub.s32 5, %v7742_v15 }
 0x445   : > { %v2998_v28 = vpop.f32.mrb[117].mxu1  ;;  %v3007_v63 = vadd.f32 %v7252_v9, %v8424_v24  ;;  %v8523_v9 = vsub.s32 6, %v7742_v15 }
 0x446   : > { %v7253_v45 = vpop.f32.mrb[118].mxu1  ;;  %3142 = vadd.xlane.f32.xlu1 %v3089_v13  ;;  %v2999_v39 = vadd.f32 %v8424_v24, %v2998_v28  ;;  %v8526_v13 = vsub.s32 7, %v7742_v15 }
 0x447   : > { %v3010_v59 = vadd.f32 %v7253_v45, %v8424_v24  ;;  %v3001_v51 = vpop.f32.mrb[119].mxu1  ;;  %v3055_v0 = vmax.f32 %v3007_v63, 0.0 }
 0x448   : > { %v3002_v22 = vadd.f32 %v8424_v24, %v3001_v51  ;;  %3144 = vadd.xlane.f32.xlu0 %v3090_v26  ;;  %v3053_v8 = vmax.f32 %v2999_v39, 0.0 }
 0x449   : > { %v3056_v44 = vmax.f32 %v3010_v59, 0.0  ;;  %v3094_v61 = vmul.f32 %v8431_v30, %v3055_v0 }
 0x44a   : > { %v3054_v46 = vmax.f32 %v3002_v22, 0.0  ;;  %v3092_v18 = vmul.f32 %v8431_v30, %v3053_v8 }
 0x44b   : > { %v3095_v36 = vmul.f32 %v8431_v30, %v3056_v44 }
 0x44c   : > { %v7256_v54 = vpop.f32.mrb[120].mxu1  ;;  %3140 = vadd.xlane.f32.xlu0 %v3088_v25  ;;  %v3093_v34 = vmul.f32 %v8431_v30, %v3054_v46 }
 0x44d   : > { %v3023_v43 = vadd.f32 %v7256_v54, %v8424_v24  ;;  %v3014_v58 = vpop.f32.mrb[121].mxu1  ;;  %3154 = vadd.xlane.f32.xlu1 %v3095_v36 }
 0x44e   : > { %v3015_v27 = vadd.f32 %v8424_v24, %v3014_v58  ;;  %v7257_v12 = vpop.f32.mrb[122].mxu1 }
 0x44f   : > { %v3059_v40 = vmax.f32 %v3023_v43, 0.0  ;;  %v3026_v49 = vadd.f32 %v7257_v12, %v8424_v24  ;;  %v3017_v53 = vpop.f32.mrb[123].mxu1 }
 0x450   : > { %v3057_v16 = vmax.f32 %v3015_v27, 0.0  ;;  %v3018_v55 = vadd.f32 %v8424_v24, %v3017_v53  ;;  %3146 = vadd.xlane.f32.xlu0 %v3091_v50  ;;  %v8496_v24 = vsub.s32 0, %v7742_v15 }
 0x451   : > { %v3060_v60 = vmax.f32 %v3026_v49, 0.0  ;;  %v3098_v48 = vmul.f32 %v8431_v30, %v3059_v40 }
 0x452   : > { %v3058_v47 = vmax.f32 %v3018_v55, 0.0  ;;  %v3096_v29 = vmul.f32 %v8431_v30, %v3057_v16  ;;  %v8499_v7 = vrot.slane %v3168_v4, %v8496_v24 }
 0x453   : > { %v3099_v33 = vmul.f32 %v8431_v30, %v3060_v60 }
 0x454   : > { %3152 = vadd.xlane.f32.xlu0 %v3094_v61  ;;  %v3097_v35 = vmul.f32 %v8431_v30, %v3058_v47 }
 0x458   : > { %3148 = vadd.xlane.f32.xlu0 %v3092_v18 }
 0x45c   : > { %3150 = vadd.xlane.f32.xlu0 %v3093_v34 }
 0x460   : > { %3160 = vadd.xlane.f32.xlu0 %v3098_v48 }
 0x464   : > { %3156 = vadd.xlane.f32.xlu0 %v3096_v29 }
 0x468   : > { %3158 = vadd.xlane.f32.xlu0 %v3097_v35 }
 0x46c   : > { %3162 = vadd.xlane.f32.xlu0 %v3099_v33 }
 0x4a8   : > { %v3105_v20 = vpop.xlane.xlu1 %3104 }
 0x4a9   : > { %v3176_v31 = vadd.f32 %v8499_v7, %v3105_v20  ;;  %v3101_v19 = vpop.xlane.xlu0 %3100 }
 0x4aa   : > { %v3174_v52 = vadd.f32 %v8499_v7, %v3101_v19 }
 0x4ab   : > { %7374 = vtanh.f32 %v3176_v31 }
 0x4ac   : > { %7376 = vtanh.f32 %v3174_v52  ;;  %v3107_v30 = vpop.xlane.xlu1 %3106 }
 0x4ad   : > { %v3103_v62 = vpop.xlane.xlu0 %3102  ;;  %v3177_v1 = vadd.f32 %v8499_v7, %v3107_v30 }
 0x4ae   : > { %v3175_v17 = vadd.f32 %v8499_v7, %v3103_v62 }
 0x4af   : > { %7378 = vtanh.f32 %v3177_v1 }
 0x4b0   : > { %7380 = vtanh.f32 %v3175_v17 }
 0x4b1   : > { %v3113_v23 = vpop.xlane.xlu0 %3112 }
 0x4b2   : > { %v3180_v42 = vadd.f32 %v8499_v7, %v3113_v23  ;;  %v3115_v5 = vpop.xlane.xlu1 %3114 }
 0x4b3   : > { %v3181_v57 = vadd.f32 %v8499_v7, %v3115_v5 }
 0x4b4   : > { %7382 = vtanh.f32 %v3180_v42 }
 0x4b5   : > { %v7375_v28 = vpop.eup %7374  ;;  %7384 = vtanh.f32 %v3181_v57  ;;  %v3109_v14 = vpop.xlane.xlu0 %3108 }
 0x4b6   : > { %v7377_v45 = vpop.eup %7376  ;;  %v3178_v26 = vadd.f32 %v8499_v7, %v3109_v14  ;;  %v3111_v59 = vpop.xlane.xlu1 %3110  ;;  %v3337_v51 = vrot.slane %v7375_v28, %v8496_v24  ;;  %v3341_v22 = vrot.slane %v7375_v28, %v8506_v2  ;;  %v3345_v44 = vrot.slane %v7375_v28, %v8510_v21 }
 0x4b7   : > { %v3179_v32 = vadd.f32 %v8499_v7, %v3111_v59  ;;  %v3349_v63 = vrot.slane %v7375_v28, %v8513_v3  ;;  %v3353_v46 = vrot.slane %v7375_v28, %v8517_v37  ;;  %v3357_v25 = vrot.slane %v7375_v28, %v8520_v41 }
 0x4b8   : > { %7386 = vtanh.f32 %v3178_v26  ;;  %v3361_v36 = vrot.slane %v7375_v28, %v8523_v9  ;;  %v3365_v54 = vrot.slane %v7375_v28, %v8526_v13  ;;  %v4392_v34 = vcombine.low %v3337_v51, %v3341_v22 }
 0x4b9   : > { %7388 = vtanh.f32 %v3179_v32  ;;  %v3121_v43 = vpop.xlane.xlu0 %3120  ;;  %v4393_v58 = vcombine.low %v3345_v44, %v3349_v63  ;;  %v4394_v0 = vcombine.low %v3353_v46, %v3357_v25  ;;  %v3273_v39 = vrot.slane %v7377_v45, %v8496_v24  ;;  %v7379_v48 = vpop.eup %7378 }
 0x4ba   : > { %v3184_v27 = vadd.f32 %v8499_v7, %v3121_v43  ;;  %v3123_v12 = vpop.xlane.xlu1 %3122  ;;  %v4395_v50 = vcombine.low %v3361_v36, %v3365_v54  ;;  %v4402_v40 = vrot.slane %v4392_v34, %v8529_v11  ;;  %v3277_v49 = vrot.slane %v7377_v45, %v8506_v2  ;;  %v8552_v29 = vpop.eup %7380 }
 0x4bb   : > { %v3185_v53 = vadd.f32 %v8499_v7, %v3123_v12  ;;  %v4409_v16 = vrot.slane %v4393_v58, %v8529_v11  ;;  %v4416_v55 = vrot.slane %v4394_v0, %v8529_v11  ;;  %v3281_v60 = vrot.slane %v7377_v45, %v8510_v21 }
 0x4bc   : > { %7390 = vtanh.f32 %v3184_v27  ;;  %v4423_v8 = vrot.slane %v4395_v50, %v8529_v11  ;;  %v3285_v47 = vrot.slane %v7377_v45, %v8513_v3  ;;  %v3289_v61 = vrot.slane %v7377_v45, %v8517_v37 }
 0x4bd   : > { %7392 = vtanh.f32 %v3185_v53  ;;  %v3117_v33 = vpop.xlane.xlu0 %3116  ;;  %v4424_v35 = vcombine.low %v4402_v40, %v4409_v16  ;;  %v3293_v18 = vrot.slane %v7377_v45, %v8520_v41  ;;  %v3297_v4 = vrot.slane %v7377_v45, %v8523_v9 }
 0x4be   : > { %v8556_v20 = vpop.eup %7382  ;;  %v3182_v31 = vadd.f32 %v8499_v7, %v3117_v33  ;;  %v3119_v19 = vpop.xlane.xlu1 %3118  ;;  %v4425_v52 = vcombine.low %v4416_v55, %v4423_v8  ;;  %v3301_v30 = vrot.slane %v7377_v45, %v8526_v13  ;;  %v4294_v62 = vcombine.low %v3273_v39, %v3277_v49 }
 0x4bf   : > { %v8560_v56 = vpop.eup %7384  ;;  %v3183_v6 = vadd.f32 %v8499_v7, %v3119_v19  ;;  %v4432_v1 = vrot.slane %v4424_v35, %v8529_v11  ;;  %v4295_v17 = vcombine.low %v3281_v60, %v3285_v47  ;;  %v4296_v23 = vcombine.low %v3289_v61, %v3293_v18 }
 0x4c0   : > { %7394 = vtanh.f32 %v3182_v31  ;;  %v4439_v38 = vrot.slane %v4425_v52, %v8529_v11  ;;  %v4297_v42 = vcombine.low %v3297_v4, %v3301_v30  ;;  %v4304_v5 = vrot.slane %v4294_v62, %v8529_v11 }
 0x4c1   : > { %7396 = vtanh.f32 %v3183_v6  ;;  %v3129_v57 = vpop.xlane.xlu0 %3128  ;;  %v4311_v28 = vrot.slane %v4295_v17, %v8529_v11  ;;  %v4318_v14 = vrot.slane %v4296_v23, %v8529_v11  ;;  %v3369_v45 = vrot.slane %v7379_v48, %v8496_v24 }
 0x4c2   : > { %v8569_v26 = vpop.eup %7386  ;;  %v3188_v59 = vadd.f32 %v8499_v7, %v3129_v57  ;;  %v4440_v51 = vcombine.low %v4432_v1, %v4439_v38  ;;  %v4325_v22 = vrot.slane %v4297_v42, %v8529_v11  ;;  %v3373_v44 = vrot.slane %v7379_v48, %v8506_v2 }
 0x4c3   : > { %v8574_v32 = vpop.eup %7388  ;;  %v3127_v63 = vpop.xlane.xlu1 %3126  ;;  %v4326_v46 = vcombine.low %v4304_v5, %v4311_v28  ;;  %v3377_v25 = vrot.slane %v7379_v48, %v8510_v21  ;;  %v3381_v36 = vrot.slane %v7379_v48, %v8513_v3  ;;  %v3385_v54 = vrot.slane %v7379_v48, %v8517_v37 }
 0x4c4   : > { %7398 = vtanh.f32 %v3188_v59  ;;  %5869 = vperm.xlu1 %7315, %v4440_v51   ;;  %v3187_v34 = vadd.f32 %v8499_v7, %v3127_v63  ;;  %v4327_v43 = vcombine.low %v4318_v14, %v4325_v22  ;;  %v3389_v58 = vrot.slane %v7379_v48, %v8520_v41 }
 0x4c5   : > { %v4334_v0 = vrot.slane %v4326_v46, %v8529_v11  ;;  %v3125_v39 = vpop.xlane.xlu0 %3124  ;;  %v3393_v27 = vrot.slane %v7379_v48, %v8523_v9  ;;  %v3397_v12 = vrot.slane %v7379_v48, %v8526_v13  ;;  %v4441_v50 = vcombine.low %v3369_v45, %v3373_v44 }
 0x4c6   : > { %v8584_v40 = vpop.eup %7390  ;;  %7400 = vtanh.f32 %v3187_v34  ;;  %v4341_v49 = vrot.slane %v4327_v43, %v8529_v11  ;;  %v3186_v53 = vadd.f32 %v8499_v7, %v3125_v39  ;;  %v4442_v16 = vcombine.low %v3377_v25, %v3381_v36 }
 0x4c7   : > { %v8588_v55 = vpop.eup %7392  ;;  %v4443_v60 = vcombine.low %v3385_v54, %v3389_v58  ;;  %v4444_v8 = vcombine.low %v3393_v27, %v3397_v12  ;;  %v4451_v47 = vrot.slane %v4441_v50, %v8529_v11  ;;  %v3305_v61 = vrot.slane %v8552_v29, %v8496_v24 }
 0x4c8   : > { %v4342_v33 = vcombine.low %v4334_v0, %v4341_v49  ;;  %7402 = vtanh.f32 %v3186_v53  ;;  %v4458_v48 = vrot.slane %v4442_v16, %v8529_v11  ;;  %v3309_v35 = vrot.slane %v8552_v29, %v8506_v2 }
 0x4c9   : > { %v4465_v18 = vrot.slane %v4443_v60, %v8529_v11  ;;  %v4472_v4 = vrot.slane %v4444_v8, %v8529_v11  ;;  %v3131_v31 = vpop.xlane.xlu0 %3130  ;;  %v3313_v19 = vrot.slane %v8552_v29, %v8510_v21  ;;  %v3317_v52 = vrot.slane %v8552_v29, %v8513_v3 }
 0x4ca   : > { %v8602_v30 = vpop.eup %7394  ;;  %5863 = vperm.xlu0 %7316, %v4342_v33   ;;  %v4473_v62 = vcombine.low %v4451_v47, %v4458_v48  ;;  %v3189_v6 = vadd.f32 %v8499_v7, %v3131_v31  ;;  %v3139_v1 = vpop.xlane.xlu1 %3138  ;;  %v3321_v17 = vrot.slane %v8552_v29, %v8517_v37  ;;  %v3325_v23 = vrot.slane %v8552_v29, %v8520_v41 }
 0x4cb   : > { %v8609_v38 = vpop.eup %7396  ;;  %v4474_v42 = vcombine.low %v4465_v18, %v4472_v4  ;;  %v3193_v5 = vadd.f32 %v8499_v7, %v3139_v1  ;;  %v3329_v57 = vrot.slane %v8552_v29, %v8523_v9  ;;  %v3333_v28 = vrot.slane %v8552_v29, %v8526_v13 }
 0x4cc   : > { %v4481_v14 = vrot.slane %v4473_v62, %v8529_v11  ;;  %7404 = vtanh.f32 %v3189_v6  ;;  %v4343_v45 = vcombine.low %v3305_v61, %v3309_v35  ;;  %v4344_v59 = vcombine.low %v3313_v19, %v3317_v52 }
 0x4cd   : > { %v4488_v51 = vrot.slane %v4474_v42, %v8529_v11  ;;  %7406 = vtanh.f32 %v3193_v5  ;;  %v4345_v22 = vcombine.low %v3321_v17, %v3325_v23  ;;  %v4346_v44 = vcombine.low %v3329_v57, %v3333_v28  ;;  %v3137_v63 = vpop.xlane.xlu0 %3136 }
 0x4ce   : > { %v8618_v46 = vpop.eup %7398  ;;  %v4353_v25 = vrot.slane %v4343_v45, %v8529_v11  ;;  %v4360_v36 = vrot.slane %v4344_v59, %v8529_v11  ;;  %v3192_v54 = vadd.f32 %v8499_v7, %v3137_v63  ;;  %v3135_v29 = vpop.xlane.xlu1 %3134  ;;  %v3465_v34 = vrot.slane %v8556_v20, %v8496_v24 }
 0x4cf   : > { %v4489_v43 = vcombine.low %v4481_v14, %v4488_v51  ;;  %v4367_v58 = vrot.slane %v4345_v22, %v8529_v11  ;;  %v4374_v0 = vrot.slane %v4346_v44, %v8529_v11  ;;  %v3191_v39 = vadd.f32 %v8499_v7, %v3135_v29 }
 0x4d0   : > { %v8628_v27 = vpop.eup %7400  ;;  %v4375_v12 = vcombine.low %v4353_v25, %v4360_v36  ;;  %7408 = vtanh.f32 %v3192_v54  ;;  %v3469_v50 = vrot.slane %v8556_v20, %v8506_v2  ;;  %v3473_v49 = vrot.slane %v8556_v20, %v8510_v21 }
 0x4d1   : > { %5872 = vperm.xlu1 %7315, %v4489_v43   ;;  %v4376_v53 = vcombine.low %v4367_v58, %v4374_v0  ;;  %7410 = vtanh.f32 %v3191_v39  ;;  %v3477_v16 = vrot.slane %v8556_v20, %v8513_v3  ;;  %v3481_v60 = vrot.slane %v8556_v20, %v8517_v37  ;;  %v3133_v8 = vpop.xlane.xlu0 %3132 }
 0x4d2   : > { %v8638_v47 = vpop.eup %7402  ;;  %v4383_v61 = vrot.slane %v4375_v12, %v8529_v11  ;;  %v3485_v33 = vrot.slane %v8556_v20, %v8520_v41  ;;  %v3489_v48 = vrot.slane %v8556_v20, %v8523_v9  ;;  %v3493_v35 = vrot.slane %v8556_v20, %v8526_v13 }
 0x4d3   : > { %v4390_v18 = vrot.slane %v4376_v53, %v8529_v11  ;;  %v4588_v4 = vcombine.low %v3465_v34, %v3469_v50  ;;  %v4589_v31 = vcombine.low %v3473_v49, %v3477_v16  ;;  %v3190_v19 = vadd.f32 %v8499_v7, %v3133_v8  ;;  %v3143_v45 = vpop.xlane.xlu1 %3142 }
 0x4d4   : > { %v4590_v52 = vcombine.low %v3481_v60, %v3485_v33  ;;  %v4591_v62 = vcombine.low %v3489_v48, %v3493_v35  ;;  %v3401_v6 = vrot.slane %v8569_v26, %v8496_v24  ;;  %v3405_v1 = vrot.slane %v8569_v26, %v8506_v2 }
 0x4d5   : > { %v4391_v17 = vcombine.low %v4383_v61, %v4390_v18  ;;  %v4598_v23 = vrot.slane %v4588_v4, %v8529_v11  ;;  %v4605_v42 = vrot.slane %v4589_v31, %v8529_v11  ;;  %7412 = vtanh.f32 %v3190_v19  ;;  %v3145_v59 = vpop.xlane.xlu0 %3144 }
 0x4d6   : > { %v8655_v20 = vpop.eup %7404  ;;  %v4612_v5 = vrot.slane %v4590_v52, %v8529_v11  ;;  %v4619_v57 = vrot.slane %v4591_v62, %v8529_v11  ;;  %v3409_v28 = vrot.slane %v8569_v26, %v8510_v21  ;;  %v3413_v14 = vrot.slane %v8569_v26, %v8513_v3 }
 0x4d7   : > { %v8663_v51 = vpop.eup %7406  ;;  %5866 = vperm.xlu1 %7315, %v4391_v17   ;;  %v4620_v22 = vcombine.low %v4598_v23, %v4605_v42  ;;  %v3417_v44 = vrot.slane %v8569_v26, %v8517_v37  ;;  %v3421_v63 = vrot.slane %v8569_v26, %v8520_v41  ;;  %v3425_v25 = vrot.slane %v8569_v26, %v8523_v9 }
 0x4d8   : > { %v4621_v36 = vcombine.low %v4612_v5, %v4619_v57  ;;  %v3429_v54 = vrot.slane %v8569_v26, %v8526_v13  ;;  %v4490_v29 = vcombine.low %v3401_v6, %v3405_v1  ;;  %v4491_v34 = vcombine.low %v3409_v28, %v3413_v14 }
 0x4d9   : > { %v4628_v43 = vrot.slane %v4620_v22, %v8529_v11  ;;  %v4492_v58 = vcombine.low %v3417_v44, %v3421_v63  ;;  %v3195_v0 = vadd.f32 %v8499_v7, %v3143_v45  ;;  %v3196_v39 = vadd.f32 %v8499_v7, %v3145_v59  ;;  %v3141_v18 = vpop.xlane.xlu0 %3140 }
 0x4da   : > { %v8676_v12 = vpop.eup %7408  ;;  %v4635_v50 = vrot.slane %v4621_v36, %v8529_v11  ;;  %v4493_v49 = vcombine.low %v3425_v25, %v3429_v54  ;;  %v4500_v53 = vrot.slane %v4490_v29, %v8529_v11  ;;  %v4507_v16 = vrot.slane %v4491_v34, %v8529_v11  ;;  %v3155_v62 = vpop.xlane.xlu1 %3154 }
 0x4db   : > { %v8681_v60 = vpop.eup %7410  ;;  %v4514_v26 = vrot.slane %v4492_v58, %v8529_v11  ;;  %7414 = vtanh.f32 %v3195_v0  ;;  %v3497_v8 = vrot.slane %v8560_v56, %v8496_v24  ;;  %v3501_v61 = vrot.slane %v8560_v56, %v8506_v2 }
 0x4dc   : > { %v4636_v33 = vcombine.low %v4628_v43, %v4635_v50  ;;  %v4521_v48 = vrot.slane %v4493_v49, %v8529_v11  ;;  %v4522_v35 = vcombine.low %v4500_v53, %v4507_v16  ;;  %7416 = vtanh.f32 %v3196_v39 }
 0x4dd   : > { %v3505_v4 = vrot.slane %v8560_v56, %v8510_v21  ;;  %v3509_v31 = vrot.slane %v8560_v56, %v8513_v3  ;;  %v3513_v19 = vrot.slane %v8560_v56, %v8517_v37  ;;  %v3517_v52 = vrot.slane %v8560_v56, %v8520_v41  ;;  %v3147_v34 = vpop.xlane.xlu0 %3146 }
 0x4de   : > { %5881 = vperm.xlu1 %7315, %v4636_v33   ;;  %v4523_v6 = vcombine.low %v4514_v26, %v4521_v48  ;;  %v4530_v1 = vrot.slane %v4522_v35, %v8529_v11  ;;  %v3521_v17 = vrot.slane %v8560_v56, %v8523_v9  ;;  %v3525_v23 = vrot.slane %v8560_v56, %v8526_v13 }
 0x4df   : > { %v8702_v42 = vpop.eup %7412  ;;  %v4637_v5 = vcombine.low %v3497_v8, %v3501_v61  ;;  %v4638_v57 = vcombine.low %v3505_v4, %v3509_v31  ;;  %v4639_v28 = vcombine.low %v3513_v19, %v3517_v52  ;;  %v3194_v14 = vadd.f32 %v8499_v7, %v3141_v18 }
 0x4e0   : > { %v4537_v45 = vrot.slane %v4523_v6, %v8529_v11  ;;  %v4640_v59 = vcombine.low %v3521_v17, %v3525_v23  ;;  %v3201_v22 = vadd.f32 %v8499_v7, %v3155_v62  ;;  %v3433_v44 = vrot.slane %v8574_v32, %v8496_v24 }
 0x4e1   : > { %v4647_v63 = vrot.slane %v4637_v5, %v8529_v11  ;;  %v4654_v25 = vrot.slane %v4638_v57, %v8529_v11  ;;  %v4661_v56 = vrot.slane %v4639_v28, %v8529_v11  ;;  %7418 = vtanh.f32 %v3194_v14  ;;  %v3153_v5 = vpop.xlane.xlu0 %3152 }
 0x4e2   : > { %v4538_v36 = vcombine.low %v4530_v1, %v4537_v45  ;;  %v4668_v54 = vrot.slane %v4640_v59, %v8529_v11  ;;  %7420 = vtanh.f32 %v3201_v22  ;;  %v3437_v29 = vrot.slane %v8574_v32, %v8506_v2 }
 0x4e3   : > { %v4669_v43 = vcombine.low %v4647_v63, %v4654_v25  ;;  %v3441_v58 = vrot.slane %v8574_v32, %v8510_v21  ;;  %v3445_v0 = vrot.slane %v8574_v32, %v8513_v3  ;;  %v3449_v39 = vrot.slane %v8574_v32, %v8517_v37 }
 0x4e4   : > { %5875 = vperm.xlu1 %7315, %v4538_v36   ;;  %v4670_v50 = vcombine.low %v4661_v56, %v4668_v54  ;;  %v3453_v49 = vrot.slane %v8574_v32, %v8520_v41  ;;  %v3457_v53 = vrot.slane %v8574_v32, %v8523_v9  ;;  %v3461_v16 = vrot.slane %v8574_v32, %v8526_v13 }
 0x4e5   : > { %v8727_v26 = vpop.eup %7414  ;;  %v4677_v8 = vrot.slane %v4669_v43, %v8529_v11  ;;  %v4539_v61 = vcombine.low %v3433_v44, %v3437_v29  ;;  %v4540_v33 = vcombine.low %v3441_v58, %v3445_v0  ;;  %v3197_v48 = vadd.f32 %v8499_v7, %v3147_v34 }
 0x4e6   : > { %v8731_v35 = vpop.eup %7416  ;;  %v4684_v18 = vrot.slane %v4670_v50, %v8529_v11  ;;  %v4541_v4 = vcombine.low %v3449_v39, %v3453_v49  ;;  %v4542_v31 = vcombine.low %v3457_v53, %v3461_v16  ;;  %v3593_v19 = vrot.slane %v8584_v40, %v8496_v24 }
 0x4e7   : > { %v4549_v52 = vrot.slane %v4539_v61, %v8529_v11  ;;  %v4556_v32 = vrot.slane %v4540_v33, %v8529_v11  ;;  %7422 = vtanh.f32 %v3197_v48  ;;  %v3597_v62 = vrot.slane %v8584_v40, %v8506_v2 }
 0x4e8   : > { %v4685_v6 = vcombine.low %v4677_v8, %v4684_v18  ;;  %v4563_v1 = vrot.slane %v4541_v4, %v8529_v11  ;;  %v4570_v17 = vrot.slane %v4542_v31, %v8529_v11  ;;  %v3601_v23 = vrot.slane %v8584_v40, %v8510_v21 }
 0x4e9   : > { %v4571_v57 = vcombine.low %v4549_v52, %v4556_v32  ;;  %v3605_v28 = vrot.slane %v8584_v40, %v8513_v3  ;;  %v3609_v14 = vrot.slane %v8584_v40, %v8517_v37  ;;  %v3613_v45 = vrot.slane %v8584_v40, %v8520_v41 }
 0x4ea   : > { %5884 = vperm.xlu1 %7315, %v4685_v6   ;;  %v4572_v59 = vcombine.low %v4563_v1, %v4570_v17  ;;  %v3617_v22 = vrot.slane %v8584_v40, %v8523_v9  ;;  %v3621_v44 = vrot.slane %v8584_v40, %v8526_v13  ;;  %v4784_v63 = vcombine.low %v3593_v19, %v3597_v62 }
 0x4eb   : > { %v8754_v25 = vpop.eup %7418  ;;  %v4579_v56 = vrot.slane %v4571_v57, %v8529_v11  ;;  %v4785_v36 = vcombine.low %v3601_v23, %v3605_v28  ;;  %v4786_v54 = vcombine.low %v3609_v14, %v3613_v45  ;;  %v3200_v29 = vadd.f32 %v8499_v7, %v3153_v5  ;;  %v3149_v14 = vpop.xlane.xlu0 %3148 }
 0x4ec   : > { %v8758_v34 = vpop.eup %7420  ;;  %v4586_v43 = vrot.slane %v4572_v59, %v8529_v11  ;;  %v4787_v58 = vcombine.low %v3617_v22, %v3621_v44  ;;  %v4794_v0 = vrot.slane %v4784_v63, %v8529_v11  ;;  %v3529_v39 = vrot.slane %v8602_v30, %v8496_v24 }
 0x4ed   : > { %v4801_v40 = vrot.slane %v4785_v36, %v8529_v11  ;;  %v4808_v50 = vrot.slane %v4786_v54, %v8529_v11  ;;  %7424 = vtanh.f32 %v3200_v29  ;;  %v3533_v49 = vrot.slane %v8602_v30, %v8506_v2 }
 0x4ee   : > { %v4587_v53 = vcombine.low %v4579_v56, %v4586_v43  ;;  %v4815_v16 = vrot.slane %v4787_v58, %v8529_v11  ;;  %v3537_v8 = vrot.slane %v8602_v30, %v8510_v21  ;;  %v3541_v61 = vrot.slane %v8602_v30, %v8513_v3 }
 0x4ef   : > { %v4816_v33 = vcombine.low %v4794_v0, %v4801_v40  ;;  %v3545_v48 = vrot.slane %v8602_v30, %v8517_v37  ;;  %v3549_v18 = vrot.slane %v8602_v30, %v8520_v41  ;;  %v3553_v4 = vrot.slane %v8602_v30, %v8523_v9 }
 0x4f0   : > { %5878 = vperm.xlu1 %7315, %v4587_v53   ;;  %v4817_v31 = vcombine.low %v4808_v50, %v4815_v16  ;;  %v3557_v19 = vrot.slane %v8602_v30, %v8526_v13  ;;  %v4686_v52 = vcombine.low %v3529_v39, %v3533_v49  ;;  %v4687_v32 = vcombine.low %v3537_v8, %v3541_v61 }
 0x4f1   : > { %v8781_v62 = vpop.eup %7422  ;;  %v4824_v6 = vrot.slane %v4816_v33, %v8529_v11  ;;  %v4688_v1 = vcombine.low %v3545_v48, %v3549_v18  ;;  %v3881_v17 = vrot.slane %v8663_v51, %v8496_v24  ;;  %v3885_v23 = vrot.slane %v8663_v51, %v8506_v2 }
 0x4f2   : > { %v4831_v5 = vrot.slane %v4817_v31, %v8529_v11  ;;  %v4689_v57 = vcombine.low %v3553_v4, %v3557_v19  ;;  %v4696_v28 = vrot.slane %v4686_v52, %v8529_v11  ;;  %v4703_v30 = vrot.slane %v4687_v32, %v8529_v11  ;;  %v3151_v4 = vpop.xlane.xlu0 %3150 }
 0x4f3   : > { %v4710_v45 = vrot.slane %v4688_v1, %v8529_v11  ;;  %v3889_v59 = vrot.slane %v8663_v51, %v8510_v21  ;;  %v3893_v22 = vrot.slane %v8663_v51, %v8513_v3  ;;  %v3897_v44 = vrot.slane %v8663_v51, %v8517_v37 }
 0x4f4   : > { %v4832_v63 = vcombine.low %v4824_v6, %v4831_v5  ;;  %v4717_v56 = vrot.slane %v4689_v57, %v8529_v11  ;;  %v4718_v36 = vcombine.low %v4696_v28, %v4703_v30  ;;  %v3901_v54 = vrot.slane %v8663_v51, %v8520_v41 }
 0x4f5   : > { %v3905_v29 = vrot.slane %v8663_v51, %v8523_v9  ;;  %v3909_v43 = vrot.slane %v8663_v51, %v8526_v13  ;;  %v5225_v58 = vcombine.low %v3881_v17, %v3885_v23  ;;  %v5226_v0 = vcombine.low %v3889_v59, %v3893_v22 }
 0x4f6   : > { %5893 = vperm.xlu1 %7315, %v4832_v63   ;;  %v4719_v39 = vcombine.low %v4710_v45, %v4717_v56  ;;  %v4726_v40 = vrot.slane %v4718_v36, %v8529_v11  ;;  %v5227_v50 = vcombine.low %v3897_v44, %v3901_v54  ;;  %v3198_v49 = vadd.f32 %v8499_v7, %v3149_v14 }
 0x4f7   : > { %v8807_v53 = vpop.eup %7424  ;;  %v5228_v16 = vcombine.low %v3905_v29, %v3909_v43  ;;  %v5235_v8 = vrot.slane %v5225_v58, %v8529_v11  ;;  %v5242_v61 = vrot.slane %v5226_v0, %v8529_v11  ;;  %v3625_v33 = vrot.slane %v8588_v55, %v8496_v24  ;;  %v3161_v43 = vpop.xlane.xlu0 %3160 }
 0x4f8   : > { %v4733_v51 = vrot.slane %v4719_v39, %v8529_v11  ;;  %v5249_v48 = vrot.slane %v5227_v50, %v8529_v11  ;;  %7426 = vtanh.f32 %v3198_v49  ;;  %v3629_v18 = vrot.slane %v8588_v55, %v8506_v2 }
 0x4f9   : > { %v5256_v31 = vrot.slane %v5228_v16, %v8529_v11  ;;  %v5257_v19 = vcombine.low %v5235_v8, %v5242_v61  ;;  %v3633_v52 = vrot.slane %v8588_v55, %v8510_v21  ;;  %v3637_v32 = vrot.slane %v8588_v55, %v8513_v3 }
 0x4fa   : > { %v4734_v6 = vcombine.low %v4726_v40, %v4733_v51  ;;  %v3641_v1 = vrot.slane %v8588_v55, %v8517_v37  ;;  %v3645_v17 = vrot.slane %v8588_v55, %v8520_v41  ;;  %v3649_v23 = vrot.slane %v8588_v55, %v8523_v9 }
 0x4fb   : > { %v5258_v5 = vcombine.low %v5249_v48, %v5256_v31  ;;  %v5265_v57 = vrot.slane %v5257_v19, %v8529_v11  ;;  %v3653_v28 = vrot.slane %v8588_v55, %v8526_v13  ;;  %v4833_v30 = vcombine.low %v3625_v33, %v3629_v18 }
 0x4fc   : > { %5887 = vperm.xlu1 %7315, %v4734_v6   ;;  %v4834_v14 = vcombine.low %v3633_v52, %v3637_v32  ;;  %v4835_v45 = vcombine.low %v3641_v1, %v3645_v17  ;;  %v3199_v59 = vadd.f32 %v8499_v7, %v3151_v4  ;;  %v3561_v22 = vrot.slane %v8609_v38, %v8496_v24 }
 0x4fd   : > { %v5272_v44 = vrot.slane %v5258_v5, %v8529_v11  ;;  %v4836_v63 = vcombine.low %v3649_v23, %v3653_v28  ;;  %v4843_v56 = vrot.slane %v4833_v30, %v8529_v11  ;;  %v3565_v36 = vrot.slane %v8609_v38, %v8506_v2 }
 0x4fe   : > { %v4850_v54 = vrot.slane %v4834_v14, %v8529_v11  ;;  %v4857_v55 = vrot.slane %v4835_v45, %v8529_v11  ;;  %7428 = vtanh.f32 %v3199_v59  ;;  %v3569_v29 = vrot.slane %v8609_v38, %v8510_v21 }
 0x4ff   : > { %v5273_v58 = vcombine.low %v5265_v57, %v5272_v44  ;;  %v4864_v0 = vrot.slane %v4836_v63, %v8529_v11  ;;  %v3573_v39 = vrot.slane %v8609_v38, %v8513_v3  ;;  %v3577_v40 = vrot.slane %v8609_v38, %v8517_v37 }
 0x500   : > { %v4865_v50 = vcombine.low %v4843_v56, %v4850_v54  ;;  %v3581_v49 = vrot.slane %v8609_v38, %v8520_v41  ;;  %v3585_v16 = vrot.slane %v8609_v38, %v8523_v9  ;;  %v3589_v8 = vrot.slane %v8609_v38, %v8526_v13 }
 0x501   : > { %5920 = vperm.xlu0 %7316, %v5273_v58   ;;  %v4866_v61 = vcombine.low %v4857_v55, %v4864_v0  ;;  %v4735_v33 = vcombine.low %v3561_v22, %v3565_v36  ;;  %v4736_v51 = vcombine.low %v3569_v29, %v3573_v39  ;;  %v3204_v48 = vadd.f32 %v8499_v7, %v3161_v43 }
 0x502   : > { %v8854_v18 = vpop.eup %7426  ;;  %v4873_v4 = vrot.slane %v4865_v50, %v8529_v11  ;;  %v4737_v31 = vcombine.low %v3577_v40, %v3581_v49  ;;  %v4738_v19 = vcombine.low %v3585_v16, %v3589_v8  ;;  %v3849_v52 = vrot.slane %v8676_v12, %v8496_v24  ;;  %v3157_v49 = vpop.xlane.xlu0 %3156 }
 0x503   : > { %v4880_v32 = vrot.slane %v4866_v61, %v8529_v11  ;;  %v4745_v6 = vrot.slane %v4735_v33, %v8529_v11  ;;  %v4752_v38 = vrot.slane %v4736_v51, %v8529_v11  ;;  %7430 = vtanh.f32 %v3204_v48 }
 0x504   : > { %v4759_v1 = vrot.slane %v4737_v31, %v8529_v11  ;;  %v4766_v17 = vrot.slane %v4738_v19, %v8529_v11  ;;  %v3853_v23 = vrot.slane %v8676_v12, %v8506_v2  ;;  %v3857_v5 = vrot.slane %v8676_v12, %v8510_v21 }
 0x505   : > { %v4881_v57 = vcombine.low %v4873_v4, %v4880_v32  ;;  %v4767_v28 = vcombine.low %v4745_v6, %v4752_v38  ;;  %v3861_v30 = vrot.slane %v8676_v12, %v8513_v3  ;;  %v3865_v14 = vrot.slane %v8676_v12, %v8517_v37 }
 0x506   : > { %v4768_v45 = vcombine.low %v4759_v1, %v4766_v17  ;;  %v3869_v59 = vrot.slane %v8676_v12, %v8520_v41  ;;  %v3873_v22 = vrot.slane %v8676_v12, %v8523_v9  ;;  %v3877_v44 = vrot.slane %v8676_v12, %v8526_v13 }
 0x507   : > { %5896 = vperm.xlu1 %7315, %v4881_v57   ;;  %v4775_v63 = vrot.slane %v4767_v28, %v8529_v11  ;;  %v5176_v56 = vcombine.low %v3849_v52, %v3853_v23  ;;  %v5177_v36 = vcombine.low %v3857_v5, %v3861_v30  ;;  %v3977_v54 = vrot.slane %v8731_v35, %v8496_v24 }
 0x508   : > { %v8881_v55 = vpop.eup %7428  ;;  %v4782_v29 = vrot.slane %v4768_v45, %v8529_v11  ;;  %v5178_v43 = vcombine.low %v3865_v14, %v3869_v59  ;;  %v5179_v58 = vcombine.low %v3873_v22, %v3877_v44  ;;  %v3981_v0 = vrot.slane %v8731_v35, %v8506_v2 }
 0x509   : > { %v5186_v39 = vrot.slane %v5176_v56, %v8529_v11  ;;  %v5193_v12 = vrot.slane %v5177_v36, %v8529_v11  ;;  %v3985_v40 = vrot.slane %v8731_v35, %v8510_v21  ;;  %v3989_v50 = vrot.slane %v8731_v35, %v8513_v3 }
 0x50a   : > { %v4783_v16 = vcombine.low %v4775_v63, %v4782_v29  ;;  %v5200_v8 = vrot.slane %v5178_v43, %v8529_v11  ;;  %v5207_v61 = vrot.slane %v5179_v58, %v8529_v11  ;;  %v3993_v33 = vrot.slane %v8731_v35, %v8517_v37 }
 0x50b   : > { %v5208_v51 = vcombine.low %v5186_v39, %v5193_v12  ;;  %v3997_v48 = vrot.slane %v8731_v35, %v8520_v41  ;;  %v4001_v4 = vrot.slane %v8731_v35, %v8523_v9  ;;  %v4005_v31 = vrot.slane %v8731_v35, %v8526_v13 }
 0x50c   : > { %5890 = vperm.xlu1 %7315, %v4783_v16   ;;  %v5209_v19 = vcombine.low %v5200_v8, %v5207_v61  ;;  %v5372_v52 = vcombine.low %v3977_v54, %v3981_v0  ;;  %v5373_v32 = vcombine.low %v3985_v40, %v3989_v50  ;;  %v3202_v6 = vadd.f32 %v8499_v7, %v3157_v49 }
 0x50d   : > { %v8903_v38 = vpop.eup %7430  ;;  %v5216_v1 = vrot.slane %v5208_v51, %v8529_v11  ;;  %v5374_v17 = vcombine.low %v3993_v33, %v3997_v48  ;;  %v5375_v23 = vcombine.low %v4001_v4, %v4005_v31  ;;  %v3785_v5 = vrot.slane %v8702_v42, %v8496_v24  ;;  %v3159_v51 = vpop.xlane.xlu0 %3158 }
 0x50e   : > { %v5223_v57 = vrot.slane %v5209_v19, %v8529_v11  ;;  %v5382_v28 = vrot.slane %v5372_v52, %v8529_v11  ;;  %v5389_v35 = vrot.slane %v5373_v32, %v8529_v11  ;;  %7432 = vtanh.f32 %v3202_v6 }
 0x50f   : > { %v5396_v30 = vrot.slane %v5374_v17, %v8529_v11  ;;  %v5403_v14 = vrot.slane %v5375_v23, %v8529_v11  ;;  %v3789_v45 = vrot.slane %v8702_v42, %v8506_v2  ;;  %v3793_v59 = vrot.slane %v8702_v42, %v8510_v21 }
 0x510   : > { %v5224_v22 = vcombine.low %v5216_v1, %v5223_v57  ;;  %v5404_v44 = vcombine.low %v5382_v28, %v5389_v35  ;;  %v3797_v63 = vrot.slane %v8702_v42, %v8513_v3  ;;  %v3801_v56 = vrot.slane %v8702_v42, %v8517_v37 }
 0x511   : > { %v5405_v36 = vcombine.low %v5396_v30, %v5403_v14  ;;  %v3805_v54 = vrot.slane %v8702_v42, %v8520_v41  ;;  %v3809_v29 = vrot.slane %v8702_v42, %v8523_v9  ;;  %v3813_v43 = vrot.slane %v8702_v42, %v8526_v13 }
 0x512   : > { %5917 = vperm.xlu1 %7315, %v5224_v22   ;;  %v5412_v58 = vrot.slane %v5404_v44, %v8529_v11  ;;  %v5078_v0 = vcombine.low %v3785_v5, %v3789_v45  ;;  %v5079_v39 = vcombine.low %v3793_v59, %v3797_v63  ;;  %v3913_v12 = vrot.slane %v8754_v25, %v8496_v24 }
 0x513   : > { %v5419_v40 = vrot.slane %v5405_v36, %v8529_v11  ;;  %v5080_v50 = vcombine.low %v3801_v56, %v3805_v54  ;;  %v5081_v49 = vcombine.low %v3809_v29, %v3813_v43  ;;  %v3917_v16 = vrot.slane %v8754_v25, %v8506_v2 }
 0x514   : > { %v5088_v8 = vrot.slane %v5078_v0, %v8529_v11  ;;  %v5095_v61 = vrot.slane %v5079_v39, %v8529_v11  ;;  %v3921_v42 = vrot.slane %v8754_v25, %v8510_v21  ;;  %v3925_v33 = vrot.slane %v8754_v25, %v8513_v3 }
 0x515   : > { %v5420_v48 = vcombine.low %v5412_v58, %v5419_v40  ;;  %v5102_v4 = vrot.slane %v5080_v50, %v8529_v11  ;;  %v5109_v31 = vrot.slane %v5081_v49, %v8529_v11  ;;  %v3929_v19 = vrot.slane %v8754_v25, %v8517_v37 }
 0x516   : > { %v5110_v52 = vcombine.low %v5088_v8, %v5095_v61  ;;  %v3933_v32 = vrot.slane %v8754_v25, %v8520_v41  ;;  %v3937_v6 = vrot.slane %v8754_v25, %v8523_v9  ;;  %v3941_v1 = vrot.slane %v8754_v25, %v8526_v13 }
 0x517   : > { %5929 = vperm.xlu0 %7316, %v5420_v48   ;;  %v5111_v17 = vcombine.low %v5102_v4, %v5109_v31  ;;  %v5274_v23 = vcombine.low %v3913_v12, %v3917_v16  ;;  %v5275_v5 = vcombine.low %v3921_v42, %v3925_v33  ;;  %v3203_v57 = vadd.f32 %v8499_v7, %v3159_v51 }
 0x518   : > { %v8950_v28 = vpop.eup %7432  ;;  %v5118_v35 = vrot.slane %v5110_v52, %v8529_v11  ;;  %v5276_v30 = vcombine.low %v3929_v19, %v3933_v32  ;;  %v5277_v14 = vcombine.low %v3937_v6, %v3941_v1  ;;  %v3817_v45 = vrot.slane %v8681_v60, %v8496_v24  ;;  %v3163_v19 = vpop.xlane.xlu0 %3162 }
 0x519   : > { %v5125_v59 = vrot.slane %v5111_v17, %v8529_v11  ;;  %v5284_v22 = vrot.slane %v5274_v23, %v8529_v11  ;;  %v5291_v25 = vrot.slane %v5275_v5, %v8529_v11  ;;  %7434 = vtanh.f32 %v3203_v57 }
 0x51a   : > { %v5298_v44 = vrot.slane %v5276_v30, %v8529_v11  ;;  %v5305_v63 = vrot.slane %v5277_v14, %v8529_v11  ;;  %v3821_v56 = vrot.slane %v8681_v60, %v8506_v2  ;;  %v3825_v36 = vrot.slane %v8681_v60, %v8510_v21 }
 0x51b   : > { %v5126_v54 = vcombine.low %v5118_v35, %v5125_v59  ;;  %v5306_v29 = vcombine.low %v5284_v22, %v5291_v25  ;;  %v3829_v43 = vrot.slane %v8681_v60, %v8513_v3  ;;  %v3833_v58 = vrot.slane %v8681_v60, %v8517_v37 }
 0x51c   : > { %v5307_v0 = vcombine.low %v5298_v44, %v5305_v63  ;;  %v3837_v39 = vrot.slane %v8681_v60, %v8520_v41  ;;  %v3841_v12 = vrot.slane %v8681_v60, %v8523_v9  ;;  %v3845_v40 = vrot.slane %v8681_v60, %v8526_v13 }
 0x51d   : > { %5911 = vperm.xlu1 %7315, %v5126_v54   ;;  %v5314_v50 = vrot.slane %v5306_v29, %v8529_v11  ;;  %v5127_v49 = vcombine.low %v3817_v45, %v3821_v56  ;;  %v5128_v16 = vcombine.low %v3825_v36, %v3829_v43  ;;  %v4009_v8 = vrot.slane %v8781_v62, %v8496_v24 }
 0x51e   : > { %v5321_v61 = vrot.slane %v5307_v0, %v8529_v11  ;;  %v5129_v42 = vcombine.low %v3833_v58, %v3837_v39  ;;  %v5130_v33 = vcombine.low %v3841_v12, %v3845_v40  ;;  %v4013_v51 = vrot.slane %v8781_v62, %v8506_v2 }
 0x51f   : > { %v5137_v48 = vrot.slane %v5127_v49, %v8529_v11  ;;  %v5144_v4 = vrot.slane %v5128_v16, %v8529_v11  ;;  %v4017_v60 = vrot.slane %v8781_v62, %v8510_v21  ;;  %v4021_v31 = vrot.slane %v8781_v62, %v8513_v3 }
 0x520   : > { %v5322_v52 = vcombine.low %v5314_v50, %v5321_v61  ;;  %v5151_v32 = vrot.slane %v5129_v42, %v8529_v11  ;;  %v5158_v6 = vrot.slane %v5130_v33, %v8529_v11  ;;  %v4025_v1 = vrot.slane %v8781_v62, %v8517_v37 }
 0x521   : > { %v5159_v17 = vcombine.low %v5137_v48, %v5144_v4  ;;  %v4029_v23 = vrot.slane %v8781_v62, %v8520_v41  ;;  %v4033_v5 = vrot.slane %v8781_v62, %v8523_v9  ;;  %v4037_v57 = vrot.slane %v8781_v62, %v8526_v13 }
 0x522   : > { %5923 = vperm.xlu0 %7316, %v5322_v52   ;;  %v5160_v35 = vcombine.low %v5151_v32, %v5158_v6  ;;  %v5421_v30 = vcombine.low %v4009_v8, %v4013_v51  ;;  %v5422_v14 = vcombine.low %v4017_v60, %v4021_v31  ;;  %v3205_v45 = vadd.f32 %v8499_v7, %v3163_v19 }
 0x523   : > { %v8997_v59 = vpop.eup %7434  ;;  %v5167_v22 = vrot.slane %v5159_v17, %v8529_v11  ;;  %v5423_v25 = vcombine.low %v4025_v1, %v4029_v23  ;;  %v5424_v44 = vcombine.low %v4033_v5, %v4037_v57  ;;  %v3657_v63 = vrot.slane %v8638_v47, %v8496_v24 }
 0x524   : > { %v5174_v56 = vrot.slane %v5160_v35, %v8529_v11  ;;  %v5431_v36 = vrot.slane %v5421_v30, %v8529_v11  ;;  %v5438_v62 = vrot.slane %v5422_v14, %v8529_v11  ;;  %7436 = vtanh.f32 %v3205_v45 }
 0x525   : > { %v5445_v54 = vrot.slane %v5423_v25, %v8529_v11  ;;  %v5452_v7 = vrot.slane %v5424_v44, %v8529_v11  ;;  %v3661_v29 = vrot.slane %v8638_v47, %v8506_v2  ;;  %v3665_v43 = vrot.slane %v8638_v47, %v8510_v21 }
 0x526   : > { %v5175_v58 = vcombine.low %v5167_v22, %v5174_v56  ;;  %v5453_v0 = vcombine.low %v5431_v36, %v5438_v62  ;;  %v3669_v39 = vrot.slane %v8638_v47, %v8513_v3  ;;  %v3673_v12 = vrot.slane %v8638_v47, %v8517_v37 }
 0x527   : > { %v5454_v40 = vcombine.low %v5445_v54, %v5452_v7  ;;  %v3677_v50 = vrot.slane %v8638_v47, %v8520_v41  ;;  %v3681_v49 = vrot.slane %v8638_v47, %v8523_v9  ;;  %v3685_v16 = vrot.slane %v8638_v47, %v8526_v13 }
 0x528   : > { %5914 = vperm.xlu1 %7315, %v5175_v58   ;;  %v5461_v8 = vrot.slane %v5453_v0, %v8529_v11  ;;  %v4882_v61 = vcombine.low %v3657_v63, %v3661_v29  ;;  %v4883_v42 = vcombine.low %v3665_v43, %v3669_v39  ;;  %v3945_v33 = vrot.slane %v8727_v26, %v8496_v24 }
 0x529   : > { %v5468_v51 = vrot.slane %v5454_v40, %v8529_v11  ;;  %v4884_v48 = vcombine.low %v3673_v12, %v3677_v50  ;;  %v4885_v4 = vcombine.low %v3681_v49, %v3685_v16  ;;  %v3949_v60 = vrot.slane %v8727_v26, %v8506_v2 }
 0x52a   : > { %v4892_v31 = vrot.slane %v4882_v61, %v8529_v11  ;;  %v4899_v19 = vrot.slane %v4883_v42, %v8529_v11  ;;  %v3953_v47 = vrot.slane %v8727_v26, %v8510_v21  ;;  %v3957_v52 = vrot.slane %v8727_v26, %v8513_v3 }
 0x52b   : > { %v5469_v32 = vcombine.low %v5461_v8, %v5468_v51  ;;  %v4906_v6 = vrot.slane %v4884_v48, %v8529_v11  ;;  %v4913_v1 = vrot.slane %v4885_v4, %v8529_v11  ;;  %v3961_v17 = vrot.slane %v8727_v26, %v8517_v37 }
 0x52c   : > { %v4914_v23 = vcombine.low %v4892_v31, %v4899_v19  ;;  %v3965_v5 = vrot.slane %v8727_v26, %v8520_v41  ;;  %v3969_v57 = vrot.slane %v8727_v26, %v8523_v9  ;;  %v3973_v35 = vrot.slane %v8727_v26, %v8526_v13 }
 0x52d   : > { %5932 = vperm.xlu0 %7316, %v5469_v32   ;;  %v4915_v30 = vcombine.low %v4906_v6, %v4913_v1  ;;  %v5323_v14 = vcombine.low %v3945_v33, %v3949_v60  ;;  %v5324_v45 = vcombine.low %v3953_v47, %v3957_v52  ;;  %v3689_v22 = vrot.slane %v8628_v27, %v8496_v24 }
 0x52e   : > { %v9045_v25 = vpop.eup %7436  ;;  %v4922_v44 = vrot.slane %v4914_v23, %v8529_v11  ;;  %v5325_v63 = vcombine.low %v3961_v17, %v3965_v5  ;;  %v5326_v56 = vcombine.low %v3969_v57, %v3973_v35  ;;  %v3693_v36 = vrot.slane %v8628_v27, %v8506_v2 }
 0x52f   : > { %v4929_v62 = vrot.slane %v4915_v30, %v8529_v11  ;;  %v5333_v26 = vrot.slane %v5323_v14, %v8529_v11  ;;  %v5340_v54 = vrot.slane %v5324_v45, %v8529_v11  ;;  %v3697_v7 = vrot.slane %v8628_v27, %v8510_v21 }
 0x530   : > { %v5347_v29 = vrot.slane %v5325_v63, %v8529_v11  ;;  %v5354_v43 = vrot.slane %v5326_v56, %v8529_v11  ;;  %v3701_v58 = vrot.slane %v8628_v27, %v8513_v3  ;;  %v3705_v0 = vrot.slane %v8628_v27, %v8517_v37 }
 0x531   : > { %v4930_v39 = vcombine.low %v4922_v44, %v4929_v62  ;;  %v5355_v12 = vcombine.low %v5333_v26, %v5340_v54  ;;  %v3709_v40 = vrot.slane %v8628_v27, %v8520_v41  ;;  %v3713_v50 = vrot.slane %v8628_v27, %v8523_v9 }
 0x532   : > { %v5356_v49 = vcombine.low %v5347_v29, %v5354_v43  ;;  %v3717_v16 = vrot.slane %v8628_v27, %v8526_v13  ;;  %v4931_v8 = vcombine.low %v3689_v22, %v3693_v36  ;;  %v4932_v61 = vcombine.low %v3697_v7, %v3701_v58 }
 0x533   : > { %5899 = vperm.xlu1 %7315, %v4930_v39   ;;  %v5363_v42 = vrot.slane %v5355_v12, %v8529_v11  ;;  %v4933_v33 = vcombine.low %v3705_v0, %v3709_v40  ;;  %v4105_v51 = vrot.slane %v8807_v53, %v8496_v24  ;;  %v4109_v48 = vrot.slane %v8807_v53, %v8506_v2 }
 0x534   : > { %v5370_v4 = vrot.slane %v5356_v49, %v8529_v11  ;;  %v4934_v60 = vcombine.low %v3713_v50, %v3717_v16  ;;  %v4941_v31 = vrot.slane %v4931_v8, %v8529_v11  ;;  %v4948_v19 = vrot.slane %v4932_v61, %v8529_v11 }
 0x535   : > { %v4955_v27 = vrot.slane %v4933_v33, %v8529_v11  ;;  %v4113_v47 = vrot.slane %v8807_v53, %v8510_v21  ;;  %v4117_v52 = vrot.slane %v8807_v53, %v8513_v3  ;;  %v4121_v32 = vrot.slane %v8807_v53, %v8517_v37 }
 0x536   : > { %v5371_v6 = vcombine.low %v5363_v42, %v5370_v4  ;;  %v4962_v1 = vrot.slane %v4934_v60, %v8529_v11  ;;  %v4963_v17 = vcombine.low %v4941_v31, %v4948_v19  ;;  %v4125_v23 = vrot.slane %v8807_v53, %v8520_v41 }
 0x537   : > { %v4129_v5 = vrot.slane %v8807_v53, %v8523_v9  ;;  %v4133_v57 = vrot.slane %v8807_v53, %v8526_v13  ;;  %v5568_v35 = vcombine.low %v4105_v51, %v4109_v48  ;;  %v5569_v30 = vcombine.low %v4113_v47, %v4117_v52 }
 0x538   : > { %5926 = vperm.xlu0 %7316, %v5371_v6   ;;  %v4964_v14 = vcombine.low %v4955_v27, %v4962_v1  ;;  %v4971_v45 = vrot.slane %v4963_v17, %v8529_v11  ;;  %v5570_v22 = vcombine.low %v4121_v32, %v4125_v23  ;;  %v3721_v44 = vrot.slane %v8618_v46, %v8496_v24 }
 0x539   : > { %v5571_v63 = vcombine.low %v4129_v5, %v4133_v57  ;;  %v5578_v56 = vrot.slane %v5568_v35, %v8529_v11  ;;  %v5585_v36 = vrot.slane %v5569_v30, %v8529_v11  ;;  %v3725_v62 = vrot.slane %v8618_v46, %v8506_v2 }
 0x53a   : > { %v4978_v53 = vrot.slane %v4964_v14, %v8529_v11  ;;  %v5592_v26 = vrot.slane %v5570_v22, %v8529_v11  ;;  %v3729_v54 = vrot.slane %v8618_v46, %v8510_v21  ;;  %v3733_v7 = vrot.slane %v8618_v46, %v8513_v3 }
 0x53b   : > { %v5599_v29 = vrot.slane %v5571_v63, %v8529_v11  ;;  %v5600_v43 = vcombine.low %v5578_v56, %v5585_v36  ;;  %v3737_v58 = vrot.slane %v8618_v46, %v8517_v37  ;;  %v3741_v0 = vrot.slane %v8618_v46, %v8520_v41 }
 0x53c   : > { %v4979_v39 = vcombine.low %v4971_v45, %v4978_v53  ;;  %v3745_v12 = vrot.slane %v8618_v46, %v8523_v9  ;;  %v3749_v40 = vrot.slane %v8618_v46, %v8526_v13  ;;  %v4980_v50 = vcombine.low %v3721_v44, %v3725_v62 }
 0x53d   : > { %v5601_v49 = vcombine.low %v5592_v26, %v5599_v29  ;;  %v5608_v16 = vrot.slane %v5600_v43, %v8529_v11  ;;  %v4981_v8 = vcombine.low %v3729_v54, %v3733_v7  ;;  %v4982_v61 = vcombine.low %v3737_v58, %v3741_v0 }
 0x53e   : > { %5902 = vperm.xlu1 %7315, %v4979_v39   ;;  %v4983_v42 = vcombine.low %v3745_v12, %v3749_v40  ;;  %v4990_v33 = vrot.slane %v4980_v50, %v8529_v11  ;;  %v4041_v51 = vrot.slane %v8854_v18, %v8496_v24  ;;  %v4045_v48 = vrot.slane %v8854_v18, %v8506_v2 }
 0x53f   : > { %v5615_v4 = vrot.slane %v5601_v49, %v8529_v11  ;;  %v4997_v46 = vrot.slane %v4981_v8, %v8529_v11  ;;  %v5004_v60 = vrot.slane %v4982_v61, %v8529_v11  ;;  %v4049_v31 = vrot.slane %v8854_v18, %v8510_v21 }
 0x540   : > { %v5011_v19 = vrot.slane %v4983_v42, %v8529_v11  ;;  %v4053_v27 = vrot.slane %v8854_v18, %v8513_v3  ;;  %v4057_v47 = vrot.slane %v8854_v18, %v8517_v37  ;;  %v4061_v52 = vrot.slane %v8854_v18, %v8520_v41 }
 0x541   : > { %v5616_v32 = vcombine.low %v5608_v16, %v5615_v4  ;;  %v5012_v6 = vcombine.low %v4990_v33, %v4997_v46  ;;  %v4065_v1 = vrot.slane %v8854_v18, %v8523_v9  ;;  %v4069_v17 = vrot.slane %v8854_v18, %v8526_v13 }
 0x542   : > { %v5013_v23 = vcombine.low %v5004_v60, %v5011_v19  ;;  %v5470_v5 = vcombine.low %v4041_v51, %v4045_v48  ;;  %v5471_v57 = vcombine.low %v4049_v31, %v4053_v27  ;;  %v5472_v35 = vcombine.low %v4057_v47, %v4061_v52 }
 0x543   : > { %5941 = vperm.xlu0 %7316, %v5616_v32   ;;  %v5020_v30 = vrot.slane %v5012_v6, %v8529_v11  ;;  %v5473_v14 = vcombine.low %v4065_v1, %v4069_v17  ;;  %v3753_v45 = vrot.slane %v8655_v20, %v8496_v24  ;;  %v3757_v22 = vrot.slane %v8655_v20, %v8506_v2 }
 0x544   : > { %v5027_v44 = vrot.slane %v5013_v23, %v8529_v11  ;;  %v5480_v63 = vrot.slane %v5470_v5, %v8529_v11  ;;  %v5487_v18 = vrot.slane %v5471_v57, %v8529_v11  ;;  %v5494_v56 = vrot.slane %v5472_v35, %v8529_v11 }
 0x545   : > { %v5501_v36 = vrot.slane %v5473_v14, %v8529_v11  ;;  %v3761_v62 = vrot.slane %v8655_v20, %v8510_v21  ;;  %v3765_v53 = vrot.slane %v8655_v20, %v8513_v3  ;;  %v3769_v26 = vrot.slane %v8655_v20, %v8517_v37 }
 0x546   : > { %v5028_v54 = vcombine.low %v5020_v30, %v5027_v44  ;;  %v5502_v7 = vcombine.low %v5480_v63, %v5487_v18  ;;  %v3773_v29 = vrot.slane %v8655_v20, %v8520_v41  ;;  %v3777_v43 = vrot.slane %v8655_v20, %v8523_v9 }
 0x547   : > { %v5503_v58 = vcombine.low %v5494_v56, %v5501_v36  ;;  %v3781_v0 = vrot.slane %v8655_v20, %v8526_v13  ;;  %v5029_v39 = vcombine.low %v3753_v45, %v3757_v22  ;;  %v5030_v12 = vcombine.low %v3761_v62, %v3765_v53 }
 0x548   : > { %5905 = vperm.xlu1 %7315, %v5028_v54   ;;  %v5510_v40 = vrot.slane %v5502_v7, %v8529_v11  ;;  %v5031_v50 = vcombine.low %v3769_v26, %v3773_v29  ;;  %v4137_v49 = vrot.slane %v8758_v34, %v8496_v24  ;;  %v4141_v16 = vrot.slane %v8758_v34, %v8506_v2 }
 0x549   : > { %v5517_v8 = vrot.slane %v5503_v58, %v8529_v11  ;;  %v5032_v61 = vcombine.low %v3777_v43, %v3781_v0  ;;  %v5039_v42 = vrot.slane %v5029_v39, %v8529_v11  ;;  %v5046_v33 = vrot.slane %v5030_v12, %v8529_v11 }
 0x54a   : > { %v5053_v20 = vrot.slane %v5031_v50, %v8529_v11  ;;  %v4145_v51 = vrot.slane %v8758_v34, %v8510_v21  ;;  %v4149_v48 = vrot.slane %v8758_v34, %v8513_v3  ;;  %v4153_v4 = vrot.slane %v8758_v34, %v8517_v37 }
 0x54b   : > { %v5518_v46 = vcombine.low %v5510_v40, %v5517_v8  ;;  %v5060_v60 = vrot.slane %v5032_v61, %v8529_v11  ;;  %v5061_v31 = vcombine.low %v5039_v42, %v5046_v33  ;;  %v4157_v19 = vrot.slane %v8758_v34, %v8520_v41 }
 0x54c   : > { %v4161_v27 = vrot.slane %v8758_v34, %v8523_v9  ;;  %v4165_v47 = vrot.slane %v8758_v34, %v8526_v13  ;;  %v5617_v52 = vcombine.low %v4137_v49, %v4141_v16  ;;  %v5618_v32 = vcombine.low %v4145_v51, %v4149_v48 }
 0x54d   : > { %5935 = vperm.xlu0 %7316, %v5518_v46   ;;  %v5062_v6 = vcombine.low %v5053_v20, %v5060_v60  ;;  %v5069_v1 = vrot.slane %v5061_v31, %v8529_v11  ;;  %v5619_v17 = vcombine.low %v4153_v4, %v4157_v19  ;;  %v4073_v23 = vrot.slane %v8881_v55, %v8496_v24 }
 0x54e   : > { %v5620_v5 = vcombine.low %v4161_v27, %v4165_v47  ;;  %v5627_v57 = vrot.slane %v5617_v52, %v8529_v11  ;;  %v5634_v35 = vrot.slane %v5618_v32, %v8529_v11  ;;  %v4077_v30 = vrot.slane %v8881_v55, %v8506_v2 }
 0x54f   : > { %v5076_v34 = vrot.slane %v5062_v6, %v8529_v11  ;;  %v5641_v14 = vrot.slane %v5619_v17, %v8529_v11  ;;  %v4081_v45 = vrot.slane %v8881_v55, %v8510_v21  ;;  %v4085_v22 = vrot.slane %v8881_v55, %v8513_v3 }
 0x550   : > { %v5648_v44 = vrot.slane %v5620_v5, %v8529_v11  ;;  %v5649_v63 = vcombine.low %v5627_v57, %v5634_v35  ;;  %v4089_v18 = vrot.slane %v8881_v55, %v8517_v37  ;;  %v4093_v56 = vrot.slane %v8881_v55, %v8520_v41 }
 0x551   : > { %v5077_v36 = vcombine.low %v5069_v1, %v5076_v34  ;;  %v4097_v62 = vrot.slane %v8881_v55, %v8523_v9  ;;  %v4101_v53 = vrot.slane %v8881_v55, %v8526_v13  ;;  %v5519_v26 = vcombine.low %v4073_v23, %v4077_v30 }
 0x552   : > { %v5650_v54 = vcombine.low %v5641_v14, %v5648_v44  ;;  %v5657_v7 = vrot.slane %v5649_v63, %v8529_v11  ;;  %v5520_v29 = vcombine.low %v4081_v45, %v4085_v22  ;;  %v5521_v43 = vcombine.low %v4089_v18, %v4093_v56 }
 0x553   : > { %5908 = vperm.xlu1 %7315, %v5077_v36   ;;  %v5522_v58 = vcombine.low %v4097_v62, %v4101_v53  ;;  %v5529_v0 = vrot.slane %v5519_v26, %v8529_v11  ;;  %v4233_v39 = vrot.slane %v8903_v38, %v8496_v24  ;;  %v4237_v12 = vrot.slane %v8903_v38, %v8506_v2 }
 0x554   : > { %v5664_v40 = vrot.slane %v5650_v54, %v8529_v11  ;;  %v5536_v55 = vrot.slane %v5520_v29, %v8529_v11  ;;  %v5543_v50 = vrot.slane %v5521_v43, %v8529_v11  ;;  %v4241_v49 = vrot.slane %v8903_v38, %v8510_v21 }
 0x555   : > { %v5550_v16 = vrot.slane %v5522_v58, %v8529_v11  ;;  %v4245_v8 = vrot.slane %v8903_v38, %v8513_v3  ;;  %v4249_v61 = vrot.slane %v8903_v38, %v8517_v37  ;;  %v4253_v42 = vrot.slane %v8903_v38, %v8520_v41 }
 0x556   : > { %v5665_v33 = vcombine.low %v5657_v7, %v5664_v40  ;;  %v5551_v20 = vcombine.low %v5529_v0, %v5536_v55  ;;  %v4257_v51 = vrot.slane %v8903_v38, %v8523_v9  ;;  %v4261_v48 = vrot.slane %v8903_v38, %v8526_v13 }
 0x557   : > { %v5552_v4 = vcombine.low %v5543_v50, %v5550_v16  ;;  %v5764_v46 = vcombine.low %v4233_v39, %v4237_v12  ;;  %v5765_v60 = vcombine.low %v4241_v49, %v4245_v8  ;;  %v5766_v31 = vcombine.low %v4249_v61, %v4253_v42 }
 0x558   : > { %5944 = vperm.xlu0 %7316, %v5665_v33   ;;  %v5559_v19 = vrot.slane %v5551_v20, %v8529_v11  ;;  %v5767_v27 = vcombine.low %v4257_v51, %v4261_v48  ;;  %v4169_v47 = vrot.slane %v8950_v28, %v8496_v24  ;;  %v4173_v52 = vrot.slane %v8950_v28, %v8506_v2 }
 0x559   : > { %v5566_v32 = vrot.slane %v5552_v4, %v8529_v11  ;;  %v5774_v6 = vrot.slane %v5764_v46, %v8529_v11  ;;  %v5781_v38 = vrot.slane %v5765_v60, %v8529_v11  ;;  %v5788_v1 = vrot.slane %v5766_v31, %v8529_v11 }
 0x55a   : > { %v5795_v17 = vrot.slane %v5767_v27, %v8529_v11  ;;  %v4177_v23 = vrot.slane %v8950_v28, %v8510_v21  ;;  %v4181_v5 = vrot.slane %v8950_v28, %v8513_v3  ;;  %v4185_v57 = vrot.slane %v8950_v28, %v8517_v37 }
 0x55b   : > { %v5567_v35 = vcombine.low %v5559_v19, %v5566_v32  ;;  %v5796_v30 = vcombine.low %v5774_v6, %v5781_v38  ;;  %v4189_v34 = vrot.slane %v8950_v28, %v8520_v41  ;;  %v4193_v14 = vrot.slane %v8950_v28, %v8523_v9 }
 0x55c   : > { %v5797_v45 = vcombine.low %v5788_v1, %v5795_v17  ;;  %v4197_v22 = vrot.slane %v8950_v28, %v8526_v13  ;;  %v5666_v44 = vcombine.low %v4169_v47, %v4173_v52  ;;  %v5667_v63 = vcombine.low %v4177_v23, %v4181_v5 }
 0x55d   : > { %5938 = vperm.xlu0 %7316, %v5567_v35   ;;  %v5804_v18 = vrot.slane %v5796_v30, %v8529_v11  ;;  %v5668_v56 = vcombine.low %v4185_v57, %v4189_v34  ;;  %v4201_v36 = vrot.slane %v8997_v59, %v8496_v24  ;;  %v4205_v62 = vrot.slane %v8997_v59, %v8506_v2 }
 0x55e   : > { %v5811_v53 = vrot.slane %v5797_v45, %v8529_v11  ;;  %v5669_v26 = vcombine.low %v4193_v14, %v4197_v22  ;;  %v5676_v54 = vrot.slane %v5666_v44, %v8529_v11  ;;  %v5683_v7 = vrot.slane %v5667_v63, %v8529_v11  ;;  %v5870_v14 = vpop.permute.xlu1 %5869 }
 0x55f   : > { %v5690_v28 = vrot.slane %v5668_v56, %v8529_v11  ;;  %v4209_v29 = vrot.slane %v8997_v59, %v8510_v21  ;;  %v4213_v43 = vrot.slane %v8997_v59, %v8513_v3  ;;  %v4217_v58 = vrot.slane %v8997_v59, %v8517_v37 }
 0x560   : > { %v5812_v0 = vcombine.low %v5804_v18, %v5811_v53  ;;  %v5697_v39 = vrot.slane %v5669_v26, %v8529_v11  ;;  %v5698_v12 = vcombine.low %v5676_v54, %v5683_v7  ;;  %v4221_v40 = vrot.slane %v8997_v59, %v8520_v41 }
 0x561   : > { %v4225_v55 = vrot.slane %v8997_v59, %v8523_v9  ;;  %v4229_v50 = vrot.slane %v8997_v59, %v8526_v13  ;;  %v5715_v49 = vcombine.low %v4201_v36, %v4205_v62  ;;  %v5716_v16 = vcombine.low %v4209_v29, %v4213_v43  ;;  %v5864_v62 = vpop.permute.xlu0 %5863 }
 0x562   : > { %5953 = vperm.xlu0 %7316, %v5812_v0   ;;  %v5699_v8 = vcombine.low %v5690_v28, %v5697_v39  ;;  %v5706_v61 = vrot.slane %v5698_v12, %v8529_v11  ;;  %v5717_v42 = vcombine.low %v4217_v58, %v4221_v40  ;;  %v4265_v33 = vrot.slane %v9045_v25, %v8496_v24  ;;  %v9295_v45 = vpop.permute.xlu1 %5872 }
 0x563   : > { %v5718_v20 = vcombine.low %v4225_v55, %v4229_v50  ;;  %v5725_v51 = vrot.slane %v5715_v49, %v8529_v11  ;;  %v5732_v48 = vrot.slane %v5716_v16, %v8529_v11  ;;  %v4269_v4 = vrot.slane %v9045_v25, %v8506_v2 }
 0x564   : > { %v5713_v59 = vrot.slane %v5699_v8, %v8529_v11  ;;  %v5739_v46 = vrot.slane %v5717_v42, %v8529_v11  ;;  %v4273_v60 = vrot.slane %v9045_v25, %v8510_v21  ;;  %v4277_v31 = vrot.slane %v9045_v25, %v8513_v3 }
 0x565   : > { %v5746_v24 = vrot.slane %v5718_v20, %v8529_v11  ;;  %v5747_v19 = vcombine.low %v5725_v51, %v5732_v48  ;;  %v4281_v27 = vrot.slane %v9045_v25, %v8517_v37  ;;  %v4285_v47 = vrot.slane %v9045_v25, %v8520_v41 }
 0x566   : > { %v5714_v2 = vcombine.low %v5706_v61, %v5713_v59  ;;  %v4289_v52 = vrot.slane %v9045_v25, %v8523_v9  ;;  %v4293_v32 = vrot.slane %v9045_v25, %v8526_v13  ;;  %v5813_v21 = vcombine.low %v4265_v33, %v4269_v4  ;;  %v5867_v22 = vpop.permute.xlu1 %5866 }
 0x567   : > { %v5748_v6 = vcombine.low %v5739_v46, %v5746_v24  ;;  %v5755_v3 = vrot.slane %v5747_v19, %v8529_v11  ;;  %v5814_v38 = vcombine.low %v4273_v60, %v4277_v31  ;;  %v5815_v1 = vcombine.low %v4281_v27, %v4285_v47 }
 0x568   : > { %5947 = vperm.xlu0 %7316, %v5714_v2   ;;  %v5816_v17 = vcombine.low %v4289_v52, %v4293_v32  ;;  %v5823_v37 = vrot.slane %v5813_v21, %v8529_v11  ;;  %v9318_v12 = vand.u32 127, %v641_v10 }
 0x569   : > { %v5762_v23 = vrot.slane %v5748_v6, %v8529_v11  ;;  %v5830_v41 = vrot.slane %v5814_v38, %v8529_v11  ;;  %v5837_v5 = vrot.slane %v5815_v1, %v8529_v11 }
 0x56a   : > { %v5844_v9 = vrot.slane %v5816_v17, %v8529_v11  ;;  %v9297_v44 = vpop.permute.xlu1 %5881  ;;  %v5964_v40 = vadd.s32 4294967288, %v9318_v12  ;;  %v5971_v16 = vadd.s32 4294967280, %v9318_v12  ;;  %v5962_v8 = vsub.s32 %v9318_v12, %v7742_v15 }
 0x56b   : > { %v5763_v57 = vcombine.low %v5755_v3, %v5762_v23  ;;  %v5845_v13 = vcombine.low %v5823_v37, %v5830_v41  ;;  %v5978_v33 = vadd.s32 4294967272, %v9318_v12  ;;  %v5985_v4 = vadd.s32 4294967264, %v9318_v12 }
 0x56c   : > { %v5846_v25 = vcombine.low %v5837_v5, %v5844_v9  ;;  %v5967_v49 = vsub.s32 %v5964_v40, %v7742_v15  ;;  %v5974_v51 = vsub.s32 %v5971_v16, %v7742_v15  ;;  %v5992_v31 = vadd.s32 4294967256, %v9318_v12 }
 0x56d   : > { %5950 = vperm.xlu0 %7316, %v5763_v57   ;;  %v5853_v35 = vrot.slane %v5845_v13, %v8529_v11  ;;  %v5981_v46 = vsub.s32 %v5978_v33, %v7742_v15  ;;  %v5963_v27 = vrot.slane %v5864_v62, %v5962_v8  ;;  %v5988_v2 = vsub.s32 %v5985_v4, %v7742_v15 }
 0x56e   : > { %v5860_v30 = vrot.slane %v5846_v25, %v8529_v11  ;;  %v9299_v63 = vpop.permute.xlu1 %5875  ;;  %v5968_v60 = vrot.slane %v5867_v22, %v5967_v49  ;;  %v5995_v32 = vsub.s32 %v5992_v31, %v7742_v15  ;;  %v5975_v6 = vrot.slane %v5870_v14, %v5974_v51 }
 0x56f   : > { %v5999_v3 = vadd.s32 4294967248, %v9318_v12  ;;  %v6006_v17 = vadd.s32 4294967240, %v9318_v12  ;;  %v5989_v5 = vrot.slane %v9299_v63, %v5988_v2  ;;  %v6013_v9 = vadd.s32 4294967232, %v9318_v12 }
 0x570   : > { %v5861_v34 = vcombine.low %v5853_v35, %v5860_v30  ;;  %v5970_v52 = vsel %vm5969_vm5, %v5968_v60, %v5963_v27  ;;  %v5982_v13 = vrot.slane %v9295_v45, %v5981_v46  ;;  %v6020_v35 = vadd.s32 4294967224, %v9318_v12 }
 0x571   : > { %v5977_v41 = vsel %vm5976_vm6, %v5975_v6, %v5970_v52  ;;  %v6002_v30 = vsub.s32 %v5999_v3, %v7742_v15  ;;  %v6009_v14 = vsub.s32 %v6006_v17, %v7742_v15  ;;  %v6016_v62 = vsub.s32 %v6013_v9, %v7742_v15 }
 0x572   : > { %5956 = vperm.xlu0 %7316, %v5861_v34   ;;  %v9301_v18 = vpop.permute.xlu1 %5884  ;;  %v5984_v34 = vsel %vm5983_vm7, %v5982_v13, %v5977_v41  ;;  %v6041_v33 = vadd.s32 4294967200, %v9318_v12 }
 0x573   : > { %v5991_v63 = vsel %vm5990_vm8, %v5989_v5, %v5984_v34 }
 0x574   : > { %v6044_v31 = vsub.s32 %v6041_v33, %v7742_v15 }
 0x576   : > { %v9303_v56 = vpop.permute.xlu1 %5878 }
 0x577   : > { %v5996_v25 = vrot.slane %v9303_v56, %v5995_v32 }
 0x579   : > { %v5998_v56 = vsel %vm5997_vm9, %v5996_v25, %v5991_v63 }
 0x57a   : > { %v9305_v36 = vpop.permute.xlu1 %5893 }
 0x57e   : > { %v9307_v53 = vpop.permute.xlu1 %5887 }
 0x580   : > { %v5921_v26 = vpop.permute.xlu0 %5920 }
 0x581   : > { %v6086_v47 = vrot.slane %v5921_v26, %v5981_v46  ;;  %v6062_v46 = vadd.s32 4294967176, %v9318_v12 }
 0x583   : > { %v6065_v6 = vsub.s32 %v6062_v46, %v7742_v15 }
 0x586   : > { %v9311_v7 = vpop.permute.xlu1 %5896 }
 0x58b   : > { %v9313_v29 = vpop.permute.xlu1 %5890 }
 0x591   : > { %v5918_v58 = vpop.permute.xlu1 %5917 }
 0x592   : > { %v6081_v59 = vrot.slane %v5918_v58, %v5974_v51  ;;  %v6023_v58 = vsub.s32 %v6020_v35, %v7742_v15  ;;  %v6048_v51 = vadd.s32 4294967192, %v9318_v12 }
 0x596   : > { %v9309_v54 = vpop.permute.xlu0 %5929 }
 0x597   : > { %v6101_v26 = vrot.slane %v9309_v54, %v6002_v30 }
 0x59c   : > { %v5912_v39 = vpop.permute.xlu1 %5911 }
 0x59d   : > { %v6072_v20 = vrot.slane %v5912_v39, %v5962_v8  ;;  %v6027_v39 = vadd.s32 4294967216, %v9318_v12 }
 0x5a1   : > { %v5924_v28 = vpop.permute.xlu0 %5923 }
 0x5a2   : > { %v6091_v38 = vrot.slane %v5924_v28, %v5988_v2  ;;  %v6051_v2 = vsub.s32 %v6048_v51, %v7742_v15 }
 0x5a7   : > { %v5915_v50 = vpop.permute.xlu1 %5914 }
 0x5a8   : > { %v6076_v61 = vrot.slane %v5915_v50, %v5967_v49  ;;  %v6010_v49 = vrot.slane %v9301_v18, %v6009_v14  ;;  %v6030_v18 = vsub.s32 %v6027_v39, %v7742_v15 }
 0x5aa   : > { %v6077_v48 = vsel %vm5969_vm5, %v6076_v61, %v6072_v20  ;;  %v6017_v61 = vrot.slane %v9307_v53, %v6016_v62  ;;  %v6034_v20 = vadd.s32 4294967208, %v9318_v12  ;;  %v6031_v52 = vrot.slane %v9305_v36, %v6030_v18 }
 0x5ab   : > { %v6082_v24 = vsel %vm5976_vm6, %v6081_v59, %v6077_v48 }
 0x5ac   : > { %v9315_v43 = vpop.permute.xlu0 %5932  ;;  %v6087_v21 = vsel %vm5983_vm7, %v6086_v47, %v6082_v24  ;;  %v6037_v27 = vsub.s32 %v6034_v20, %v7742_v15 }
 0x5ad   : > { %v6092_v57 = vsel %vm5990_vm8, %v6091_v38, %v6087_v21  ;;  %v6106_v54 = vrot.slane %v9315_v43, %v6009_v14  ;;  %v6055_v43 = vadd.s32 4294967184, %v9318_v12 }
 0x5ae   : > { %v6038_v41 = vrot.slane %v9311_v7, %v6037_v27 }
 0x5b2   : > { %v9341_v1 = vpop.permute.xlu1 %5899 }
 0x5b7   : > { %v5927_v0 = vpop.permute.xlu0 %5926 }
 0x5b8   : > { %v6096_v37 = vrot.slane %v5927_v0, %v5995_v32  ;;  %v6003_v0 = vrot.slane %v9297_v44, %v6002_v30  ;;  %v6024_v44 = vrot.slane %v9313_v29, %v6023_v58  ;;  %v6058_v32 = vsub.s32 %v6055_v43, %v7742_v15 }
 0x5ba   : > { %v6097_v22 = vsel %vm5997_vm9, %v6096_v37, %v6092_v57  ;;  %v6005_v8 = vsel %vm6004_vm10, %v6003_v0, %v5998_v56 }
 0x5bb   : > { %v6102_v40 = vsel %vm6004_vm10, %v6101_v26, %v6097_v22  ;;  %v6012_v53 = vsel %vm6011_vm11, %v6010_v49, %v6005_v8 }
 0x5bc   : > { %v6019_v29 = vsel %vm6018_vm12, %v6017_v61, %v6012_v53 }
 0x5bd   : > { %v9357_v28 = vpop.permute.xlu1 %5902  ;;  %v6026_v47 = vsel %vm6025_vm13, %v6024_v44, %v6019_v29 }
 0x5be   : > { %v6033_v17 = vsel %vm6032_vm14, %v6031_v52, %v6026_v47  ;;  %v6052_v36 = vrot.slane %v9357_v28, %v6051_v2 }
 0x5bf   : > { %v6040_v57 = vsel %vm6039_vm15, %v6038_v41, %v6033_v17 }
 0x5c2   : > { %v9321_v55 = vpop.permute.xlu0 %5941 }
 0x5c3   : > { %v6121_v24 = vrot.slane %v9321_v55, %v6030_v18  ;;  %v6045_v55 = vrot.slane %v9341_v1, %v6044_v31 }
 0x5c5   : > { %v6047_v25 = vsel %vm6046_vm0, %v6045_v55, %v6040_v57 }
 0x5c6   : > { %v6054_v7 = vsel %vm6053_vm1, %v6052_v36, %v6047_v25 }
 0x5c7   : > { %v5906_v48 = vpop.permute.xlu1 %5905 }
 0x5c8   : > { %v6059_v9 = vrot.slane %v5906_v48, %v6058_v32 }
 0x5ca   : > { %v6061_v34 = vsel %vm6060_vm2, %v6059_v9, %v6054_v7 }
 0x5cc   : > { %v9327_v42 = vpop.permute.xlu0 %5935 }
 0x5cd   : > { %v6111_v50 = vrot.slane %v9327_v42, %v6016_v62  ;;  %v6107_v42 = vsel %vm6011_vm11, %v6106_v54, %v6102_v40 }
 0x5cf   : > { %v6112_v4 = vsel %vm6018_vm12, %v6111_v50, %v6107_v42 }
 0x5d2   : > { %v5909_v37 = vpop.permute.xlu1 %5908 }
 0x5d7   : > { %v9335_v19 = vpop.permute.xlu0 %5944 }
 0x5d8   : > { %v6126_v3 = vrot.slane %v9335_v19, %v6037_v27  ;;  %v6066_v19 = vrot.slane %v5909_v37, %v6065_v6 }
 0x5da   : > { %v6068_v22 = vsel %vm6067_vm3, %v6066_v19, %v6061_v34 }
 0x5dc   : > { %v5939_v23 = vpop.permute.xlu0 %5938 }
 0x5dd   : > { %v6116_v16 = vrot.slane %v5939_v23, %v6023_v58 }
 0x5df   : > { %v6117_v60 = vsel %vm6025_vm13, %v6116_v16, %v6112_v4 }
 0x5e0   : > { %v6122_v21 = vsel %vm6032_vm14, %v6121_v24, %v6117_v60 }
 0x5e1   : > { %v9359_v45 = vpop.permute.xlu0 %5953  ;;  %v6127_v5 = vsel %vm6039_vm15, %v6126_v3, %v6122_v21 }
 0x5e2   : > { %v6141_v1 = vrot.slane %v9359_v45, %v6058_v32 }
 0x5e7   : > { %v5948_v59 = vpop.permute.xlu0 %5947 }
 0x5e8   : > { %v6131_v12 = vrot.slane %v5948_v59, %v6044_v31 }
 0x5ea   : > { %v6132_v15 = vsel %vm6046_vm0, %v6131_v12, %v6127_v5 }
 0x5ec   : > { %v5951_v38 = vpop.permute.xlu0 %5950 }
 0x5ed   : > { %v6136_v23 = vrot.slane %v5951_v38, %v6051_v2 }
 0x5ef   : > { %v6137_v13 = vsel %vm6053_vm1, %v6136_v23, %v6132_v15 }
 0x5f0   : > { %v6142_v14 = vsel %vm6060_vm2, %v6141_v1, %v6137_v13 }
 0x5f1   : > { %v5957_v35 = vpop.permute.xlu0 %5956 }
 0x5f2   : > { %v6146_v30 = vrot.slane %v5957_v35, %v6065_v6 }
 0x5f4   : > { %v6147_v63 = vsel %vm6067_vm3, %v6146_v30, %v6142_v14 }
 0x5f5   : > { %v6148_v62 = vcombine.low %v6068_v22, %v6147_v63 }
 0x5f7   : > { %v6155_v26 = vrot.slane %v6148_v62, %v8529_v11 }
 0x5f9   : > { %v6162_v28 = vrot.slane %v6155_v26, %v8529_v11 }
 0x5fb   : > { %6168 = vst.msk [vmem:[%s328_s26] sm:$0x3] %vm6166_vm4, %v6162_v28 }
 0x5fc   : > { %7451 = shalt.err (!%p7448_p3)
}
 0x5fd   : > { %s7452_s24 = scalar_lea.hbm %s9401_s30, 32  ;;  %s7456_s25 = scalar_lea.hbm %s9454_s9, 64 }
 0x5fe   : > { %p7453_p4 = scmp.ne.s32.totalorder %s9401_s30, %s7452_s24  ;;  %p7457_p9 = scmp.lt.u32.totalorder %s9401_s30, %s9454_s9 }
 0x5ff   : > { %p7458_p10 = scmp.lt.u32.totalorder %s7456_s25, %s7452_s24  ;;  %p7460_p12 = scmp.lt.u32.totalorder %s7452_s24, %s9401_s30 }
 0x600   : > { %p7454_p7 = pnand %p7453_p4, %p7593_p5 }
 0x601   : > { %p7459_p11 = por %p7458_p10, %p7457_p9 }
 0x602   : > { %p7455_p8 = pneg %p7454_p7 }
 0x603   : > { %p7461_p13 = por %p7460_p12, %p7459_p11 }
 0x605   : > { %p7462_p0 = pnand %p7461_p13, %p7455_p8 }
 0x607   : > { %7465 = shalt.err (!%p7462_p0)
}
 0x608   : > { %7274 = dma.vmem_to_hbm [thread:$0]  (%p7593_p5), %s9403_s27, 32, %s9401_s30, %s6170_s15  }
 0x609 PF: > { %p7280_p1 = scmp.ge.s32.totalorder %s7500_s14, 2  ;;  %s6196_s29 = sand.u32 1, %s7488_s11  }
 0x60a   : > { %s6197_s8 = scalar_lea.sflag [#allocation4], %s6196_s29 }
 0x60b   : > { %p7277_p2 = pnand %p7280_p1, %p7597_p6 }
 0x60d   : > { %7483 = dma.done.wait (!%p7277_p2), %s6197_s8, 32  }
 0x60e   : > { %7485 = vsyncadd (!%p7277_p2), %s6197_s8, 4294967264  ;;  %p21_p3 = scmp.ge.s32.totalorder %s7581_s16, 4   ;;  %s9461_s11 = smov %s7492_s12 }
 0x60f   : > { %s9462_s12 = smov %s7496_s13  ;;  %s9463_s13 = smov %s7591_s19 }
 0x610   : > { %s9464_s14 = smov %s7581_s16  ;;  %23 = sbr.rel (!%p21_p3) target bundleno = 6 (0x6), region = 93 }
 0x617   :  { %6202 = vsyncpa [#allocation4], 1 }
 0x618   :  { %6204 = vsyncpa [#allocation4 + $0x1], 1 }

</bundles_post_ra>
